<compile_context>
chip_gen: v7x
topology: tpu7x:2x2x1
jax: 0.10.0
libtpu: 0.0.40
codegen_flags: <defaults>
</compile_context>

<pallas_src>
import functools

import jax
import jax.numpy as jnp
from jax.experimental import pallas as pl
from jax.experimental.pallas import tpu as pltpu


def se_basic_block_kernel(xp_ref, w1_ref, b1_ref, w2_ref, b2_ref,
                          wfc1_ref, bfc1_ref, wfc2_ref, bfc2_ref,
                          o_ref, pad_scr, *, H, W, Cin, P, d):
    # xp_ref  : (1, H+2d, W+2d, Cin) f32   zero-padded input for this batch element
    # w1_ref  : (9*Cin, 2*P) bf16          [conv1*bn1_scale | 1x1 shortcut @ center tap]
    # w2_ref  : (9*P,  P)  bf16            conv2 weight (bn2_scale folded), im2col layout
    # b1/b2   : (1, P) f32                 folded BatchNorm biases
    # wfc*    : SE MLP weights/biases (f32)
    # pad_scr : (H+2d, W+2d, P) bf16       conv1 activations, spatially padded
    Hp, Wp = H + 2 * d, W + 2 * d
    f32 = jnp.float32
    bf16 = jnp.bfloat16

    # Zero only the d-wide border of the padded scratch (interior is fully
    # overwritten each grid step).  Not guarded by program_id so it remains
    # correct when the batch axis is split across TensorCores ("parallel").
    if d > 0:
        pad_scr[0:d, :, :] = jnp.zeros((d, Wp, P), bf16)
        pad_scr[d + H:Hp, :, :] = jnp.zeros((d, Wp, P), bf16)
        pad_scr[d:d + H, 0:d, :] = jnp.zeros((H, d, P), bf16)
        pad_scr[d:d + H, d + W:Wp, :] = jnp.zeros((H, d, P), bf16)

    xp = xp_ref[0]                                              # (Hp, Wp, Cin)

    # ---- conv1 (+ fused 1x1 shortcut) : single im2col matmul on the MXU ----
    p1 = jnp.concatenate(
        [xp[kh * d:kh * d + H, kw * d:kw * d + W, :]
         for kh in range(3) for kw in range(3)], axis=-1)       # (H, W, 9*Cin)
    acc1 = jnp.dot(p1.reshape(H * W, 9 * Cin).astype(bf16), w1_ref[...],
                   preferred_element_type=f32)                  # (H*W, 2*P)
    y1 = jnp.maximum(acc1[:, :P] + b1_ref[0], 0.0)              # conv1 + bn1 + relu
    resid = acc1[:, P:]                                         # 1x1 shortcut (f32)
    pad_scr[d:d + H, d:d + W, :] = y1.reshape(H, W, P).astype(bf16)

    # ---- conv2 + bn2 + relu : single im2col matmul on the MXU ----
    y1p = pad_scr[...]                                          # (Hp, Wp, P) bf16
    p2 = jnp.concatenate(
        [y1p[kh * d:kh * d + H, kw * d:kw * d + W, :]
         for kh in range(3) for kw in range(3)], axis=-1)       # (H, W, 9*P)
    acc2 = jnp.dot(p2.reshape(H * W, 9 * P), w2_ref[...],
                   preferred_element_type=f32)                  # (H*W, P)
    y2 = jnp.maximum(acc2 + b2_ref[0], 0.0)

    # ---- SE gate: global average pool -> fc1 -> relu -> fc2 -> sigmoid ----
    pooled = jnp.sum(y2, axis=0, keepdims=True) * (1.0 / float(H * W))   # (1, P)
    hidden = jnp.maximum(
        jnp.dot(pooled, wfc1_ref[...], preferred_element_type=f32) + bfc1_ref[0],
        0.0)
    gate = jax.nn.sigmoid(
        jnp.dot(hidden, wfc2_ref[...], preferred_element_type=f32) + bfc2_ref[0])  # (1, P)

    # ---- SE scale, add shortcut, final relu ----
    out = jnp.maximum(y2 * gate + resid, 0.0)                   # (H*W, P)
    o_ref[0] = out.reshape(H, W, P).astype(o_ref.dtype)


def se_basic_block(x_nchw, params, dilation=1):
    """x_nchw: (B, Cin, H, W) float32. Returns (B, P, H, W) float32 (stride=1)."""
    d = int(dilation)
    x = jnp.transpose(x_nchw, (0, 2, 3, 1)).astype(jnp.float32)     # NHWC
    B, H, W, Cin = x.shape
    P = params["w1"].shape[-1]
    hid = params["wfc1"].shape[-1]

    xp = jnp.pad(x, ((0, 0), (d, d), (d, d), (0, 0)))
    Hp, Wp = H + 2 * d, W + 2 * d

    bf16 = jnp.bfloat16
    # Fold bn1 scale into conv1 weight; append the 1x1 shortcut on the center-tap
    # rows so a single im2col matmul yields [conv1 pre-bias | residual].
    w1 = (params["w1"] * params["bn1_scale"]).reshape(9 * Cin, P)
    wsc = params.get("wsc")
    if wsc is None:                         # identity shortcut (inplanes == planes)
        wsc = jnp.eye(Cin, P, dtype=jnp.float32)
    center = (1 * 3 + 1) * Cin              # (kh=1, kw=1) tap = unpadded input slice
    wsc_rows = jnp.zeros((9 * Cin, P), jnp.float32).at[center:center + Cin, :].set(wsc)
    w1sc = jnp.concatenate([w1, wsc_rows], axis=-1).astype(bf16)    # (9*Cin, 2*P)

    w2 = (params["w2"] * params["bn2_scale"]).reshape(9 * P, P).astype(bf16)
    b1 = params["bn1_bias"].reshape(1, P)
    b2 = params["bn2_bias"].reshape(1, P)
    wfc1 = params["wfc1"]
    bfc1 = params["bfc1"].reshape(1, hid)
    wfc2 = params["wfc2"]
    bfc2 = params["bfc2"].reshape(1, P)

    kern = functools.partial(se_basic_block_kernel, H=H, W=W, Cin=Cin, P=P, d=d)

    out_nhwc = pl.pallas_call(
        kern,
        out_shape=jax.ShapeDtypeStruct((B, H, W, P), jnp.float32),
        grid_spec=pltpu.PrefetchScalarGridSpec(
            num_scalar_prefetch=0,
            grid=(B,),
            in_specs=[
                pl.BlockSpec((1, Hp, Wp, Cin), lambda b: (b, 0, 0, 0)),
                pl.BlockSpec((9 * Cin, 2 * P), lambda b: (0, 0)),
                pl.BlockSpec((1, P), lambda b: (0, 0)),
                pl.BlockSpec((9 * P, P), lambda b: (0, 0)),
                pl.BlockSpec((1, P), lambda b: (0, 0)),
                pl.BlockSpec((P, hid), lambda b: (0, 0)),
                pl.BlockSpec((1, hid), lambda b: (0, 0)),
                pl.BlockSpec((hid, P), lambda b: (0, 0)),
                pl.BlockSpec((1, P), lambda b: (0, 0)),
            ],
            out_specs=pl.BlockSpec((1, H, W, P), lambda b: (b, 0, 0, 0)),
            scratch_shapes=[
                pltpu.VMEM((Hp, Wp, P), jnp.bfloat16),   # padded conv1 output (bf16)
            ],
        ),
        # Batch elements are independent: "parallel" lets v7x shard the batch
        # grid across its 2 TensorCores (near no-op on single-TC v5e/v6e).
        compiler_params=pltpu.CompilerParams(dimension_semantics=("parallel",)),
    )(xp, w1sc, b1, w2, b2, wfc1, bfc1, wfc2, bfc2)

    return jnp.transpose(out_nhwc, (0, 3, 1, 2))  # back to NCHW


def reference_forward(x_nchw, params, dilation=1):
    """Pure-JAX reference (NHWC math) matching the PyTorch forward (eval-mode BN)."""
    d = int(dilation)
    x = jnp.transpose(x_nchw, (0, 2, 3, 1)).astype(jnp.float32)

    def conv3(inp, w):
        return jax.lax.conv_general_dilated(
            inp, w, window_strides=(1, 1), padding=[(d, d), (d, d)],
            rhs_dilation=(d, d), dimension_numbers=("NHWC", "HWIO", "NHWC"))

    out = conv3(x, params["w1"]) * params["bn1_scale"] + params["bn1_bias"]
    out = jnp.maximum(out, 0.0)
    out = conv3(out, params["w2"]) * params["bn2_scale"] + params["bn2_bias"]
    out = jnp.maximum(out, 0.0)

    y = out.mean(axis=(1, 2))                                  # (B, P)
    y = jnp.maximum(y @ params["wfc1"] + params["bfc1"], 0.0)
    y = jax.nn.sigmoid(y @ params["wfc2"] + params["bfc2"])    # (B, P)

    resid = jnp.einsum("bhwc,cp->bhwp", x, params["wsc"])
    out = jnp.maximum(out * y[:, None, None, :] + resid, 0.0)
    return jnp.transpose(out, (0, 3, 1, 2))


def make_params(key, inplanes, planes, reduction):
    hid = planes // reduction
    ks = jax.random.split(key, 12)
    eps = 1e-5

    def fold_bn(gamma, beta, mean, var):
        scale = gamma / jnp.sqrt(var + eps)
        return scale, beta - mean * scale

    g1 = 1.0 + 0.1 * jax.random.normal(ks[4], (planes,), jnp.float32)
    be1 = 0.1 * jax.random.normal(ks[5], (planes,), jnp.float32)
    m1 = 0.1 * jax.random.normal(ks[6], (planes,), jnp.float32)
    v1 = jax.random.uniform(ks[7], (planes,), jnp.float32, 0.5, 1.5)
    g2 = 1.0 + 0.1 * jax.random.normal(ks[8], (planes,), jnp.float32)
    be2 = 0.1 * jax.random.normal(ks[9], (planes,), jnp.float32)
    m2 = 0.1 * jax.random.normal(ks[10], (planes,), jnp.float32)
    v2 = jax.random.uniform(ks[11], (planes,), jnp.float32, 0.5, 1.5)
    s1, b1 = fold_bn(g1, be1, m1, v1)
    s2, b2 = fold_bn(g2, be2, m2, v2)

    return {
        "w1": 0.2 * jax.random.normal(ks[0], (3, 3, inplanes, planes), jnp.float32),
        "w2": 0.2 * jax.random.normal(ks[1], (3, 3, planes, planes), jnp.float32),
        "bn1_scale": s1, "bn1_bias": b1,
        "bn2_scale": s2, "bn2_bias": b2,
        "wfc1": 0.3 * jax.random.normal(ks[2], (planes, hid), jnp.float32),
        "bfc1": 0.1 * jnp.ones((hid,), jnp.float32),
        "wfc2": 0.3 * jax.random.normal(ks[3], (hid, planes), jnp.float32),
        "bfc2": 0.1 * jnp.ones((planes,), jnp.float32),
        "wsc": 0.2 * jax.random.normal(jax.random.fold_in(key, 99),
                                       (inplanes, planes), jnp.float32),
    }


if __name__ == "__main__":
    B, inplanes, planes, H, W = 2, 4, 16, 16, 16
    reduction, dilation = 8, 1

    key = jax.random.PRNGKey(0)
    kx, kp = jax.random.split(key)
    x = jax.random.normal(kx, (B, inplanes, H, W), jnp.float32)   # NCHW like PyTorch
    params = make_params(kp, inplanes, planes, reduction)

    out = se_basic_block(x, params, dilation=dilation)
    out = jax.block_until_ready(out)

    ref = jax.block_until_ready(reference_forward(x, params, dilation=dilation))
    assert out.shape == (B, planes, H, W)
    # bf16 MXU operands (f32 accumulation) -> slightly looser tolerance than pure f32.
    assert jnp.allclose(out, ref, rtol=5e-2, atol=5e-2), float(jnp.abs(out - ref).max())

    print("KERNEL_OK")
</pallas_src>

<mosaic_0001>
module attributes {stable_mosaic.version = 11 : i64} {
  func.func @se_basic_block_kernel(%arg0: i32, %arg1: memref<1x18x18x4xf32, #tpu.memory_space<vmem>>, %arg2: memref<36x32xbf16, #tpu.memory_space<vmem>>, %arg3: memref<1x16xf32, #tpu.memory_space<vmem>>, %arg4: memref<144x16xbf16, #tpu.memory_space<vmem>>, %arg5: memref<1x16xf32, #tpu.memory_space<vmem>>, %arg6: memref<16x2xf32, #tpu.memory_space<vmem>>, %arg7: memref<1x2xf32, #tpu.memory_space<vmem>>, %arg8: memref<2x16xf32, #tpu.memory_space<vmem>>, %arg9: memref<1x16xf32, #tpu.memory_space<vmem>>, %arg10: memref<1x16x16x16xf32, #tpu.memory_space<vmem>>, %arg11: memref<18x18x16xbf16, #tpu.memory_space<vmem>>) attributes {dimension_semantics = [#tpu.dimension_semantics<parallel>], iteration_bounds = array<i64: 2>, scalar_prefetch = 0 : i64, scratch_operands = 1 : i64, tpu.core_type = #tpu.core_type<tc>, window_params = [{transform_indices = @transform_0, window_bounds = array<i64: 1, 18, 18, 4>}, {pipeline_mode = #tpu.pipeline_mode<synchronous>, transform_indices = @transform_1, window_bounds = array<i64: 36, 32>}, {pipeline_mode = #tpu.pipeline_mode<synchronous>, transform_indices = @transform_2, window_bounds = array<i64: 1, 16>}, {pipeline_mode = #tpu.pipeline_mode<synchronous>, transform_indices = @transform_3, window_bounds = array<i64: 144, 16>}, {pipeline_mode = #tpu.pipeline_mode<synchronous>, transform_indices = @transform_4, window_bounds = array<i64: 1, 16>}, {pipeline_mode = #tpu.pipeline_mode<synchronous>, transform_indices = @transform_5, window_bounds = array<i64: 16, 2>}, {pipeline_mode = #tpu.pipeline_mode<synchronous>, transform_indices = @transform_6, window_bounds = array<i64: 1, 2>}, {pipeline_mode = #tpu.pipeline_mode<synchronous>, transform_indices = @transform_7, window_bounds = array<i64: 2, 16>}, {pipeline_mode = #tpu.pipeline_mode<synchronous>, transform_indices = @transform_8, window_bounds = array<i64: 1, 16>}, {transform_indices = @transform_9, window_bounds = array<i64: 1, 16, 16, 16>}]} {
    %cst = arith.constant 0.000000e+00 : bf16
    %0 = vector.broadcast %cst : bf16 to vector<1x18x16xbf16>
    %c0 = arith.constant 0 : index
    %c0_0 = arith.constant 0 : index
    %c0_1 = arith.constant 0 : index
    %1 = vector.load %arg11[%c0, %c0_0, %c0_1] : memref<18x18x16xbf16, #tpu.memory_space<vmem>>, vector<1x18x16xbf16>
    tpu.vector_store %arg11[%c0, %c0_0, %c0_1], %0 {strides = array<i32>} : memref<18x18x16xbf16, #tpu.memory_space<vmem>>, vector<1x18x16xbf16>,
    %cst_2 = arith.constant 0.000000e+00 : bf16
    %2 = vector.broadcast %cst_2 : bf16 to vector<1x18x16xbf16>
    %c17 = arith.constant 17 : index
    %c0_3 = arith.constant 0 : index
    %c0_4 = arith.constant 0 : index
    %3 = vector.load %arg11[%c17, %c0_3, %c0_4] : memref<18x18x16xbf16, #tpu.memory_space<vmem>>, vector<1x18x16xbf16>
    tpu.vector_store %arg11[%c17, %c0_3, %c0_4], %2 {strides = array<i32>} : memref<18x18x16xbf16, #tpu.memory_space<vmem>>, vector<1x18x16xbf16>,
    %cst_5 = arith.constant 0.000000e+00 : bf16
    %4 = vector.broadcast %cst_5 : bf16 to vector<16x1x16xbf16>
    %c1 = arith.constant 1 : index
    %c0_6 = arith.constant 0 : index
    %c0_7 = arith.constant 0 : index
    %5 = vector.load %arg11[%c1, %c0_6, %c0_7] : memref<18x18x16xbf16, #tpu.memory_space<vmem>>, vector<16x1x16xbf16>
    tpu.vector_store %arg11[%c1, %c0_6, %c0_7], %4 {strides = array<i32>} : memref<18x18x16xbf16, #tpu.memory_space<vmem>>, vector<16x1x16xbf16>,
    %cst_8 = arith.constant 0.000000e+00 : bf16
    %6 = vector.broadcast %cst_8 : bf16 to vector<16x1x16xbf16>
    %c1_9 = arith.constant 1 : index
    %c17_10 = arith.constant 17 : index
    %c0_11 = arith.constant 0 : index
    %7 = vector.load %arg11[%c1_9, %c17_10, %c0_11] : memref<18x18x16xbf16, #tpu.memory_space<vmem>>, vector<16x1x16xbf16>
    tpu.vector_store %arg11[%c1_9, %c17_10, %c0_11], %6 {strides = array<i32>} : memref<18x18x16xbf16, #tpu.memory_space<vmem>>, vector<16x1x16xbf16>,
    %c0_12 = arith.constant 0 : index
    %c0_13 = arith.constant 0 : index
    %c0_14 = arith.constant 0 : index
    %c0_15 = arith.constant 0 : index
    %8 = vector.load %arg1[%c0_12, %c0_13, %c0_14, %c0_15] : memref<1x18x18x4xf32, #tpu.memory_space<vmem>>, vector<1x18x18x4xf32>
    %9 = vector.shape_cast %8 : vector<1x18x18x4xf32> to vector<18x18x4xf32>
    %10 = vector.extract_strided_slice %9 {offsets = [0, 0, 0], sizes = [16, 16, 4], strides = [1, 1, 1]} : vector<18x18x4xf32> to vector<16x16x4xf32>
    %11 = vector.extract_strided_slice %9 {offsets = [0, 1, 0], sizes = [16, 16, 4], strides = [1, 1, 1]} : vector<18x18x4xf32> to vector<16x16x4xf32>
    %12 = vector.extract_strided_slice %9 {offsets = [0, 2, 0], sizes = [16, 16, 4], strides = [1, 1, 1]} : vector<18x18x4xf32> to vector<16x16x4xf32>
    %13 = vector.extract_strided_slice %9 {offsets = [1, 0, 0], sizes = [16, 16, 4], strides = [1, 1, 1]} : vector<18x18x4xf32> to vector<16x16x4xf32>
    %14 = vector.extract_strided_slice %9 {offsets = [1, 1, 0], sizes = [16, 16, 4], strides = [1, 1, 1]} : vector<18x18x4xf32> to vector<16x16x4xf32>
    %15 = vector.extract_strided_slice %9 {offsets = [1, 2, 0], sizes = [16, 16, 4], strides = [1, 1, 1]} : vector<18x18x4xf32> to vector<16x16x4xf32>
    %16 = vector.extract_strided_slice %9 {offsets = [2, 0, 0], sizes = [16, 16, 4], strides = [1, 1, 1]} : vector<18x18x4xf32> to vector<16x16x4xf32>
    %17 = vector.extract_strided_slice %9 {offsets = [2, 1, 0], sizes = [16, 16, 4], strides = [1, 1, 1]} : vector<18x18x4xf32> to vector<16x16x4xf32>
    %18 = vector.extract_strided_slice %9 {offsets = [2, 2, 0], sizes = [16, 16, 4], strides = [1, 1, 1]} : vector<18x18x4xf32> to vector<16x16x4xf32>
    %19 = tpu.concatenate %10, %11, %12, %13, %14, %15, %16, %17, %18 in 2 : vector<16x16x4xf32>, vector<16x16x4xf32>, vector<16x16x4xf32>, vector<16x16x4xf32>, vector<16x16x4xf32>, vector<16x16x4xf32>, vector<16x16x4xf32>, vector<16x16x4xf32>, vector<16x16x4xf32> -> vector<16x16x36xf32>
    %20 = vector.shape_cast %19 : vector<16x16x36xf32> to vector<256x36xf32>
    %21 = arith.truncf %20 : vector<256x36xf32> to vector<256x36xbf16>
    %c0_16 = arith.constant 0 : index
    %c0_17 = arith.constant 0 : index
    %22 = vector.load %arg2[%c0_16, %c0_17] : memref<36x32xbf16, #tpu.memory_space<vmem>>, vector<36x32xbf16>
    %cst_18 = arith.constant dense<0.000000e+00> : vector<256x32xf32>
    %23 = tpu.matmul %21, %22, %cst_18 {dimension_numbers = #tpu.dot_dimension_numbers<[1], [0], [0], [1], [0, 0, 1, 1], [], []>} : vector<256x36xbf16>, vector<36x32xbf16>, vector<256x32xf32> -> vector<256x32xf32>
    %24 = vector.extract_strided_slice %23 {offsets = [0, 0], sizes = [256, 16], strides = [1, 1]} : vector<256x32xf32> to vector<256x16xf32>
    %c0_19 = arith.constant 0 : index
    %c0_20 = arith.constant 0 : index
    %25 = vector.load %arg3[%c0_19, %c0_20] : memref<1x16xf32, #tpu.memory_space<vmem>>, vector<1x16xf32>
    %26 = vector.shape_cast %25 : vector<1x16xf32> to vector<16xf32>
    %27 = vector.shape_cast %26 : vector<16xf32> to vector<1x16xf32>
    %28 = vector.broadcast %27 : vector<1x16xf32> to vector<256x16xf32>
    %29 = arith.addf %24, %28 : vector<256x16xf32>
    %cst_21 = arith.constant 0.000000e+00 : f32
    %30 = vector.broadcast %cst_21 : f32 to vector<256x16xf32>
    %31 = arith.maximumf %29, %30 : vector<256x16xf32>
    %32 = vector.extract_strided_slice %23 {offsets = [0, 16], sizes = [256, 16], strides = [1, 1]} : vector<256x32xf32> to vector<256x16xf32>
    %33 = vector.shape_cast %31 : vector<256x16xf32> to vector<16x16x16xf32>
    %34 = arith.truncf %33 : vector<16x16x16xf32> to vector<16x16x16xbf16>
    %c1_22 = arith.constant 1 : index
    %c1_23 = arith.constant 1 : index
    %c0_24 = arith.constant 0 : index
    %35 = vector.load %arg11[%c1_22, %c1_23, %c0_24] : memref<18x18x16xbf16, #tpu.memory_space<vmem>>, vector<16x16x16xbf16>
    tpu.vector_store %arg11[%c1_22, %c1_23, %c0_24], %34 {strides = array<i32>} : memref<18x18x16xbf16, #tpu.memory_space<vmem>>, vector<16x16x16xbf16>,
    %c0_25 = arith.constant 0 : index
    %c0_26 = arith.constant 0 : index
    %c0_27 = arith.constant 0 : index
    %36 = vector.load %arg11[%c0_25, %c0_26, %c0_27] : memref<18x18x16xbf16, #tpu.memory_space<vmem>>, vector<18x18x16xbf16>
    %37 = vector.extract_strided_slice %36 {offsets = [0, 0, 0], sizes = [16, 16, 16], strides = [1, 1, 1]} : vector<18x18x16xbf16> to vector<16x16x16xbf16>
    %38 = vector.extract_strided_slice %36 {offsets = [0, 1, 0], sizes = [16, 16, 16], strides = [1, 1, 1]} : vector<18x18x16xbf16> to vector<16x16x16xbf16>
    %39 = vector.extract_strided_slice %36 {offsets = [0, 2, 0], sizes = [16, 16, 16], strides = [1, 1, 1]} : vector<18x18x16xbf16> to vector<16x16x16xbf16>
    %40 = vector.extract_strided_slice %36 {offsets = [1, 0, 0], sizes = [16, 16, 16], strides = [1, 1, 1]} : vector<18x18x16xbf16> to vector<16x16x16xbf16>
    %41 = vector.extract_strided_slice %36 {offsets = [1, 1, 0], sizes = [16, 16, 16], strides = [1, 1, 1]} : vector<18x18x16xbf16> to vector<16x16x16xbf16>
    %42 = vector.extract_strided_slice %36 {offsets = [1, 2, 0], sizes = [16, 16, 16], strides = [1, 1, 1]} : vector<18x18x16xbf16> to vector<16x16x16xbf16>
    %43 = vector.extract_strided_slice %36 {offsets = [2, 0, 0], sizes = [16, 16, 16], strides = [1, 1, 1]} : vector<18x18x16xbf16> to vector<16x16x16xbf16>
    %44 = vector.extract_strided_slice %36 {offsets = [2, 1, 0], sizes = [16, 16, 16], strides = [1, 1, 1]} : vector<18x18x16xbf16> to vector<16x16x16xbf16>
    %45 = vector.extract_strided_slice %36 {offsets = [2, 2, 0], sizes = [16, 16, 16], strides = [1, 1, 1]} : vector<18x18x16xbf16> to vector<16x16x16xbf16>
    %46 = tpu.concatenate %37, %38, %39, %40, %41, %42, %43, %44, %45 in 2 : vector<16x16x16xbf16>, vector<16x16x16xbf16>, vector<16x16x16xbf16>, vector<16x16x16xbf16>, vector<16x16x16xbf16>, vector<16x16x16xbf16>, vector<16x16x16xbf16>, vector<16x16x16xbf16>, vector<16x16x16xbf16> -> vector<16x16x144xbf16>
    %47 = vector.shape_cast %46 : vector<16x16x144xbf16> to vector<256x144xbf16>
    %c0_28 = arith.constant 0 : index
    %c0_29 = arith.constant 0 : index
    %48 = vector.load %arg4[%c0_28, %c0_29] : memref<144x16xbf16, #tpu.memory_space<vmem>>, vector<144x16xbf16>
    %cst_30 = arith.constant dense<0.000000e+00> : vector<256x16xf32>
    %49 = tpu.matmul %47, %48, %cst_30 {dimension_numbers = #tpu.dot_dimension_numbers<[1], [0], [0], [1], [0, 0, 1, 1], [], []>} : vector<256x144xbf16>, vector<144x16xbf16>, vector<256x16xf32> -> vector<256x16xf32>
    %c0_31 = arith.constant 0 : index
    %c0_32 = arith.constant 0 : index
    %50 = vector.load %arg5[%c0_31, %c0_32] : memref<1x16xf32, #tpu.memory_space<vmem>>, vector<1x16xf32>
    %51 = vector.shape_cast %50 : vector<1x16xf32> to vector<16xf32>
    %52 = vector.shape_cast %51 : vector<16xf32> to vector<1x16xf32>
    %53 = vector.broadcast %52 : vector<1x16xf32> to vector<256x16xf32>
    %54 = arith.addf %49, %53 : vector<256x16xf32>
    %cst_33 = arith.constant 0.000000e+00 : f32
    %55 = vector.broadcast %cst_33 : f32 to vector<256x16xf32>
    %56 = arith.maximumf %54, %55 : vector<256x16xf32>
    %cst_34 = arith.constant dense<0.000000e+00> : vector<16xf32>
    %57 = vector.multi_reduction <add>, %56, %cst_34 [0] : vector<256x16xf32> to vector<16xf32>
    %58 = vector.shape_cast %57 : vector<16xf32> to vector<1x16xf32>
    %cst_35 = arith.constant 3.906250e-03 : f32
    %59 = vector.broadcast %cst_35 : f32 to vector<1x16xf32>
    %60 = arith.mulf %58, %59 : vector<1x16xf32>
    %c0_36 = arith.constant 0 : index
    %c0_37 = arith.constant 0 : index
    %61 = vector.load %arg6[%c0_36, %c0_37] : memref<16x2xf32, #tpu.memory_space<vmem>>, vector<16x2xf32>
    %cst_38 = arith.constant dense<0.000000e+00> : vector<1x2xf32>
    %62 = tpu.matmul %60, %61, %cst_38 {dimension_numbers = #tpu.dot_dimension_numbers<[1], [0], [0], [1], [0, 0, 1, 1], [], []>} : vector<1x16xf32>, vector<16x2xf32>, vector<1x2xf32> -> vector<1x2xf32>
    %c0_39 = arith.constant 0 : index
    %c0_40 = arith.constant 0 : index
    %63 = vector.load %arg7[%c0_39, %c0_40] : memref<1x2xf32, #tpu.memory_space<vmem>>, vector<1x2xf32>
    %64 = vector.shape_cast %63 : vector<1x2xf32> to vector<2xf32>
    %65 = vector.shape_cast %64 : vector<2xf32> to vector<1x2xf32>
    %66 = arith.addf %62, %65 : vector<1x2xf32>
    %cst_41 = arith.constant 0.000000e+00 : f32
    %67 = vector.broadcast %cst_41 : f32 to vector<1x2xf32>
    %68 = arith.maximumf %66, %67 : vector<1x2xf32>
    %c0_42 = arith.constant 0 : index
    %c0_43 = arith.constant 0 : index
    %69 = vector.load %arg8[%c0_42, %c0_43] : memref<2x16xf32, #tpu.memory_space<vmem>>, vector<2x16xf32>
    %cst_44 = arith.constant dense<0.000000e+00> : vector<1x16xf32>
    %70 = tpu.matmul %68, %69, %cst_44 {dimension_numbers = #tpu.dot_dimension_numbers<[1], [0], [0], [1], [0, 0, 1, 1], [], []>} : vector<1x2xf32>, vector<2x16xf32>, vector<1x16xf32> -> vector<1x16xf32>
    %c0_45 = arith.constant 0 : index
    %c0_46 = arith.constant 0 : index
    %71 = vector.load %arg9[%c0_45, %c0_46] : memref<1x16xf32, #tpu.memory_space<vmem>>, vector<1x16xf32>
    %72 = vector.shape_cast %71 : vector<1x16xf32> to vector<16xf32>
    %73 = vector.shape_cast %72 : vector<16xf32> to vector<1x16xf32>
    %74 = arith.addf %70, %73 : vector<1x16xf32>
    %75 = arith.negf %74 : vector<1x16xf32>
    %76 = math.exp %75 : vector<1x16xf32>
    %cst_47 = arith.constant 1.000000e+00 : f32
    %77 = vector.broadcast %cst_47 : f32 to vector<1x16xf32>
    %78 = arith.addf %77, %76 : vector<1x16xf32>
    %79 = arith.divf %77, %78 : vector<1x16xf32>
    %80 = vector.broadcast %79 : vector<1x16xf32> to vector<256x16xf32>
    %81 = arith.mulf %56, %80 : vector<256x16xf32>
    %82 = arith.addf %81, %32 : vector<256x16xf32>
    %cst_48 = arith.constant 0.000000e+00 : f32
    %83 = vector.broadcast %cst_48 : f32 to vector<256x16xf32>
    %84 = arith.maximumf %82, %83 : vector<256x16xf32>
    %85 = vector.shape_cast %84 : vector<256x16xf32> to vector<16x16x16xf32>
    %c0_49 = arith.constant 0 : index
    %c0_50 = arith.constant 0 : index
    %c0_51 = arith.constant 0 : index
    %c0_52 = arith.constant 0 : index
    %86 = vector.load %arg10[%c0_49, %c0_50, %c0_51, %c0_52] : memref<1x16x16x16xf32, #tpu.memory_space<vmem>>, vector<1x16x16x16xf32>
    %87 = vector.shape_cast %86 : vector<1x16x16x16xf32> to vector<16x16x16xf32>
    %88 = vector.shape_cast %85 : vector<16x16x16xf32> to vector<1x16x16x16xf32>
    tpu.vector_store %arg10[%c0_49, %c0_50, %c0_51, %c0_52], %88 {strides = array<i32>} : memref<1x16x16x16xf32, #tpu.memory_space<vmem>>, vector<1x16x16x16xf32>,
    return
  }
  func.func @transform_0(%arg0: i32) -> (i32, i32, i32, i32) {
    %c0_i32 = arith.constant 0 : i32
    %c0_i32_0 = arith.constant 0 : i32
    %c0_i32_1 = arith.constant 0 : i32
    %c0_i32_2 = arith.constant 0 : i32
    return %arg0, %c0_i32, %c0_i32_0, %c0_i32_1 : i32, i32, i32, i32
  }
  func.func @transform_1(%arg0: i32) -> (i32, i32) {
    %c0_i32 = arith.constant 0 : i32
    %c0_i32_0 = arith.constant 0 : i32
    %c0_i32_1 = arith.constant 0 : i32
    return %c0_i32, %c0_i32_0 : i32, i32
  }
  func.func @transform_2(%arg0: i32) -> (i32, i32) {
    %c0_i32 = arith.constant 0 : i32
    %c0_i32_0 = arith.constant 0 : i32
    %c0_i32_1 = arith.constant 0 : i32
    return %c0_i32, %c0_i32_0 : i32, i32
  }
  func.func @transform_3(%arg0: i32) -> (i32, i32) {
    %c0_i32 = arith.constant 0 : i32
    %c0_i32_0 = arith.constant 0 : i32
    %c0_i32_1 = arith.constant 0 : i32
    return %c0_i32, %c0_i32_0 : i32, i32
  }
  func.func @transform_4(%arg0: i32) -> (i32, i32) {
    %c0_i32 = arith.constant 0 : i32
    %c0_i32_0 = arith.constant 0 : i32
    %c0_i32_1 = arith.constant 0 : i32
    return %c0_i32, %c0_i32_0 : i32, i32
  }
  func.func @transform_5(%arg0: i32) -> (i32, i32) {
    %c0_i32 = arith.constant 0 : i32
    %c0_i32_0 = arith.constant 0 : i32
    %c0_i32_1 = arith.constant 0 : i32
    return %c0_i32, %c0_i32_0 : i32, i32
  }
  func.func @transform_6(%arg0: i32) -> (i32, i32) {
    %c0_i32 = arith.constant 0 : i32
    %c0_i32_0 = arith.constant 0 : i32
    %c0_i32_1 = arith.constant 0 : i32
    return %c0_i32, %c0_i32_0 : i32, i32
  }
  func.func @transform_7(%arg0: i32) -> (i32, i32) {
    %c0_i32 = arith.constant 0 : i32
    %c0_i32_0 = arith.constant 0 : i32
    %c0_i32_1 = arith.constant 0 : i32
    return %c0_i32, %c0_i32_0 : i32, i32
  }
  func.func @transform_8(%arg0: i32) -> (i32, i32) {
    %c0_i32 = arith.constant 0 : i32
    %c0_i32_0 = arith.constant 0 : i32
    %c0_i32_1 = arith.constant 0 : i32
    return %c0_i32, %c0_i32_0 : i32, i32
  }
  func.func @transform_9(%arg0: i32) -> (i32, i32, i32, i32) {
    %c0_i32 = arith.constant 0 : i32
    %c0_i32_0 = arith.constant 0 : i32
    %c0_i32_1 = arith.constant 0 : i32
    %c0_i32_2 = arith.constant 0 : i32
    return %arg0, %c0_i32, %c0_i32_0, %c0_i32_1 : i32, i32, i32, i32
  }
}

</mosaic_0001>

<bundles_post_ra>
// kernel: tpu_custom_call.1
= control target key start
LH: loop header
LB: loop body
LE: loop exit
PB: predicated region body
PF: predicated region fallthrough
CT: control target
= control target key end

     0   :  { %14 = vsyncpa [#allocation4], 0  ;;  %s8411_s0 = inlined_call_operand.vmem [shape: f32[2,18,18,4], index: 0, kind: input, shape index: {}]   ;;  %s8412_s1 = inlined_call_operand.vmem [shape: bf16[36,32], index: 1, kind: input, shape index: {}]   ;;  %s8413_s2 = inlined_call_operand.vmem [shape: f32[1,16], index: 2, kind: input, shape index: {}]   ;;  %s8414_s3 = inlined_call_operand.vmem [shape: bf16[144,16], index: 3, kind: input, shape index: {}]   ;;  %s8415_s4 = inlined_call_operand.vmem [shape: f32[1,16], index: 4, kind: input, shape index: {}]   ;;  %s8416_s5 = inlined_call_operand.vmem [shape: f32[16,2], index: 5, kind: input, shape index: {}]   ;;  %s8417_s6 = inlined_call_operand.vmem [shape: f32[1,2], index: 6, kind: input, shape index: {}]   ;;  %s8418_s7 = inlined_call_operand.vmem [shape: f32[2,16], index: 7, kind: input, shape index: {}]   ;;  %s8419_s8 = inlined_call_operand.vmem [shape: f32[1,16], index: 8, kind: input, shape index: {}]   ;;  %s8420_s9 = inlined_call_operand.hbm [shape: f32[2,16,16,16], index: 9, kind: output, shape index: {}]  }
   0x1   :  { %16 = vsyncpa [#allocation4 + $0x1], 0  ;;  %s5618_s30 = smov 0   ;;  %s5620_s10 = smov 0  }
   0x2   :  { %s5622_s11 = smov 0   ;;  %s5624_s12 = smov 0  }
   0x3 LB: > { %s5639_s13 = sadd.s32 4294967295, %s5547_s12   ;;  %s4445_s14 = sadd.s32 4294967294, %s5547_s12   ;;  %s5547_s12 = sphi %s5624_s12, %s8626_s12   ;;  %s5543_s11 = sphi %s5622_s11, %s8625_s11   ;;  %s5539_s10 = sphi %s5620_s10, %s8624_s10   ;;  %s5535_s30 = sphi %s5618_s30, %s8623_s30  }
   0x4   : > { %s5643_s15 = sadd.s32 1, %s5547_s12   ;;  %s223_s16 = sadd.s32 1, %s5543_s11 }
   0x5   : > { %s220_s17 = ssub.s32 %s5547_s12, %s5643_s15  ;;  %p233_p0 = scmp.ne.s32.totalorder %s5543_s11, %s5539_s10 }
   0x6   : > { %p221_p1 = scmp.eq.s32.totalorder %s220_s17, 0  ;;  %p234_p2 = scmp.eq.s32.totalorder %s5639_s13, 1 }
   0x7   : > { %p239_p3 = scmp.ne.s32.totalorder %s5539_s10, %s5535_s30  ;;  %p240_p4 = scmp.eq.s32.totalorder %s4445_s14, 1 }
   0x8   : > { %s5654_s18 = scalar_select %p221_p1, %s5543_s11, %s223_s16  }
   0x9   : > { %p5656_p5 = por %p234_p2, %p233_p0  ;;  %p5660_p6 = por %p240_p4, %p239_p3 }
   0xa   : > { %p4448_p7 = scmp.ge.s32.totalorder %s5547_s12, 1  ;;  %p290_p8 = scmp.lt.s32.totalorder %s5547_s12, 3 }
   0xc   : > { %p291_p9 = pnand %p4448_p7, %p290_p8 }
   0xe   : > { %294 = sbr.rel (%p291_p9) target bundleno = 1572 (0x624), region = 56 }
  0x15   : > { %p326_p10 = scmp.lt.s32.totalorder %s5639_s13, 1  ;;  %vm722_vm0 = vcmask 1045504   ;;  %vm545_vm1 = vcmask 1046528   ;;  %s5549_s26 = smov 12   ;;  %v5401_v49 = vld [vmem:[%s8412_s1] sm:$0xff]   ;;  %v5402_v54 = vld [vmem:[%s8412_s1 + $0x8] sm:$0xff]  }
  0x16   : > { %s5550_s27 = smov 8   ;;  %s5551_s28 = smov 4   ;;  %4631 = vmatprep.subr.bf16.mxu0 %v5401_v49  ;;  %vm8421_vm2 = vcmask 1041408   ;;  %vm1501_vm3 = vcmask 31744   ;;  %vm1534_vm4 = vcmask 64512   ;;  %vm1567_vm5 = vcmask 97280  }
  0x17   : > { %s327_s21 = scalar_select %p326_p10, %s5639_s13, 1  ;;  %4632 = vmatpush3.bf16.msra.mxu0 %v5401_v49  ;;  %vm1600_vm6 = vcmask 130048   ;;  %vm1633_vm7 = vcmask 162816   ;;  %vm1666_vm8 = vcmask 195584   ;;  %vm1699_vm9 = vcmask 228352  }
  0x18   : > { %s5552_s16 = smov 16   ;;  %4633 = vmatprep.subr.bf16.mxu0 %v5402_v54  ;;  %s5554_s23 = smov 24   ;;  %vm1732_vm10 = vcmask 261120   ;;  %vm1801_vm11 = vcmask 293888   ;;  %vm332_vm12 = vcmask 125952   ;;  %vm335_vm13 = vcmask 122880  }
  0x19   : > { %s4703_s22 = smul.u32 432, %s327_s21  ;;  %s5555_s24 = smov 28   ;;  %vm8422_vm14 = vsmask.f32 256 }
  0x1a   : > { %s5556_s29 = smov 32   ;;  %vm6479_vm15 = vmand %vm335_vm13, %vm8422_vm14  ;;  %s5559_s14 = smov 48  }
  0x1b   : > { %s5671_s25 = scalar_lea.vmem %s8411_s0, %s4703_s22  ;;  %s5553_s22 = smov 20   ;;  %4634 = vmatpush3.bf16.msra.mxu0 %v5402_v54 }
  0x1c   : > { %v5674_v0 = vld [vmem:[%s5671_s25 + $0x30] sm:$0xff]  ;;  %v5677_v1 = vld [vmem:[%s5671_s25 + $0x38] sm:$0xff]  ;;  %v5687_v4 = vld [vmem:[%s5671_s25 + $0x20] sm:$0xff]  ;;  %s5560_s21 = smov 80   ;;  %s5561_s17 = smov 112  }
  0x1d   : > { %v5680_v2 = vld [vmem:[%s5671_s25 + $0x18] sm:$0xff]  ;;  %v5684_v3 = vpack.i.bf16 %v5677_v1, %v5674_v0  ;;  %v5690_v5 = vld [vmem:[%s5671_s25] sm:$0xff]  ;;  %v5693_v6 = vld [vmem:[%s5671_s25 + $0x8] sm:$0xff]  ;;  %v556_v9 = vrot.slane %v5674_v0, 1  ;;  %v729_v19 = vrot.slane %v5687_v4, 2  ;;  %v552_v22 = vrot.slane %v5687_v4, 1 }
  0x1e   : > { %v728_v7 = vrot.slane %v5680_v2, 2  ;;  %v551_v8 = vrot.slane %v5680_v2, 1  ;;  %v4761_v10 = vpack.i.bf16 %v5687_v4, %v5680_v2  ;;  %v445_v11 = vld [vmem:[%s5671_s25 + $0x10] sm:$0x3]  ;;  %v723_v12 = vrot.slane %v5690_v5, 2  ;;  %v5732_v46 = vld [vmem:[%s5671_s25 + $0x48] sm:$0xff] }
  0x1f   : > { %v724_v13 = vrot.slane %v5693_v6, 2  ;;  %v546_v14 = vrot.slane %v5690_v5, 1  ;;  %4767 = vrot.lane.b32.xlu1 %v5684_v3, %s5549_s26  ;;  %v726_v15 = vrot.slane %v445_v11, 2  ;;  %v547_v16 = vrot.slane %v5693_v6, 1  ;;  %v448_v18 = vld [vmem:[%s5671_s25 + $0x28] sm:$0x3] }
  0x20   : > { %v549_v17 = vrot.slane %v445_v11, 1  ;;  %4762 = vrot.lane.b32.xlu0 %v4761_v10, %s5549_s26  ;;  %v731_v21 = vrot.slane %v448_v18, 2  ;;  %v554_v23 = vrot.slane %v448_v18, 1  ;;  %v451_v24 = vld [vmem:[%s5671_s25 + $0x40] sm:$0x3]  ;;  %v730_v28 = vsel %vm722_vm0, %v728_v7, %v729_v19  ;;  %v5735_v47 = vld [vmem:[%s5671_s25 + $0x50] sm:$0xff] }
  0x21   : > { %v725_v20 = vsel %vm722_vm0, %v723_v12, %v724_v13  ;;  %v727_v25 = vsel %vm722_vm0, %v724_v13, %v726_v15  ;;  %v548_v26 = vsel %vm545_vm1, %v546_v14, %v547_v16  ;;  %v553_v32 = vsel %vm545_vm1, %v551_v8, %v552_v22  ;;  %v454_v48 = vld [vmem:[%s5671_s25 + $0x58] sm:$0x3]  ;;  %v455_v7 = vld [vmem:[%s5671_s25 + $0x60] sm:$0xff]  ;;  %v456_v8 = vld [vmem:[%s5671_s25 + $0x68] sm:$0xff] }
  0x22   : > { %v550_v27 = vsel %vm545_vm1, %v547_v16, %v549_v17  ;;  %v4781_v29 = vpack.i.bf16 %v727_v25, %v725_v20  ;;  %v732_v31 = vsel %vm722_vm0, %v729_v19, %v731_v21  ;;  %v555_v33 = vsel %vm545_vm1, %v552_v22, %v554_v23  ;;  %v5403_v19 = vld [vmem:[%s8412_s1 + $0x10] ss:$0 sps:$4 sm:$0x33]   ;;  %v5782_v23 = vld [vmem:[%s5671_s25 + $0x78] sm:$0xff]  ;;  %v460_v25 = vld [vmem:[%s5671_s25 + $0x88] sm:$0x3] }
  0x23   : > { %v4771_v30 = vpack.i.bf16 %v550_v27, %v548_v26  ;;  %v557_v34 = vrot.slane %v5677_v1, 1  ;;  %v559_v35 = vrot.slane %v451_v24, 1  ;;  %v4786_v36 = vpack.i.bf16 %v732_v31, %v730_v28  ;;  %4702 = vmatprep.subr.msk.bf16.mxu0 %vm8421_vm2, %v5403_v19 }
  0x24   : > { %4782 = vrot.lane.b32.xlu1 %v4781_v29, %s5550_s27  ;;  %v4776_v37 = vpack.i.bf16 %v555_v33, %v553_v32  ;;  %v733_v38 = vrot.slane %v5674_v0, 2  ;;  %v734_v41 = vrot.slane %v5677_v1, 2  ;;  %v736_v42 = vrot.slane %v451_v24, 2  ;;  %v5785_v24 = vld [vmem:[%s5671_s25 + $0x80] sm:$0xff] }
  0x25   : > { %4772 = vrot.lane.b32.xlu0 %v4771_v30, %s5551_s28  ;;  %v558_v39 = vsel %vm545_vm1, %v556_v9, %v557_v34  ;;  %v560_v40 = vsel %vm545_vm1, %v557_v34, %v559_v35  ;;  %v561_v51 = vrot.slane %v5732_v46, 1  ;;  %v562_v52 = vrot.slane %v5735_v47, 1  ;;  %v457_v9 = vld [vmem:[%s5671_s25 + $0x70] sm:$0x3] }
  0x26   : > { %v4796_v43 = vpack.i.bf16 %v560_v40, %v558_v39  ;;  %v735_v44 = vsel %vm722_vm0, %v733_v38, %v734_v41  ;;  %v737_v45 = vsel %vm722_vm0, %v734_v41, %v736_v42  ;;  %v564_v53 = vrot.slane %v454_v48, 1  ;;  %v461_v41 = vld [vmem:[%s5671_s25 + $0x90] sm:$0xff]  ;;  %v462_v42 = vld [vmem:[%s5671_s25 + $0x98] sm:$0xff] }
  0x27   : > { %v4806_v50 = vpack.i.bf16 %v737_v45, %v735_v44  ;;  %v4816_v55 = vpack.i.bf16 %v5735_v47, %v5732_v46  ;;  %v563_v56 = vsel %vm545_vm1, %v561_v51, %v562_v52  ;;  %v738_v59 = vrot.slane %v5732_v46, 2 }
  0x28   : > { %4787 = vrot.lane.b32.xlu1 %v4786_v36, %s5550_s27  ;;  %v565_v57 = vsel %vm545_vm1, %v562_v52, %v564_v53  ;;  %v739_v60 = vrot.slane %v5735_v47, 2  ;;  %v741_v61 = vrot.slane %v454_v48, 2  ;;  %v566_v10 = vrot.slane %v455_v7, 1 }
  0x29   : > { %4777 = vrot.lane.b32.xlu0 %v4776_v37, %s5551_s28  ;;  %v4826_v58 = vpack.i.bf16 %v565_v57, %v563_v56  ;;  %v567_v11 = vrot.slane %v456_v8, 1  ;;  %v569_v12 = vrot.slane %v457_v9, 1  ;;  %v4866_v13 = vpack.i.bf16 %v456_v8, %v455_v7 }
  0x2a   : > { %v740_v62 = vsel %vm722_vm0, %v738_v59, %v739_v60  ;;  %v742_v63 = vsel %vm722_vm0, %v739_v60, %v741_v61  ;;  %v743_v14 = vrot.slane %v455_v7, 2  ;;  %v744_v17 = vrot.slane %v456_v8, 2  ;;  %v465_v59 = vld [vmem:[%s5671_s25 + $0xb0] sm:$0xff]  ;;  %v466_v60 = vld [vmem:[%s5671_s25 + $0xb8] sm:$0x3] }
  0x2b   : > { %v568_v15 = vsel %vm545_vm1, %v566_v10, %v567_v11  ;;  %v570_v16 = vsel %vm545_vm1, %v567_v11, %v569_v12  ;;  %v746_v18 = vrot.slane %v457_v9, 2  ;;  %v1852_v27 = vsel %vm8421_vm2, %v5403_v19, 0  ;;  %v469_v19 = vld [vmem:[%s5671_s25 + $0xd0] sm:$0x3] }
  0x2c   : > { %4797 = vrot.lane.b32.xlu1 %v4796_v43, %s5552_s16  ;;  %v4876_v20 = vpack.i.bf16 %v570_v16, %v568_v15  ;;  %v745_v21 = vsel %vm722_vm0, %v743_v14, %v744_v17  ;;  %v571_v28 = vrot.slane %v5782_v23, 1  ;;  %v572_v29 = vrot.slane %v5785_v24, 1  ;;  %4636 = vmatpush3.bf16.msra.mxu0 %v1852_v27 }
  0x2d   : > { %4792 = vrot.lane.b32.xlu0 %v4776_v37, %s5552_s16  ;;  %v747_v22 = vsel %vm722_vm0, %v744_v17, %v746_v18  ;;  %v574_v30 = vrot.slane %v460_v25, 1  ;;  %v4896_v31 = vpack.i.bf16 %v5785_v24, %v5782_v23  ;;  %v748_v35 = vrot.slane %v5782_v23, 2  ;;  %v467_v17 = vld [vmem:[%s5671_s25 + $0xc0] sm:$0xff]  ;;  %v468_v18 = vld [vmem:[%s5671_s25 + $0xc8] sm:$0xff] }
  0x2e   : > { %v4886_v26 = vpack.i.bf16 %v747_v22, %v745_v21  ;;  %v573_v32 = vsel %vm545_vm1, %v571_v28, %v572_v29  ;;  %v751_v37 = vrot.slane %v460_v25, 2  ;;  %v576_v44 = vrot.slane %v461_v41, 1 }
  0x2f   : > { %v575_v33 = vsel %vm545_vm1, %v572_v29, %v574_v30  ;;  %v577_v45 = vrot.slane %v462_v42, 1  ;;  %v4946_v49 = vpack.i.bf16 %v462_v42, %v461_v41  ;;  %v754_v53 = vrot.slane %v462_v42, 2 }
  0x30   : > { %4807 = vrot.lane.b32.xlu1 %v4806_v50, %s5553_s22  ;;  %v4906_v34 = vpack.i.bf16 %v575_v33, %v573_v32  ;;  %v759_v12 = vrot.slane %v465_v59, 2  ;;  %v587_v21 = vrot.slane %v468_v18, 1  ;;  %v589_v22 = vrot.slane %v469_v19, 1 }
  0x31   : > { %4802 = vrot.lane.b32.xlu0 %v4786_v36, %s5553_s22  ;;  %v749_v36 = vrot.slane %v5785_v24, 2  ;;  %v578_v51 = vsel %vm545_vm1, %v576_v44, %v577_v45  ;;  %v5026_v25 = vpack.i.bf16 %v468_v18, %v467_v17  ;;  %v764_v29 = vrot.slane %v468_v18, 2  ;;  %v5909_v18 = vld [vmem:[%s5671_s25 + $0x110] sm:$0xff] }
  0x32   : > { %v590_v28 = vsel %vm545_vm1, %v587_v21, %v589_v22  ;;  %v766_v30 = vrot.slane %v469_v19, 2  ;;  %vm393_vm2 = vsmask.f32 7938 }
  0x33   : > { %v750_v38 = vsel %vm722_vm0, %v748_v35, %v749_v36  ;;  %v752_v39 = vsel %vm722_vm0, %v749_v36, %v751_v37  ;;  %v471_v35 = vld [vmem:[%s5671_s25 + $0xe0] sm:$0xff]  ;;  %v472_v36 = vld [vmem:[%s5671_s25 + $0xe8] sm:$0x3]  ;;  %vm6511_vm14 = vmand %vm335_vm13, %vm393_vm2 }
  0x34   : > { %4817 = vrot.lane.b32.xlu1 %v4816_v55, %s5554_s23  ;;  %v4921_v40 = vpack.i.bf16 %v752_v39, %v750_v38  ;;  %v767_v33 = vsel %vm722_vm0, %v764_v29, %v766_v30  ;;  %v592_v39 = vrot.slane %v471_v35, 1 }
  0x35   : > { %4812 = vrot.lane.b32.xlu0 %v5684_v3, %s5554_s23  ;;  %v4841_v3 = vpack.i.bf16 %v742_v63, %v740_v62  ;;  %v582_v63 = vrot.slane %v465_v59, 1 }
  0x38   : > { %4827 = vrot.lane.b32.xlu1 %v4826_v58, %s5555_s24 }
  0x39   : > { %4822 = vrot.lane.b32.xlu0 %v4796_v43, %s5555_s24 }
  0x3c   : > { %4837 = vrot.lane.b32.xlu1 %v4796_v43, %s5551_s28  ;;  %v463_v43 = vld [vmem:[%s5671_s25 + $0xa0] sm:$0x3] }
  0x3d   : > { %4832 = vrot.lane.b32.xlu0 %v4806_v50, %s5556_s29  ;;  %v579_v48 = vrot.slane %v463_v43, 1  ;;  %v756_v54 = vrot.slane %v463_v43, 2 }
  0x3f   : > { %v580_v52 = vsel %vm545_vm1, %v577_v45, %v579_v48  ;;  %v757_v57 = vsel %vm722_vm0, %v754_v53, %v756_v54  ;;  %v769_v48 = vrot.slane %v471_v35, 2 }
  0x40   : > { %4847 = vrot.lane.b32.xlu1 %v4826_v58, %s5551_s28 }
  0x41   : > { %4842 = vrot.lane.b32.xlu0 %v4841_v3, %s5556_s29 }
  0x44   : > { %4857 = vrot.lane.b32.xlu1 %v4841_v3, %s5550_s27 }
  0x45   : > { %4852 = vrot.lane.b32.xlu0 %v4806_v50, %s5550_s27  ;;  %v753_v50 = vrot.slane %v461_v41, 2 }
  0x47   : > { %v755_v56 = vsel %vm722_vm0, %v753_v50, %v754_v53 }
  0x48   : > { %4867 = vrot.lane.b32.xlu1 %v4866_v13, %s5549_s26  ;;  %v4966_v61 = vpack.i.bf16 %v757_v57, %v755_v56  ;;  %v473_v56 = vld [vmem:[%s5671_s25 + $0xf0] sm:$0xff] }
  0x49   : > { %4862 = vrot.lane.b32.xlu0 %v4816_v55, %s5549_s26  ;;  %v4956_v55 = vpack.i.bf16 %v580_v52, %v578_v51 }
  0x4c   : > { %4877 = vrot.lane.b32.xlu1 %v4876_v20, %s5552_s16 }
  0x4d   : > { %4872 = vrot.lane.b32.xlu0 %v4826_v58, %s5552_s16  ;;  %v464_v58 = vld [vmem:[%s5671_s25 + $0xa8] sm:$0xff] }
  0x4e   : > { %v581_v62 = vrot.slane %v464_v58, 1  ;;  %v4976_v7 = vpack.i.bf16 %v465_v59, %v464_v58  ;;  %v758_v11 = vrot.slane %v464_v58, 2  ;;  %v474_v58 = vld [vmem:[%s5671_s25 + $0xf8] sm:$0xff]  ;;  %v475_v59 = vld [vmem:[%s5671_s25 + $0x100] sm:$0x3] }
  0x50   : > { %4887 = vrot.lane.b32.xlu1 %v4886_v26, %s5553_s22  ;;  %v583_v8 = vsel %vm545_vm1, %v581_v62, %v582_v63  ;;  %v760_v14 = vsel %vm722_vm0, %v758_v11, %v759_v12  ;;  %v596_v62 = vrot.slane %v473_v56, 1 }
  0x51   : > { %4882 = vrot.lane.b32.xlu0 %v4841_v3, %s5553_s22  ;;  %v584_v3 = vrot.slane %v466_v60, 1 }
  0x53   : > { %v585_v9 = vsel %vm545_vm1, %v582_v63, %v584_v3  ;;  %v597_v63 = vrot.slane %v474_v58, 1  ;;  %v599_v3 = vrot.slane %v475_v59, 1 }
  0x54   : > { %4897 = vrot.lane.b32.xlu1 %v4896_v31, %s5554_s23  ;;  %v4986_v10 = vpack.i.bf16 %v585_v9, %v583_v8  ;;  %v774_v8 = vrot.slane %v474_v58, 2  ;;  %v776_v9 = vrot.slane %v475_v59, 2 }
  0x55   : > { %4892 = vrot.lane.b32.xlu0 %v4866_v13, %s5554_s23  ;;  %v761_v13 = vrot.slane %v466_v60, 2 }
  0x57   : > { %v762_v15 = vsel %vm722_vm0, %v759_v12, %v761_v13  ;;  %v598_v12 = vsel %vm545_vm1, %v596_v62, %v597_v63  ;;  %v600_v13 = vsel %vm545_vm1, %v597_v63, %v599_v3 }
  0x58   : > { %4907 = vrot.lane.b32.xlu1 %v4906_v34, %s5555_s24  ;;  %v5001_v16 = vpack.i.bf16 %v762_v15, %v760_v14 }
  0x59   : > { %4902 = vrot.lane.b32.xlu0 %v4876_v20, %s5555_s24 }
  0x5c   : > { %4917 = vrot.lane.b32.xlu1 %v4876_v20, %s5551_s28  ;;  %v586_v20 = vrot.slane %v467_v17, 1 }
  0x5d   : > { %4912 = vrot.lane.b32.xlu0 %v4886_v26, %s5556_s29 }
  0x5e   : > { %v588_v27 = vsel %vm545_vm1, %v586_v20, %v587_v21  ;;  %v777_v20 = vsel %vm722_vm0, %v774_v8, %v776_v9 }
  0x60   : > { %4927 = vrot.lane.b32.xlu1 %v4906_v34, %s5551_s28 }
  0x61   : > { %4922 = vrot.lane.b32.xlu0 %v4921_v40, %s5556_s29 }
  0x64   : > { %4937 = vrot.lane.b32.xlu1 %v4921_v40, %s5550_s27 }
  0x65   : > { %4932 = vrot.lane.b32.xlu0 %v4886_v26, %s5550_s27  ;;  %v763_v26 = vrot.slane %v467_v17, 2  ;;  %v5906_v17 = vld [vmem:[%s5671_s25 + $0x108] sm:$0xff] }
  0x67   : > { %v765_v32 = vsel %vm722_vm0, %v763_v26, %v764_v29 }
  0x68   : > { %4947 = vrot.lane.b32.xlu1 %v4946_v49, %s5549_s26  ;;  %v5858_v37 = vpack.i.bf16 %v767_v33, %v765_v32  ;;  %v602_v32 = vrot.slane %v5909_v18, 1 }
  0x69   : > { %4942 = vrot.lane.b32.xlu0 %v4896_v31, %s5549_s26  ;;  %v5036_v31 = vpack.i.bf16 %v590_v28, %v588_v27  ;;  %v5917_v27 = vpack.i.bf16 %v600_v13, %v598_v12  ;;  %v5920_v28 = vld [vmem:[%s5671_s25 + $0x118] sm:$0x3] }
  0x6c   : > { %4957 = vrot.lane.b32.xlu1 %v4956_v55, %s5552_s16 }
  0x6d   : > { %4952 = vrot.lane.b32.xlu0 %v4906_v34, %s5552_s16  ;;  %v470_v34 = vld [vmem:[%s5671_s25 + $0xd8] sm:$0xff] }
  0x6e   : > { %v591_v38 = vrot.slane %v470_v34, 1  ;;  %v5863_v41 = vpack.i.bf16 %v471_v35, %v470_v34  ;;  %v768_v42 = vrot.slane %v470_v34, 2 }
  0x70   : > { %4967 = vrot.lane.b32.xlu1 %v4966_v61, %s5553_s22  ;;  %v593_v44 = vsel %vm545_vm1, %v591_v38, %v592_v39  ;;  %v770_v52 = vsel %vm722_vm0, %v768_v42, %v769_v48 }
  0x71   : > { %4962 = vrot.lane.b32.xlu0 %v4921_v40, %s5553_s22  ;;  %v594_v40 = vrot.slane %v472_v36, 1 }
  0x73   : > { %v595_v45 = vsel %vm545_vm1, %v592_v39, %v594_v40 }
  0x74   : > { %4977 = vrot.lane.b32.xlu1 %v4976_v7, %s5554_s23  ;;  %v5874_v51 = vpack.i.bf16 %v595_v45, %v593_v44  ;;  %v778_v44 = vrot.slane %v5906_v17, 2  ;;  %v779_v45 = vrot.slane %v5909_v18, 2 }
  0x75   : > { %4972 = vrot.lane.b32.xlu0 %v4946_v49, %s5554_s23  ;;  %v771_v49 = vrot.slane %v472_v36, 2 }
  0x77   : > { %v772_v53 = vsel %vm722_vm0, %v769_v48, %v771_v49 }
  0x78   : > { %4987 = vrot.lane.b32.xlu1 %v4986_v10, %s5555_s24  ;;  %v5884_v57 = vpack.i.bf16 %v772_v53, %v770_v52 }
  0x79   : > { %4982 = vrot.lane.b32.xlu0 %v4956_v55, %s5555_s24 }
  0x7c   : > { %4997 = vrot.lane.b32.xlu1 %v4956_v55, %s5551_s28 }
  0x7d   : > { %4992 = vrot.lane.b32.xlu0 %v4966_v61, %s5556_s29 }
  0x80   : > { %5007 = vrot.lane.b32.xlu1 %v4986_v10, %s5551_s28 }
  0x81   : > { %5002 = vrot.lane.b32.xlu0 %v5001_v16, %s5556_s29 }
  0x84   : > { %5017 = vrot.lane.b32.xlu1 %v5001_v16, %s5550_s27 }
  0x85   : > { %5012 = vrot.lane.b32.xlu0 %v4966_v61, %s5550_s27 }
  0x88   : > { %5027 = vrot.lane.b32.xlu1 %v5026_v25, %s5549_s26 }
  0x89   : > { %5022 = vrot.lane.b32.xlu0 %v4976_v7, %s5549_s26  ;;  %v773_v7 = vrot.slane %v473_v56, 2 }
  0x8b   : > { %v775_v19 = vsel %vm722_vm0, %v773_v7, %v774_v8 }
  0x8c   : > { %5037 = vrot.lane.b32.xlu1 %v5036_v31, %s5552_s16  ;;  %v5934_v35 = vpack.i.bf16 %v777_v20, %v775_v19 }
  0x8d   : > { %5032 = vrot.lane.b32.xlu0 %v4986_v10, %s5552_s16 }
  0x90   : > { %5047 = vrot.lane.b32.xlu1 %v5858_v37, %s5553_s22 }
  0x91   : > { %5042 = vrot.lane.b32.xlu0 %v5001_v16, %s5553_s22  ;;  %v5865_v43 = vpop.permute.xlu1 %4767  ;;  %v5903_v16 = vpack.i.bf16 %v474_v58, %v473_v56 }
  0x92   : > { %v5869_v50 = vpop.permute.xlu0 %4762  ;;  %v4769_v53 = vunpack.i.l.bf16 %v5865_v43 }
  0x94   : > { %5057 = vrot.lane.b32.xlu1 %v5863_v41, %s5554_s23 }
  0x95   : > { %5052 = vrot.lane.b32.xlu0 %v5026_v25, %s5554_s23 }
  0x96   : > { %v5878_v54 = vpop.permute.xlu1 %4782 }
  0x97   : > { %v4773_v55 = vpop.permute.xlu0 %4772  ;;  %v4785_v29 = vunpack.i.h.bf16 %v5878_v54  ;;  %v4784_v30 = vunpack.i.l.bf16 %v5878_v54  ;;  %v4765_v54 = vunpack.i.h.bf16 %v5869_v50 }
  0x98   : > { %5067 = vrot.lane.b32.xlu1 %v5874_v51, %s5555_s24  ;;  %v4775_v14 = vunpack.i.h.bf16 %v4773_v55  ;;  %v4774_v15 = vunpack.i.l.bf16 %v4773_v55  ;;  %v4764_v55 = vunpack.i.l.bf16 %v5869_v50 }
  0x99   : > { %5062 = vrot.lane.b32.xlu0 %v5036_v31, %s5555_s24 }
  0x9a   : > { %v5888_v60 = vpop.permute.xlu1 %4787  ;;  %v1503_v33 = vsel %vm1501_vm3, %v5693_v6, %v4775_v14  ;;  %v1502_v34 = vsel %vm1501_vm3, %v5690_v5, %v4774_v15  ;;  %v5940_v6 = vpack.i.bf16 %v5909_v18, %v5906_v17  ;;  %v604_v5 = vrot.slane %v5920_v28, 1 }
  0x9b   : > { %v4778_v61 = vpop.permute.xlu0 %4777  ;;  %v4790_v36 = vunpack.i.h.bf16 %v5888_v60  ;;  %v4789_v38 = vunpack.i.l.bf16 %v5888_v60  ;;  %v1536_v48 = vsel %vm1534_vm4, %v1503_v33, %v4785_v29  ;;  %v1535_v49 = vsel %vm1534_vm4, %v1502_v34, %v4784_v30 }
  0x9c   : > { %5077 = vrot.lane.b32.xlu1 %v5884_v57, %s5556_s29  ;;  %v4780_v21 = vunpack.i.h.bf16 %v4778_v61  ;;  %v4779_v22 = vunpack.i.l.bf16 %v4778_v61  ;;  %v1569_v61 = vsel %vm1567_vm5, %v1536_v48, %v4765_v54 }
  0x9d   : > { %5072 = vrot.lane.b32.xlu0 %v5858_v37, %s5556_s29 }
  0x9e   : > { %v5894_v10 = vpop.permute.xlu1 %4797  ;;  %v1504_v39 = vsel %vm1501_vm3, %v5680_v2, %v4779_v22  ;;  %v4770_v2 = vunpack.i.h.bf16 %v5865_v43  ;;  %v1568_v43 = vsel %vm1567_vm5, %v1535_v49, %v4764_v55 }
  0x9f   : > { %v5896_v11 = vpop.permute.xlu0 %4792  ;;  %v1537_v58 = vsel %vm1534_vm4, %v1504_v39, %v4789_v38  ;;  %v4800_v3 = vunpack.i.h.bf16 %v5894_v10  ;;  %v4799_v7 = vunpack.i.l.bf16 %v5894_v10 }
  0xa0   : > { %5087 = vrot.lane.b32.xlu1 %v5874_v51, %s5551_s28  ;;  %v4795_v59 = vunpack.i.h.bf16 %v5896_v11  ;;  %v4794_v60 = vunpack.i.l.bf16 %v5896_v11  ;;  %v1570_v12 = vsel %vm1567_vm5, %v1537_v58, %v4769_v53 }
  0xa1   : > { %5082 = vrot.lane.b32.xlu0 %v5036_v31, %s5551_s28  ;;  %v601_v31 = vrot.slane %v5906_v17, 1 }
  0xa2   : > { %v5913_v25 = vpop.permute.xlu1 %4807  ;;  %v1601_v15 = vsel %vm1600_vm6, %v1568_v43, %v4794_v60  ;;  %v1602_v19 = vsel %vm1600_vm6, %v1569_v61, %v4795_v59 }
  0xa3   : > { %v5915_v26 = vpop.permute.xlu0 %4802  ;;  %v5956_v52 = vsel %vm545_vm1, %v601_v31, %v602_v32  ;;  %v4810_v10 = vunpack.i.h.bf16 %v5913_v25  ;;  %v4809_v20 = vunpack.i.l.bf16 %v5913_v25 }
  0xa4   : > { %5097 = vrot.lane.b32.xlu1 %v5884_v57, %s5550_s27  ;;  %v4805_v50 = vunpack.i.h.bf16 %v5915_v26 }
  0xa5   : > { %5092 = vrot.lane.b32.xlu0 %v5858_v37, %s5550_s27  ;;  %v1505_v37 = vsel %vm1501_vm3, %v5687_v4, %v4780_v21  ;;  %v781_v4 = vrot.slane %v5920_v28, 2  ;;  %v481_v28 = vld [vmem:[%s5671_s25 + $0x130] sm:$0x3] }
  0xa6   : > { %v5947_v40 = vpop.permute.xlu1 %4817  ;;  %v1538_v56 = vsel %vm1534_vm4, %v1505_v37, %v4790_v36  ;;  %v1635_v22 = vsel %vm1633_vm7, %v1602_v19, %v4805_v50  ;;  %v6065_v19 = vld [vmem:[%s5671_s25 + $0x138] sm:$0xff] }
  0xa7   : > { %v4813_v42 = vpop.permute.xlu0 %4812  ;;  %v1571_v11 = vsel %vm1567_vm5, %v1538_v56, %v4770_v2  ;;  %v4819_v29 = vunpack.i.l.bf16 %v5947_v40  ;;  %v605_v56 = vsel %vm545_vm1, %v602_v32, %v604_v5 }
  0xa8   : > { %5107 = vrot.lane.b32.xlu1 %v5903_v16, %s5549_s26  ;;  %v4815_v8 = vunpack.i.h.bf16 %v4813_v42  ;;  %v4814_v9 = vunpack.i.l.bf16 %v4813_v42  ;;  %v1604_v42 = vsel %vm1600_vm6, %v1571_v11, %v4800_v3 }
  0xa9   : > { %5102 = vrot.lane.b32.xlu0 %v5863_v41, %s5549_s26  ;;  %v4804_v41 = vunpack.i.l.bf16 %v5915_v26  ;;  %v4820_v26 = vunpack.i.h.bf16 %v5947_v40  ;;  %v1603_v40 = vsel %vm1600_vm6, %v1570_v12, %v4799_v7  ;;  %v1637_v53 = vsel %vm1633_vm7, %v1604_v42, %v4810_v10  ;;  %v6068_v10 = vld [vmem:[%s5671_s25 + $0x140] sm:$0xff] }
  0xaa   : > { %v4828_v62 = vpop.permute.xlu1 %4827  ;;  %v1668_v36 = vsel %vm1666_vm8, %v1635_v22, %v4815_v8  ;;  %v1636_v2 = vsel %vm1633_vm7, %v1603_v40, %v4809_v20  ;;  %v782_v7 = vsel %vm722_vm0, %v779_v45, %v781_v4  ;;  %v480_v8 = vld [vmem:[%s5671_s25 + $0x128] sm:$0xff] }
  0xab   : > { %v4823_v63 = vpop.permute.xlu0 %4822  ;;  %v1634_v21 = vsel %vm1633_vm7, %v1601_v15, %v4804_v41  ;;  %v4830_v38 = vunpack.i.h.bf16 %v4828_v62  ;;  %v4829_v37 = vunpack.i.l.bf16 %v4828_v62  ;;  %v1669_v58 = vsel %vm1666_vm8, %v1636_v2, %v4819_v29  ;;  %v6071_v20 = vld [vmem:[%s5671_s25 + $0x148] sm:$0x3] }
  0xac   : > { %v4825_v13 = vunpack.i.h.bf16 %v4823_v63  ;;  %v4824_v14 = vunpack.i.l.bf16 %v4823_v63  ;;  %5117 = vrot.lane.b32.xlu1 %v5917_v27, %s5552_s16  ;;  %v1667_v34 = vsel %vm1666_vm8, %v1634_v21, %v4814_v9  ;;  %v1670_v59 = vsel %vm1666_vm8, %v1637_v53, %v4820_v26 }
  0xad   : > { %5112 = vrot.lane.b32.xlu0 %v5874_v51, %s5552_s16  ;;  %v1702_v61 = vsel %vm1699_vm9, %v1669_v58, %v4829_v37  ;;  %v1703_v50 = vsel %vm1699_vm9, %v1670_v59, %v4830_v38  ;;  %v6026_v41 = vpack.i.bf16 %v605_v56, %v5956_v52  ;;  %v479_v52 = vld [vmem:[%s5671_s25 + $0x120] sm:$0xff]  ;;  %v607_v4 = vrot.slane %v480_v8, 1 }
  0xae   : > { %v5991_v51 = vpop.permute.xlu1 %4837  ;;  %v1700_v25 = vsel %vm1699_vm9, %v1667_v34, %v4824_v14  ;;  %v1701_v39 = vsel %vm1699_vm9, %v1668_v36, %v4825_v13  ;;  %v609_v9 = vrot.slane %v481_v28, 1  ;;  %v783_v12 = vrot.slane %v479_v52, 2 }
  0xaf   : > { %v4833_v30 = vpop.permute.xlu0 %4832  ;;  %v784_v11 = vrot.slane %v480_v8, 2  ;;  %v786_v13 = vrot.slane %v481_v28, 2  ;;  %v614_v34 = vrot.slane %v6071_v20, 1  ;;  %v6090_v38 = vpack.i.bf16 %v6068_v10, %v6065_v19 }
  0xb0   : > { %v4835_v31 = vunpack.i.h.bf16 %v4833_v30  ;;  %v4834_v33 = vunpack.i.l.bf16 %v4833_v30  ;;  %5127 = vrot.lane.b32.xlu1 %v5934_v35, %s5553_s22  ;;  %v610_v22 = vsel %vm545_vm1, %v607_v4, %v609_v9  ;;  %v6081_v30 = vpack.i.bf16 %v480_v8, %v479_v52 }
  0xb1   : > { %5122 = vrot.lane.b32.xlu0 %v5884_v57, %s5553_s22  ;;  %v785_v26 = vsel %vm722_vm0, %v783_v12, %v784_v11  ;;  %v787_v29 = vsel %vm722_vm0, %v784_v11, %v786_v13  ;;  %v4840_v42 = vunpack.i.h.bf16 %v5991_v51  ;;  %v788_v59 = vrot.slane %v6065_v19, 2 }
  0xb2   : > { %v1733_v48 = vsel %vm1732_vm10, %v1700_v25, %v4834_v33  ;;  %v1734_v49 = vsel %vm1732_vm10, %v1701_v39, %v4835_v31  ;;  %v6007_v57 = vpop.permute.xlu1 %4847  ;;  %v611_v31 = vrot.slane %v6065_v19, 1  ;;  %v612_v33 = vrot.slane %v6068_v10, 1 }
  0xb3   : > { %v4843_v54 = vpop.permute.xlu0 %4842  ;;  %v1765_v55 = vpack.c.bf16 %v1734_v49, %v1733_v48  ;;  %v4850_v37 = vunpack.i.h.bf16 %v6007_v57  ;;  %v4849_v25 = vunpack.i.l.bf16 %v6007_v57  ;;  %v6096_v40 = vpack.i.bf16 %v787_v29, %v785_v26 }
  0xb4   : > { %v4845_v60 = vunpack.i.h.bf16 %v4843_v54  ;;  %v4844_v43 = vunpack.i.l.bf16 %v4843_v54  ;;  %5137 = vrot.lane.b32.xlu1 %v5940_v6, %s5554_s23  ;;  %v4839_v48 = vunpack.i.l.bf16 %v5991_v51  ;;  %v6109_v57 = vsel %vm545_vm1, %v611_v31, %v612_v33 }
  0xb5   : > { %5132 = vrot.lane.b32.xlu0 %v5903_v16, %s5554_s23  ;;  %4637 = vmatprep.mubr.msk.bf16.mxu0 %vm1801_vm11, %v1765_v55  ;;  %v780_v16 = vsel %vm722_vm0, %v778_v44, %v779_v45  ;;  %v606_v45 = vrot.slane %v479_v52, 1  ;;  %v6112_v55 = vsel %vm545_vm1, %v612_v33, %v614_v34 }
  0xb6   : > { %v1735_v32 = vsel %vm1732_vm10, %v1702_v61, %v4844_v43  ;;  %v1736_v5 = vsel %vm1732_vm10, %v1703_v50, %v4845_v60  ;;  %v6028_v62 = vpop.permute.xlu1 %4857  ;;  %v6049_v17 = vpack.i.bf16 %v782_v7, %v780_v16  ;;  %v789_v60 = vrot.slane %v6068_v10, 2 }
  0xb7   : > { %v6030_v63 = vpop.permute.xlu0 %4852  ;;  %v1766_v3 = vpack.c.bf16 %v1736_v5, %v1735_v32  ;;  %v608_v21 = vsel %vm545_vm1, %v606_v45, %v607_v4  ;;  %v4860_v49 = vunpack.i.h.bf16 %v6028_v62  ;;  %v4859_v2 = vunpack.i.l.bf16 %v6028_v62 }
  0xb8   : > { %5147 = vrot.lane.b32.xlu1 %v6026_v41, %s5555_s24  ;;  %v6094_v39 = vpack.i.bf16 %v610_v22, %v608_v21  ;;  %v4855_v53 = vunpack.i.h.bf16 %v6030_v63  ;;  %v4854_v54 = vunpack.i.l.bf16 %v6030_v63  ;;  %v1509_v43 = vsel %vm1501_vm3, %v5735_v47, %v4850_v37 }
  0xb9   : > { %5142 = vrot.lane.b32.xlu0 %v5917_v27, %s5555_s24  ;;  %4638 = vmatmul.mubr.msk.bf16.vlgmr.msra.gmra.mrb[0].mxu0 %vm1801_vm11, %v1766_v3  ;;  %v1508_v61 = vsel %vm1501_vm3, %v5732_v46, %v4849_v25  ;;  %v1507_v5 = vsel %vm1501_vm3, %v5677_v1, %v4840_v42  ;;  %v1506_v62 = vsel %vm1501_vm3, %v5674_v0, %v4839_v48 }
  0xba   : > { %v6052_v44 = vpop.permute.xlu1 %4867  ;;  %v1541_v63 = vsel %vm1534_vm4, %v1508_v61, %v4859_v2  ;;  %v1542_v3 = vsel %vm1534_vm4, %v1509_v43, %v4860_v49  ;;  %v1540_v47 = vsel %vm1534_vm4, %v1507_v5, %v4855_v53  ;;  %v1539_v46 = vsel %vm1534_vm4, %v1506_v62, %v4854_v54 }
  0xbb   : > { %v6054_v18 = vpop.permute.xlu0 %4862  ;;  %v4870_v51 = vunpack.i.h.bf16 %v6052_v44  ;;  %v4869_v56 = vunpack.i.l.bf16 %v6052_v44 }
  0xbc   : > { %5157 = vrot.lane.b32.xlu1 %v6049_v17, %s5556_s29  ;;  %v4865_v50 = vunpack.i.h.bf16 %v6054_v18  ;;  %v4864_v32 = vunpack.i.l.bf16 %v6054_v18 }
  0xbd   : > { %5152 = vrot.lane.b32.xlu0 %v5934_v35, %s5556_s29  ;;  %v1574_v0 = vsel %vm1567_vm5, %v1541_v63, %v4869_v56  ;;  %v1575_v1 = vsel %vm1567_vm5, %v1542_v3, %v4870_v51 }
  0xbe   : > { %v6060_v14 = vpop.permute.xlu1 %4877  ;;  %v1573_v18 = vsel %vm1567_vm5, %v1540_v47, %v4865_v50 }
  0xbf   : > { %v6062_v15 = vpop.permute.xlu0 %4872  ;;  %v4880_v9 = vunpack.i.h.bf16 %v6060_v14  ;;  %v4879_v12 = vunpack.i.l.bf16 %v6060_v14 }
  0xc0   : > { %5167 = vrot.lane.b32.xlu1 %v6026_v41, %s5551_s28  ;;  %v4875_v16 = vunpack.i.h.bf16 %v6062_v15  ;;  %v4874_v7 = vunpack.i.l.bf16 %v6062_v15 }
  0xc1   : > { %5162 = vrot.lane.b32.xlu0 %v5917_v27, %s5551_s28  ;;  %v1607_v53 = vsel %vm1600_vm6, %v1574_v0, %v4879_v12  ;;  %v1608_v54 = vsel %vm1600_vm6, %v1575_v1, %v4880_v9  ;;  %v6224_v9 = vld [vmem:[%s5671_s25 + $0x170] sm:$0xff] }
  0xc2   : > { %v6086_v27 = vpop.permute.xlu1 %4887  ;;  %v1606_v21 = vsel %vm1600_vm6, %v1573_v18, %v4875_v16  ;;  %v6190_v16 = vpack.i.bf16 %v6112_v55, %v6109_v57  ;;  %v487_v57 = vld [vmem:[%s5671_s25 + $0x160] sm:$0x3] }
  0xc3   : > { %v4883_v36 = vpop.permute.xlu0 %4882  ;;  %v4890_v22 = vunpack.i.h.bf16 %v6086_v27  ;;  %v4889_v26 = vunpack.i.l.bf16 %v6086_v27 }
  0xc4   : > { %5177 = vrot.lane.b32.xlu1 %v6049_v17, %s5550_s27  ;;  %v4885_v52 = vunpack.i.h.bf16 %v4883_v36  ;;  %v4884_v8 = vunpack.i.l.bf16 %v4883_v36 }
  0xc5   : > { %5172 = vrot.lane.b32.xlu0 %v5934_v35, %s5550_s27 }
  0xc6   : > { %v6116_v58 = vpop.permute.xlu1 %4897  ;;  %v1639_v14 = vsel %vm1633_vm7, %v1606_v21, %v4885_v52  ;;  %v6235_v21 = vld [vmem:[%s5671_s25 + $0x178] sm:$0x3] }
  0xc7   : > { %v4893_v35 = vpop.permute.xlu0 %4892  ;;  %v4900_v31 = vunpack.i.h.bf16 %v6116_v58  ;;  %v4899_v33 = vunpack.i.l.bf16 %v6116_v58  ;;  %v1640_v58 = vsel %vm1633_vm7, %v1607_v53, %v4889_v26 }
  0xc8   : > { %5187 = vrot.lane.b32.xlu1 %v6081_v30, %s5549_s26  ;;  %v4895_v45 = vunpack.i.h.bf16 %v4893_v35  ;;  %v4894_v4 = vunpack.i.l.bf16 %v4893_v35  ;;  %v1641_v35 = vsel %vm1633_vm7, %v1608_v54, %v4890_v22 }
  0xc9   : > { %5182 = vrot.lane.b32.xlu0 %v5940_v6, %s5549_s26  ;;  %v1572_v6 = vsel %vm1567_vm5, %v1539_v46, %v4864_v32  ;;  %v1673_v32 = vsel %vm1666_vm8, %v1640_v58, %v4899_v33  ;;  %v1674_v5 = vsel %vm1666_vm8, %v1641_v35, %v4900_v31  ;;  %v624_v33 = vrot.slane %v6235_v21, 1 }
  0xca   : > { %v4908_v28 = vpop.permute.xlu1 %4907  ;;  %v1605_v15 = vsel %vm1600_vm6, %v1572_v6, %v4874_v7  ;;  %v1672_v37 = vsel %vm1666_vm8, %v1639_v14, %v4895_v45  ;;  %v796_v45 = vrot.slane %v487_v57, 2  ;;  %v622_v14 = vrot.slane %v6224_v9, 1 }
  0xcb   : > { %v4903_v44 = vpop.permute.xlu0 %4902  ;;  %v1638_v29 = vsel %vm1633_vm7, %v1605_v15, %v4884_v8  ;;  %v4910_v42 = vunpack.i.h.bf16 %v4908_v28  ;;  %v4909_v48 = vunpack.i.l.bf16 %v4908_v28  ;;  %v485_v8 = vld [vmem:[%s5671_s25 + $0x150] sm:$0xff]  ;;  %v486_v28 = vld [vmem:[%s5671_s25 + $0x158] sm:$0xff] }
  0xcc   : > { %v4905_v11 = vunpack.i.h.bf16 %v4903_v44  ;;  %v4904_v13 = vunpack.i.l.bf16 %v4903_v44  ;;  %5197 = vrot.lane.b32.xlu1 %v6094_v39, %s5552_s16  ;;  %v1671_v36 = vsel %vm1666_vm8, %v1638_v29, %v4894_v4  ;;  %v619_v44 = vrot.slane %v487_v57, 1  ;;  %v6221_v4 = vld [vmem:[%s5671_s25 + $0x168] sm:$0xff] }
  0xcd   : > { %5192 = vrot.lane.b32.xlu0 %v6026_v41, %s5552_s16  ;;  %v1706_v3 = vsel %vm1699_vm9, %v1673_v32, %v4909_v48  ;;  %v1707_v47 = vsel %vm1699_vm9, %v1674_v5, %v4910_v42  ;;  %v793_v6 = vrot.slane %v485_v8, 2  ;;  %v794_v18 = vrot.slane %v486_v28, 2 }
  0xce   : > { %v6158_v41 = vpop.permute.xlu1 %4917  ;;  %v1704_v49 = vsel %vm1699_vm9, %v1671_v36, %v4904_v13  ;;  %v1705_v2 = vsel %vm1699_vm9, %v1672_v37, %v4905_v11  ;;  %v621_v29 = vrot.slane %v6221_v4, 1  ;;  %v6245_v31 = vpack.i.bf16 %v486_v28, %v485_v8 }
  0xcf   : > { %v4913_v34 = vpop.permute.xlu0 %4912  ;;  %v795_v22 = vsel %vm722_vm0, %v793_v6, %v794_v18  ;;  %v797_v26 = vsel %vm722_vm0, %v794_v18, %v796_v45  ;;  %v6274_v58 = vsel %vm545_vm1, %v622_v14, %v624_v33 }
  0xd0   : > { %v4915_v25 = vunpack.i.h.bf16 %v4913_v34  ;;  %v4914_v27 = vunpack.i.l.bf16 %v4913_v34  ;;  %5207 = vrot.lane.b32.xlu1 %v6096_v40, %s5553_s22  ;;  %v6261_v48 = vsel %vm545_vm1, %v621_v29, %v622_v14 }
  0xd1   : > { %5202 = vrot.lane.b32.xlu0 %v6049_v17, %s5553_s22  ;;  %v791_v17 = vrot.slane %v6071_v20, 2 }
  0xd2   : > { %v1737_v51 = vsel %vm1732_vm10, %v1704_v49, %v4914_v27  ;;  %v1738_v56 = vsel %vm1732_vm10, %v1705_v2, %v4915_v25  ;;  %v6174_v43 = vpop.permute.xlu1 %4927  ;;  %v6252_v25 = vpack.i.bf16 %v797_v26, %v795_v22  ;;  %v4920_v49 = vunpack.i.h.bf16 %v6158_v41 }
  0xd3   : > { %v4923_v61 = vpop.permute.xlu0 %4922  ;;  %v1767_v50 = vpack.c.bf16 %v1738_v56, %v1737_v51  ;;  %v792_v52 = vsel %vm722_vm0, %v789_v60, %v791_v17  ;;  %v4930_v27 = vunpack.i.h.bf16 %v6174_v43  ;;  %v4929_v42 = vunpack.i.l.bf16 %v6174_v43 }
  0xd4   : > { %v4925_v62 = vunpack.i.h.bf16 %v4923_v61  ;;  %v4924_v63 = vunpack.i.l.bf16 %v4923_v61  ;;  %5217 = vrot.lane.b32.xlu1 %v6090_v38, %s5554_s23  ;;  %v4919_v2 = vunpack.i.l.bf16 %v6158_v41  ;;  %v798_v41 = vrot.slane %v6221_v4, 2 }
  0xd5   : > { %5212 = vrot.lane.b32.xlu0 %v6081_v30, %s5554_s23  ;;  %4641 = vmatprep.mubr.msk.bf16.mxu0 %vm1801_vm11, %v1767_v50  ;;  %v790_v30 = vsel %vm722_vm0, %v788_v59, %v789_v60  ;;  %v616_v59 = vrot.slane %v485_v8, 1  ;;  %v617_v60 = vrot.slane %v486_v28, 1  ;;  %v799_v50 = vrot.slane %v6224_v9, 2 }
  0xd6   : > { %v1740_v20 = vsel %vm1732_vm10, %v1707_v47, %v4925_v62  ;;  %v1739_v46 = vsel %vm1732_vm10, %v1706_v3, %v4924_v63  ;;  %v6192_v7 = vpop.permute.xlu1 %4937  ;;  %v6212_v19 = vpack.i.bf16 %v792_v52, %v790_v30  ;;  %v801_v17 = vrot.slane %v6235_v21, 2  ;;  %v5453_v3 = vld [vmem:[%s5671_s25 + $0x68] sm:$0xff] }
  0xd7   : > { %v6194_v0 = vpop.permute.xlu0 %4932  ;;  %v1768_v1 = vpack.c.bf16 %v1740_v20, %v1739_v46  ;;  %v618_v13 = vsel %vm545_vm1, %v616_v59, %v617_v60  ;;  %v620_v15 = vsel %vm545_vm1, %v617_v60, %v619_v44  ;;  %v4940_v53 = vunpack.i.h.bf16 %v6192_v7  ;;  %v5454_v20 = vld [vmem:[%s5671_s25 + $0x60] sm:$0xff] }
  0xd8   : > { %5227 = vrot.lane.b32.xlu1 %v6190_v16, %s5555_s24  ;;  %v6250_v37 = vpack.i.bf16 %v620_v15, %v618_v13  ;;  %v4939_v54 = vunpack.i.l.bf16 %v6192_v7  ;;  %v4935_v51 = vunpack.i.h.bf16 %v6194_v0  ;;  %v4934_v56 = vunpack.i.l.bf16 %v6194_v0 }
  0xd9   : > { %5222 = vrot.lane.b32.xlu0 %v6094_v39, %s5555_s24  ;;  %4642 = vmatmul.mubr.msk.bf16.gmra.mrb[4].mxu0 %vm1801_vm11, %v1768_v1  ;;  %v1513_v32 = vsel %vm1501_vm3, %v5785_v24, %v4930_v27  ;;  %v1512_v5 = vsel %vm1501_vm3, %v5782_v23, %v4929_v42  ;;  %v1511_v47 = vsel %vm1501_vm3, %v5453_v3, %v4920_v49 }
  0xda   : > { %v6214_v55 = vpop.permute.xlu1 %4947  ;;  %v1510_v46 = vsel %vm1501_vm3, %v5454_v20, %v4919_v2  ;;  %v1545_v7 = vsel %vm1534_vm4, %v1512_v5, %v4939_v54  ;;  %v1546_v0 = vsel %vm1534_vm4, %v1513_v32, %v4940_v53  ;;  %v1544_v24 = vsel %vm1534_vm4, %v1511_v47, %v4935_v51 }
  0xdb   : > { %v6216_v10 = vpop.permute.xlu0 %4942  ;;  %v4950_v35 = vunpack.i.h.bf16 %v6214_v55  ;;  %v4949_v43 = vunpack.i.l.bf16 %v6214_v55  ;;  %v1543_v23 = vsel %vm1534_vm4, %v1510_v46, %v4934_v56  ;;  %v491_v46 = vld [vmem:[%s5671_s25 + $0x180] sm:$0xff] }
  0xdc   : > { %5237 = vrot.lane.b32.xlu1 %v6212_v19, %s5556_s29  ;;  %v4945_v62 = vunpack.i.h.bf16 %v6216_v10  ;;  %v4944_v63 = vunpack.i.l.bf16 %v6216_v10 }
  0xdd   : > { %5232 = vrot.lane.b32.xlu0 %v6096_v40, %s5556_s29  ;;  %v1578_v52 = vsel %vm1567_vm5, %v1545_v7, %v4949_v43  ;;  %v1579_v8 = vsel %vm1567_vm5, %v1546_v0, %v4950_v35  ;;  %v492_v7 = vld [vmem:[%s5671_s25 + $0x188] sm:$0xff]  ;;  %v493_v0 = vld [vmem:[%s5671_s25 + $0x190] sm:$0x3] }
  0xde   : > { %v6228_v12 = vpop.permute.xlu1 %4957  ;;  %v1577_v59 = vsel %vm1567_vm5, %v1544_v24, %v4945_v62  ;;  %v1102_v21 = vrot.slane %v493_v0, 2 }
  0xdf   : > { %v6230_v11 = vpop.permute.xlu0 %4952  ;;  %v4960_v6 = vunpack.i.h.bf16 %v6228_v12  ;;  %v4959_v18 = vunpack.i.l.bf16 %v6228_v12 }
  0xe0   : > { %5247 = vrot.lane.b32.xlu1 %v6190_v16, %s5551_s28  ;;  %v4955_v1 = vunpack.i.h.bf16 %v6230_v11  ;;  %v4954_v30 = vunpack.i.l.bf16 %v6230_v11 }
  0xe1   : > { %5242 = vrot.lane.b32.xlu0 %v6094_v39, %s5551_s28  ;;  %v6258_v39 = vpack.i.bf16 %v6224_v9, %v6221_v4  ;;  %v1611_v56 = vsel %vm1600_vm6, %v1578_v52, %v4959_v18  ;;  %v1612_v35 = vsel %vm1600_vm6, %v1579_v8, %v4960_v6  ;;  %v800_v8 = vsel %vm722_vm0, %v798_v41, %v799_v50  ;;  %v6391_v6 = vld [vmem:[%s5671_s25 + $0x1a8] sm:$0x3] }
  0xe2   : > { %v6248_v34 = vpop.permute.xlu1 %4967  ;;  %v1610_v15 = vsel %vm1600_vm6, %v1577_v59, %v4955_v1  ;;  %v6351_v1 = vpack.i.bf16 %v6274_v58, %v6261_v48  ;;  %v1099_v4 = vrot.slane %v491_v46, 2  ;;  %v1100_v9 = vrot.slane %v492_v7, 2 }
  0xe3   : > { %v4963_v36 = vpop.permute.xlu0 %4962  ;;  %v4970_v22 = vunpack.i.h.bf16 %v6248_v34  ;;  %v4969_v26 = vunpack.i.l.bf16 %v6248_v34  ;;  %v6395_v18 = vpack.i.bf16 %v492_v7, %v491_v46 }
  0xe4   : > { %5257 = vrot.lane.b32.xlu1 %v6212_v19, %s5550_s27  ;;  %v4965_v28 = vunpack.i.h.bf16 %v4963_v36  ;;  %v4964_v57 = vunpack.i.l.bf16 %v4963_v36 }
  0xe5   : > { %5252 = vrot.lane.b32.xlu0 %v6096_v40, %s5550_s27  ;;  %v1645_v32 = vsel %vm1633_vm7, %v1612_v35, %v4970_v22 }
  0xe6   : > { %v6279_v61 = vpop.permute.xlu1 %4977  ;;  %v1643_v12 = vsel %vm1633_vm7, %v1610_v15, %v4965_v28 }
  0xe7   : > { %v4973_v40 = vpop.permute.xlu0 %4972  ;;  %v4980_v14 = vunpack.i.h.bf16 %v6279_v61  ;;  %v4979_v33 = vunpack.i.l.bf16 %v6279_v61 }
  0xe8   : > { %5267 = vrot.lane.b32.xlu1 %v6245_v31, %s5549_s26  ;;  %v4975_v60 = vunpack.i.h.bf16 %v4973_v40  ;;  %v4974_v44 = vunpack.i.l.bf16 %v4973_v40  ;;  %v1644_v40 = vsel %vm1633_vm7, %v1611_v56, %v4969_v26  ;;  %v5455_v56 = vld [vmem:[%s5671_s25 + $0x98] sm:$0xff] }
  0xe9   : > { %5262 = vrot.lane.b32.xlu0 %v6090_v38, %s5549_s26  ;;  %v1576_v38 = vsel %vm1567_vm5, %v1543_v23, %v4944_v63  ;;  %v1677_v63 = vsel %vm1666_vm8, %v1644_v40, %v4979_v33  ;;  %v1678_v3 = vsel %vm1666_vm8, %v1645_v32, %v4980_v14  ;;  %v1302_v33 = vrot.slane %v6391_v6, 1 }
  0xea   : > { %v4988_v55 = vpop.permute.xlu1 %4987  ;;  %v1609_v13 = vsel %vm1600_vm6, %v1576_v38, %v4954_v30  ;;  %v1676_v42 = vsel %vm1666_vm8, %v1643_v12, %v4975_v60  ;;  %v6385_v60 = vld [vmem:[%s5671_s25 + $0x198] sm:$0xff] }
  0xeb   : > { %v4983_v10 = vpop.permute.xlu0 %4982  ;;  %v1642_v29 = vsel %vm1633_vm7, %v1609_v13, %v4964_v57  ;;  %v4990_v2 = vunpack.i.h.bf16 %v4988_v55  ;;  %v4989_v53 = vunpack.i.l.bf16 %v4988_v55  ;;  %v998_v57 = vrot.slane %v491_v46, 1 }
  0xec   : > { %v4985_v45 = vunpack.i.h.bf16 %v4983_v10  ;;  %v4984_v11 = vunpack.i.l.bf16 %v4983_v10  ;;  %5277 = vrot.lane.b32.xlu1 %v6250_v37, %s5552_s16  ;;  %v1675_v27 = vsel %vm1666_vm8, %v1642_v29, %v4974_v44  ;;  %v999_v55 = vrot.slane %v492_v7, 1  ;;  %v6388_v44 = vld [vmem:[%s5671_s25 + $0x1a0] sm:$0xff] }
  0xed   : > { %5272 = vrot.lane.b32.xlu0 %v6190_v16, %s5552_s16  ;;  %v1710_v24 = vsel %vm1699_vm9, %v1677_v63, %v4989_v53  ;;  %v1711_v23 = vsel %vm1699_vm9, %v1678_v3, %v4990_v2  ;;  %v1001_v10 = vrot.slane %v493_v0, 1  ;;  %v1300_v15 = vrot.slane %v6388_v44, 1  ;;  %v5458_v3 = vld [vmem:[%s5671_s25 + $0xa8] sm:$0xff] }
  0xee   : > { %v6321_v16 = vpop.permute.xlu1 %4997  ;;  %v1708_v54 = vsel %vm1699_vm9, %v1675_v27, %v4984_v11  ;;  %v1709_v51 = vsel %vm1699_vm9, %v1676_v42, %v4985_v45  ;;  %v1000_v38 = vsel %vm545_vm1, %v998_v57, %v999_v55  ;;  %v1101_v45 = vsel %vm722_vm0, %v1099_v4, %v1100_v9 }
  0xef   : > { %v4993_v36 = vpop.permute.xlu0 %4992  ;;  %v1002_v59 = vsel %vm545_vm1, %v999_v55, %v1001_v10  ;;  %v1103_v11 = vsel %vm722_vm0, %v1100_v9, %v1102_v21  ;;  %v1299_v22 = vrot.slane %v6385_v60, 1  ;;  %v5000_v26 = vunpack.i.h.bf16 %v6321_v16 }
  0xf0   : > { %v4995_v49 = vunpack.i.h.bf16 %v4993_v36  ;;  %v4994_v34 = vunpack.i.l.bf16 %v4993_v36  ;;  %5287 = vrot.lane.b32.xlu1 %v6252_v25, %s5553_s22  ;;  %v6401_v13 = vpack.i.bf16 %v1002_v59, %v1000_v38  ;;  %v4999_v29 = vunpack.i.l.bf16 %v6321_v16 }
  0xf1   : > { %5282 = vrot.lane.b32.xlu0 %v6212_v19, %s5553_s22  ;;  %v6410_v42 = vpack.i.bf16 %v1103_v11, %v1101_v45  ;;  %v5376_v16 = vpack.i.bf16 %v6388_v44, %v6385_v60  ;;  %v1400_v2 = vrot.slane %v6385_v60, 2  ;;  %v1515_v35 = vsel %vm1501_vm3, %v5455_v56, %v5000_v26 }
  0xf2   : > { %v1741_v43 = vsel %vm1732_vm10, %v1708_v54, %v4994_v34  ;;  %v1742_v61 = vsel %vm1732_vm10, %v1709_v51, %v4995_v49  ;;  %v6337_v5 = vpop.permute.xlu1 %5007  ;;  %v1401_v34 = vrot.slane %v6388_v44, 2 }
  0xf3   : > { %v5003_v19 = vpop.permute.xlu0 %5002  ;;  %v1769_v62 = vpack.c.bf16 %v1742_v61, %v1741_v43  ;;  %v5010_v36 = vunpack.i.h.bf16 %v6337_v5  ;;  %v5009_v27 = vunpack.i.l.bf16 %v6337_v5  ;;  %v5456_v43 = vld [vmem:[%s5671_s25 + $0x90] sm:$0xff]  ;;  %v6432_v5 = vsel %vm545_vm1, %v1300_v15, %v1302_v33 }
  0xf4   : > { %v5005_v47 = vunpack.i.h.bf16 %v5003_v19  ;;  %v5004_v20 = vunpack.i.l.bf16 %v5003_v19  ;;  %5297 = vrot.lane.b32.xlu1 %v6258_v39, %s5554_s23  ;;  %v1514_v61 = vsel %vm1501_vm3, %v5456_v43, %v4999_v29  ;;  %v1403_v19 = vrot.slane %v6391_v6, 2 }
  0xf5   : > { %5292 = vrot.lane.b32.xlu0 %v6245_v31, %s5554_s23  ;;  %4645 = vmatprep.mubr.msk.bf16.mxu0 %vm1801_vm11, %v1769_v62  ;;  %v802_v31 = vsel %vm722_vm0, %v799_v50, %v801_v17  ;;  %v5457_v62 = vld [vmem:[%s5671_s25 + $0xb0] sm:$0xff] }
  0xf6   : > { %v1744_v30 = vsel %vm1732_vm10, %v1711_v23, %v5005_v47  ;;  %v1743_v52 = vsel %vm1732_vm10, %v1710_v24, %v5004_v20  ;;  %v6367_v48 = vpop.permute.xlu1 %5017  ;;  %v6376_v41 = vpack.i.bf16 %v802_v31, %v800_v8  ;;  %v1517_v63 = vsel %vm1501_vm3, %v5457_v62, %v5010_v36 }
  0xf7   : > { %v6369_v58 = vpop.permute.xlu0 %5012  ;;  %v1770_v28 = vpack.c.bf16 %v1744_v30, %v1743_v52  ;;  %v5019_v49 = vunpack.i.l.bf16 %v6367_v48  ;;  %v5020_v53 = vunpack.i.h.bf16 %v6367_v48  ;;  %v1516_v47 = vsel %vm1501_vm3, %v5458_v3, %v5009_v27  ;;  %v348_v3 = vld [vmem:[#allocation2 + $0x18] sm:$0x1] }
  0xf8   : > { %5307 = vrot.lane.b32.xlu1 %v6351_v1, %s5555_s24  ;;  %v5015_v54 = vunpack.i.h.bf16 %v6369_v58  ;;  %v5014_v51 = vunpack.i.l.bf16 %v6369_v58 }
  0xf9   : > { %5302 = vrot.lane.b32.xlu0 %v6250_v37, %s5555_s24  ;;  %4646 = vmatmul.mubr.msk.bf16.gmra.mrb[8].mxu0 %vm1801_vm11, %v1770_v28  ;;  %v1549_v7 = vsel %vm1534_vm4, %v1516_v47, %v5019_v49  ;;  %v1550_v30 = vsel %vm1534_vm4, %v1517_v63, %v5020_v53 }
  0xfa   : > { %v6378_v50 = vpop.permute.xlu1 %5027  ;;  %v1548_v52 = vsel %vm1534_vm4, %v1515_v35, %v5015_v54  ;;  %v1547_v8 = vsel %vm1534_vm4, %v1514_v61, %v5014_v51 }
  0xfb   : > { %v6380_v17 = vpop.permute.xlu0 %5022  ;;  %v5030_v20 = vunpack.i.h.bf16 %v6378_v50  ;;  %v5029_v46 = vunpack.i.l.bf16 %v6378_v50 }
  0xfc   : > { %5317 = vrot.lane.b32.xlu1 %v6376_v41, %s5556_s29  ;;  %v5025_v0 = vunpack.i.h.bf16 %v6380_v17  ;;  %v5024_v24 = vunpack.i.l.bf16 %v6380_v17 }
  0xfd   : > { %5312 = vrot.lane.b32.xlu0 %v6252_v25, %s5556_s29  ;;  %v1582_v4 = vsel %vm1567_vm5, %v1549_v7, %v5029_v46 }
  0xfe   : > { %v5038_v12 = vpop.permute.xlu1 %5037  ;;  %v1580_v50 = vsel %vm1567_vm5, %v1547_v8, %v5024_v24  ;;  %v1581_v17 = vsel %vm1567_vm5, %v1548_v52, %v5025_v0  ;;  %v5557_v0 = vmov 0   ;;  %v345_v52 = vld [vmem:[#allocation2 + $0xc] sm:$0x1] }
  0xff   : > { %v5033_v14 = vpop.permute.xlu0 %5032  ;;  %v5039_v23 = vunpack.i.l.bf16 %v5038_v12  ;;  %v5040_v31 = vunpack.i.h.bf16 %v5038_v12  ;;  %333 = vst.msk [vmem:[#allocation2] sm:$0xf] %vm332_vm12, %v5557_v0  ;;  %334 = vst.msk [vmem:[#allocation2 + $0x4] sm:$0xf] %vm332_vm12, %v5557_v0  ;;  %3684 = vmatprep.subr.bf16.mxu0 %v5557_v0  ;;  %4684 = vmatprep.subr.bf16.mxu1 %v5557_v0 }
 0x100   : > { %5327 = vrot.lane.b32.xlu1 %v6351_v1, %s5551_s28  ;;  %v5035_v48 = vunpack.i.h.bf16 %v5033_v14  ;;  %v5034_v58 = vunpack.i.l.bf16 %v5033_v14  ;;  %336 = vst.msk [vmem:[#allocation2 + $0x8] sm:$0x1] %vm335_vm13, %v5557_v0  ;;  %340 = vst.msk [vmem:[#allocation2 + $0xd4] sm:$0x1] %vm335_vm13, %v5557_v0  ;;  %vm3508_vm13 = vcmask 916480  }
 0x101   : > { %5322 = vrot.lane.b32.xlu0 %v6250_v37, %s5551_s28  ;;  %v6425_v37 = vsel %vm545_vm1, %v1299_v22, %v1300_v15  ;;  %v1615_v38 = vsel %vm1600_vm6, %v1582_v4, %v5039_v23  ;;  %338 = vst.msk [vmem:[#allocation2 + $0xcc] sm:$0xf] %vm332_vm12, %v5557_v0  ;;  %339 = vst.msk [vmem:[#allocation2 + $0xd0] sm:$0xf] %vm332_vm12, %v5557_v0  ;;  %s5562_s28 = smov 64  }
 0x102   : > { %v5048_v40 = vpop.permute.xlu1 %5047  ;;  %v1613_v26 = vsel %vm1600_vm6, %v1580_v50, %v5034_v58  ;;  %v1614_v29 = vsel %vm1600_vm6, %v1581_v17, %v5035_v48  ;;  %v5386_v17 = vpack.i.bf16 %v6432_v5, %v6425_v37 }
 0x103   : > { %v5043_v32 = vpop.permute.xlu0 %5042  ;;  %v5050_v28 = vunpack.i.h.bf16 %v5048_v40  ;;  %v5049_v57 = vunpack.i.l.bf16 %v5048_v40 }
 0x104   : > { %5337 = vrot.lane.b32.xlu1 %v6376_v41, %s5550_s27  ;;  %v5045_v9 = vunpack.i.h.bf16 %v5043_v32  ;;  %v5044_v21 = vunpack.i.l.bf16 %v5043_v32 }
 0x105   : > { %5332 = vrot.lane.b32.xlu0 %v6252_v25, %s5550_s27  ;;  %v1583_v25 = vsel %vm1567_vm5, %v1550_v30, %v5030_v20  ;;  %v1648_v12 = vsel %vm1633_vm7, %v1615_v38, %v5049_v57  ;;  %v349_v30 = vsel %vm6479_vm15, 0, %v348_v3 }
 0x106   : > { %v5058_v55 = vpop.permute.xlu1 %5057  ;;  %v1616_v45 = vsel %vm1600_vm6, %v1583_v25, %v5040_v31  ;;  %v1647_v27 = vsel %vm1633_vm7, %v1614_v29, %v5045_v9  ;;  %350 = vst [vmem:[#allocation2 + $0x18] sm:$0x1] %v349_v30  ;;  %v346_v25 = vsel %vm6479_vm15, 0, %v345_v52  ;;  %v5460_v29 = vld [vmem:[%s5671_s25 + $0xc0] sm:$0xff] }
 0x107   : > { %v5053_v10 = vpop.permute.xlu0 %5052  ;;  %v5059_v59 = vunpack.i.l.bf16 %v5058_v55  ;;  %v5060_v11 = vunpack.i.h.bf16 %v5058_v55  ;;  %v1649_v14 = vsel %vm1633_vm7, %v1616_v45, %v5050_v28  ;;  %v398_v28 = vld [vmem:[#allocation2 + $0x20] sm:$0x1]  ;;  %347 = vst [vmem:[#allocation2 + $0xc] sm:$0x1] %v346_v25 }
 0x108   : > { %v5055_v15 = vunpack.i.h.bf16 %v5053_v10  ;;  %v5054_v22 = vunpack.i.l.bf16 %v5053_v10  ;;  %5347 = vrot.lane.b32.xlu1 %v6395_v18, %s5549_s26  ;;  %v399_v9 = vsel %vm6511_vm14, 0, %v398_v28 }
 0x109   : > { %5342 = vrot.lane.b32.xlu0 %v6258_v39, %s5549_s26  ;;  %v1646_v39 = vsel %vm1633_vm7, %v1613_v26, %v5044_v21  ;;  %v1681_v54 = vsel %vm1666_vm8, %v1648_v12, %v5059_v59  ;;  %v1682_v35 = vsel %vm1666_vm8, %v1649_v14, %v5060_v11  ;;  %v395_v21 = vld [vmem:[#allocation2 + $0x14] sm:$0x1]  ;;  %400 = vst [vmem:[#allocation2 + $0x20] sm:$0x1] %v399_v9 }
 0x10a   : > { %v5068_v33 = vpop.permute.xlu1 %5067  ;;  %v1679_v43 = vsel %vm1666_vm8, %v1646_v39, %v5054_v22  ;;  %v1680_v61 = vsel %vm1666_vm8, %v1647_v27, %v5055_v15  ;;  %v396_v50 = vsel %vm6511_vm14, 0, %v395_v21  ;;  %v1402_v11 = vsel %vm722_vm0, %v1400_v2, %v1401_v34  ;;  %v5404_v15 = vld [vmem:[#allocation2] sm:$0xff]   ;;  %v5459_v2 = vld [vmem:[%s5671_s25 + $0xc8] sm:$0xff] }
 0x10b   : > { %v5063_v36 = vpop.permute.xlu0 %5062  ;;  %v5070_v49 = vunpack.i.h.bf16 %v5068_v33  ;;  %v5069_v53 = vunpack.i.l.bf16 %v5068_v33  ;;  %397 = vst [vmem:[#allocation2 + $0x14] sm:$0x1] %v396_v50  ;;  %v5405_v14 = vld [vmem:[#allocation2 + $0x8] ss:$0 sps:$4 sm:$0x11]   ;;  %v5461_v33 = vld [vmem:[%s5671_s25 + $0xd8] sm:$0xff] }
 0x10c   : > { %v5065_v51 = vunpack.i.h.bf16 %v5063_v36  ;;  %v5064_v56 = vunpack.i.l.bf16 %v5063_v36  ;;  %5357 = vrot.lane.b32.xlu1 %v6401_v13, %s5552_s16  ;;  %v5462_v39 = vld [vmem:[%s5671_s25 + $0xe0] sm:$0xff] }
 0x10d   : > { %5352 = vrot.lane.b32.xlu0 %v6351_v1, %s5552_s16  ;;  %v1714_v40 = vsel %vm1699_vm9, %v1681_v54, %v5069_v53  ;;  %v1715_v32 = vsel %vm1699_vm9, %v1682_v35, %v5070_v49  ;;  %v2802_v49 = vshrl.u32 %v5404_v15, 16  ;;  %v2804_v53 = vshll.u32 %v5404_v15, 16 }
 0x10e   : > { %v5078_v62 = vpop.permute.xlu1 %5077  ;;  %v1712_v24 = vsel %vm1699_vm9, %v1679_v43, %v5064_v56  ;;  %v1713_v23 = vsel %vm1699_vm9, %v1680_v61, %v5065_v51 }
 0x10f   : > { %v5073_v63 = vpop.permute.xlu0 %5072  ;;  %v5080_v1 = vunpack.i.h.bf16 %v5078_v62  ;;  %v5079_v47 = vunpack.i.l.bf16 %v5078_v62  ;;  %v2809_v62 = vshll.u32 %v5405_v14, 16 }
 0x110   : > { %v5075_v20 = vunpack.i.h.bf16 %v5073_v63  ;;  %v5074_v46 = vunpack.i.l.bf16 %v5073_v63  ;;  %5367 = vrot.lane.b32.xlu1 %v6410_v42, %s5553_s22 }
 0x111   : > { %5362 = vrot.lane.b32.xlu0 %v6376_v41, %s5553_s22  ;;  %v1747_v8 = vsel %vm1732_vm10, %v1714_v40, %v5079_v47  ;;  %v1748_v31 = vsel %vm1732_vm10, %v1715_v32, %v5080_v1  ;;  %v2806_v32 = vrot.slane %v2804_v53, 1  ;;  %v2811_v47 = vrot.slane %v2809_v62, 1  ;;  %s5558_s22 = smov 96  }
 0x112   : > { %v1745_v48 = vsel %vm1732_vm10, %v1712_v24, %v5074_v46  ;;  %v1746_v58 = vsel %vm1732_vm10, %v1713_v23, %v5075_v20  ;;  %v5088_v55 = vpop.permute.xlu1 %5087  ;;  %v1772_v4 = vpack.c.bf16 %v1748_v31, %v1747_v8  ;;  %v3026_v20 = vrot.slane %v5404_v15, 1 }
 0x113   : > { %v5083_v57 = vpop.permute.xlu0 %5082  ;;  %v1771_v10 = vpack.c.bf16 %v1746_v58, %v1745_v48  ;;  %v5089_v37 = vunpack.i.l.bf16 %v5088_v55  ;;  %v5090_v5 = vunpack.i.h.bf16 %v5088_v55  ;;  %v2807_v1 = vor.u32 %v2806_v32, %v2802_v49 }
 0x114   : > { %5377 = vrot.lane.b32.xlu1 %v5376_v16, %s5554_s23  ;;  %v5085_v38 = vunpack.i.h.bf16 %v5083_v57  ;;  %v5084_v59 = vunpack.i.l.bf16 %v5083_v57  ;;  %v1404_v16 = vsel %vm722_vm0, %v1401_v34, %v1403_v19  ;;  %vm2800_vm0 = vsmask.f32 7424 }
 0x115   : > { %5372 = vrot.lane.b32.xlu0 %v6395_v18, %s5554_s23  ;;  %4649 = vmatprep.mubr.msk.bf16.mxu0 %vm1801_vm11, %v1771_v10  ;;  %v5396_v60 = vpack.i.bf16 %v1404_v16, %v1402_v11  ;;  %v1521_v27 = vsel %vm1501_vm3, %v5462_v39, %v5090_v5  ;;  %v3027_v46 = vrot.slane %v5405_v14, 1  ;;  %v2812_v28 = vsel %vm2800_vm0, %v2807_v1, %v2811_v47 }
 0x116   : > { %4650 = vmatmul.mubr.msk.bf16.gmra.mrb[12].mxu0 %vm1801_vm11, %v1772_v4  ;;  %v5098_v45 = vpop.permute.xlu1 %5097  ;;  %v1519_v6 = vsel %vm1501_vm3, %v5459_v2, %v5085_v38  ;;  %v1518_v44 = vsel %vm1501_vm3, %v5460_v29, %v5084_v59 }
 0x117   : > { %v5093_v18 = vpop.permute.xlu0 %5092  ;;  %v5099_v34 = vunpack.i.l.bf16 %v5098_v45  ;;  %v5100_v36 = vunpack.i.h.bf16 %v5098_v45  ;;  %v3028_v25 = vsel %vm545_vm1, %v3026_v20, %v3027_v46  ;;  %v404_v46 = vld [vmem:[#allocation2 + $0x38] sm:$0x1] }
 0x118   : > { %v5095_v22 = vunpack.i.h.bf16 %v5093_v18  ;;  %v5094_v26 = vunpack.i.l.bf16 %v5093_v18  ;;  %5387 = vrot.lane.b32.xlu1 %v5386_v17, %s5555_s24 }
 0x119   : > { %5382 = vrot.lane.b32.xlu0 %v6401_v13, %s5555_s24  ;;  %v1520_v13 = vsel %vm1501_vm3, %v5461_v33, %v5089_v37  ;;  %v1554_v63 = vsel %vm1534_vm4, %v1521_v27, %v5100_v36  ;;  %s5566_s24 = smov [#allocation3]  }
 0x11a   : > { %v5108_v12 = vpop.permute.xlu1 %5107  ;;  %v1551_v54 = vsel %vm1534_vm4, %v1518_v44, %v5094_v26  ;;  %v1552_v51 = vsel %vm1534_vm4, %v1519_v6, %v5095_v22  ;;  %v1553_v35 = vsel %vm1534_vm4, %v1520_v13, %v5099_v34  ;;  %v354_v26 = vld [vmem:[#allocation2 + $0x30] sm:$0x1] }
 0x11b   : > { %v5103_v19 = vpop.permute.xlu0 %5102  ;;  %v5110_v3 = vunpack.i.h.bf16 %v5108_v12  ;;  %v355_v6 = vsel %vm6479_vm15, 0, %v354_v26 }
 0x11c   : > { %v5104_v56 = vunpack.i.l.bf16 %v5103_v19  ;;  %5397 = vrot.lane.b32.xlu1 %v5396_v60, %s5556_s29  ;;  %v5105_v43 = vunpack.i.h.bf16 %v5103_v19  ;;  %356 = vst [vmem:[#allocation2 + $0x30] sm:$0x1] %v355_v6 }
 0x11d   : > { %5392 = vrot.lane.b32.xlu0 %v6410_v42, %s5556_s29  ;;  %v5109_v42 = vunpack.i.l.bf16 %v5108_v12  ;;  %v1587_v55 = vsel %vm1567_vm5, %v1554_v63, %v5110_v3  ;;  %v351_v63 = vld [vmem:[#allocation2 + $0x24] sm:$0x1] }
 0x11e   : > { %v5118_v40 = vpop.permute.xlu1 %5117  ;;  %v1584_v24 = vsel %vm1567_vm5, %v1551_v54, %v5104_v56  ;;  %v1585_v52 = vsel %vm1567_vm5, %v1552_v51, %v5105_v43  ;;  %v352_v20 = vsel %vm6479_vm15, 0, %v351_v63 }
 0x11f   : > { %v5113_v61 = vpop.permute.xlu0 %5112  ;;  %v5120_v8 = vunpack.i.h.bf16 %v5118_v40  ;;  %v5119_v31 = vunpack.i.l.bf16 %v5118_v40  ;;  %v1586_v57 = vsel %vm1567_vm5, %v1553_v35, %v5109_v42  ;;  %353 = vst [vmem:[#allocation2 + $0x24] sm:$0x1] %v352_v20 }
 0x120   : > { %v5115_v23 = vunpack.i.h.bf16 %v5113_v61  ;;  %v5114_v30 = vunpack.i.l.bf16 %v5113_v61 }
 0x121   : > { %2993 = vrot.lane.b32.xlu0 %v2812_v28, %s5552_s16  ;;  %v1619_v38 = vsel %vm1600_vm6, %v1586_v57, %v5119_v31  ;;  %v1620_v59 = vsel %vm1600_vm6, %v1587_v55, %v5120_v8 }
 0x122   : > { %v5128_v58 = vpop.permute.xlu1 %5127  ;;  %v1617_v9 = vsel %vm1600_vm6, %v1584_v24, %v5114_v30  ;;  %v1618_v21 = vsel %vm1600_vm6, %v1585_v52, %v5115_v23  ;;  %v405_v30 = vsel %vm6511_vm14, 0, %v404_v46  ;;  %v401_v52 = vld [vmem:[#allocation2 + $0x2c] sm:$0x1] }
 0x123   : > { %v5123_v48 = vpop.permute.xlu0 %5122  ;;  %v5130_v50 = vunpack.i.h.bf16 %v5128_v58  ;;  %v5129_v17 = vunpack.i.l.bf16 %v5128_v58  ;;  %406 = vst [vmem:[#allocation2 + $0x38] sm:$0x1] %v405_v30  ;;  %v402_v8 = vsel %vm6511_vm14, 0, %v401_v52 }
 0x124   : > { %v5125_v10 = vunpack.i.h.bf16 %v5123_v48  ;;  %v5124_v4 = vunpack.i.l.bf16 %v5123_v48  ;;  %403 = vst [vmem:[#allocation2 + $0x2c] sm:$0x1] %v402_v8 }
 0x125   : > { %3074 = vrot.lane.b32.xlu0 %v3028_v25, %s5556_s29  ;;  %v1652_v60 = vsel %vm1633_vm7, %v1619_v38, %v5129_v17  ;;  %v1653_v2 = vsel %vm1633_vm7, %v1620_v59, %v5130_v50  ;;  %v5464_v17 = vld [vmem:[%s5671_s25 + $0xf0] sm:$0xff] }
 0x126   : > { %v5138_v16 = vpop.permute.xlu1 %5137  ;;  %v1650_v37 = vsel %vm1633_vm7, %v1617_v9, %v5124_v4  ;;  %v1651_v5 = vsel %vm1633_vm7, %v1618_v21, %v5125_v10  ;;  %v5463_v21 = vld [vmem:[%s5671_s25 + $0xf8] sm:$0xff] }
 0x127   : > { %v5133_v18 = vpop.permute.xlu0 %5132  ;;  %v5140_v15 = vunpack.i.h.bf16 %v5138_v16  ;;  %v5139_v22 = vunpack.i.l.bf16 %v5138_v16  ;;  %v5466_v16 = vld [vmem:[%s5671_s25 + $0x108] sm:$0xff] }
 0x128   : > { %v5135_v45 = vunpack.i.h.bf16 %v5133_v18  ;;  %v5134_v11 = vunpack.i.l.bf16 %v5133_v18 }
 0x129   : > { %v1685_v33 = vsel %vm1666_vm8, %v1652_v60, %v5139_v22  ;;  %v1686_v13 = vsel %vm1666_vm8, %v1653_v2, %v5140_v15 }
 0x12a   : > { %v1683_v44 = vsel %vm1666_vm8, %v1650_v37, %v5134_v11  ;;  %v1684_v34 = vsel %vm1666_vm8, %v1651_v5, %v5135_v45  ;;  %v5148_v14 = vpop.permute.xlu1 %5147  ;;  %v5465_v45 = vld [vmem:[%s5671_s25 + $0x110] sm:$0xff] }
 0x12b   : > { %v5143_v29 = vpop.permute.xlu0 %5142  ;;  %v5150_v36 = vunpack.i.h.bf16 %v5148_v14  ;;  %v5149_v39 = vunpack.i.l.bf16 %v5148_v14 }
 0x12c   : > { %v5145_v19 = vunpack.i.h.bf16 %v5143_v29  ;;  %v5144_v12 = vunpack.i.l.bf16 %v5143_v29 }
 0x12d   : > { %v1718_v54 = vsel %vm1699_vm9, %v1685_v33, %v5149_v39  ;;  %v1719_v51 = vsel %vm1699_vm9, %v1686_v13, %v5150_v36 }
 0x12e   : > { %v1716_v27 = vsel %vm1699_vm9, %v1683_v44, %v5144_v12  ;;  %v1717_v49 = vsel %vm1699_vm9, %v1684_v34, %v5145_v19  ;;  %v5158_v43 = vpop.permute.xlu1 %5157 }
 0x12f   : > { %v5153_v53 = vpop.permute.xlu0 %5152  ;;  %v5160_v61 = vunpack.i.h.bf16 %v5158_v43  ;;  %v5159_v40 = vunpack.i.l.bf16 %v5158_v43 }
 0x130   : > { %v5155_v56 = vunpack.i.h.bf16 %v5153_v53  ;;  %v5154_v35 = vunpack.i.l.bf16 %v5153_v53 }
 0x131   : > { %v1751_v3 = vsel %vm1732_vm10, %v1718_v54, %v5159_v40  ;;  %v1752_v42 = vsel %vm1732_vm10, %v1719_v51, %v5160_v61 }
 0x132   : > { %v1749_v32 = vsel %vm1732_vm10, %v1716_v27, %v5154_v35  ;;  %v1750_v62 = vsel %vm1732_vm10, %v1717_v49, %v5155_v56  ;;  %v5168_v24 = vpop.permute.xlu1 %5167  ;;  %v1774_v23 = vpack.c.bf16 %v1752_v42, %v1751_v3 }
 0x133   : > { %v5163_v1 = vpop.permute.xlu0 %5162  ;;  %v1773_v47 = vpack.c.bf16 %v1750_v62, %v1749_v32  ;;  %v5170_v57 = vunpack.i.h.bf16 %v5168_v24  ;;  %v5169_v55 = vunpack.i.l.bf16 %v5168_v24  ;;  %v360_v24 = vld [vmem:[#allocation2 + $0x48] sm:$0x1] }
 0x134   : > { %v5165_v58 = vunpack.i.h.bf16 %v5163_v1  ;;  %v5164_v28 = vunpack.i.l.bf16 %v5163_v1  ;;  %v361_v52 = vsel %vm6479_vm15, 0, %v360_v24 }
 0x135   : > { %4653 = vmatprep.mubr.msk.bf16.mxu0 %vm1801_vm11, %v1773_v47  ;;  %v1525_v11 = vsel %vm1501_vm3, %v5465_v45, %v5170_v57  ;;  %v1524_v37 = vsel %vm1501_vm3, %v5466_v16, %v5169_v55  ;;  %362 = vst [vmem:[#allocation2 + $0x48] sm:$0x1] %v361_v52 }
 0x136   : > { %4654 = vmatmul.mubr.msk.bf16.gmra.mrb[16].mxu0 %vm1801_vm11, %v1774_v23  ;;  %v5178_v48 = vpop.permute.xlu1 %5177  ;;  %v1523_v50 = vsel %vm1501_vm3, %v5463_v21, %v5165_v58  ;;  %v1522_v38 = vsel %vm1501_vm3, %v5464_v17, %v5164_v28 }
 0x137   : > { %v5173_v31 = vpop.permute.xlu0 %5172  ;;  %v5180_v59 = vunpack.i.h.bf16 %v5178_v48  ;;  %v5179_v18 = vunpack.i.l.bf16 %v5178_v48 }
 0x138   : > { %v5175_v4 = vunpack.i.h.bf16 %v5173_v31  ;;  %v5174_v25 = vunpack.i.l.bf16 %v5173_v31 }
 0x139   : > { %v1557_v44 = vsel %vm1534_vm4, %v1524_v37, %v5179_v18  ;;  %v1558_v34 = vsel %vm1534_vm4, %v1525_v11, %v5180_v59 }
 0x13a   : > { %v5188_v9 = vpop.permute.xlu1 %5187  ;;  %v1555_v26 = vsel %vm1534_vm4, %v1522_v38, %v5174_v25  ;;  %v1556_v60 = vsel %vm1534_vm4, %v1523_v50, %v5175_v4 }
 0x13b   : > { %v5183_v10 = vpop.permute.xlu0 %5182  ;;  %v5190_v2 = vunpack.i.h.bf16 %v5188_v9  ;;  %v5189_v6 = vunpack.i.l.bf16 %v5188_v9 }
 0x13c   : > { %v5185_v5 = vunpack.i.h.bf16 %v5183_v10  ;;  %v5184_v15 = vunpack.i.l.bf16 %v5183_v10 }
 0x13d   : > { %v1590_v27 = vsel %vm1567_vm5, %v1557_v44, %v5189_v6  ;;  %v1591_v49 = vsel %vm1567_vm5, %v1558_v34, %v5190_v2 }
 0x13e   : > { %v5198_v29 = vpop.permute.xlu1 %5197  ;;  %v1588_v14 = vsel %vm1567_vm5, %v1555_v26, %v5184_v15  ;;  %v1589_v33 = vsel %vm1567_vm5, %v1556_v60, %v5185_v5  ;;  %v357_v15 = vld [vmem:[#allocation2 + $0x3c] sm:$0x1] }
 0x13f   : > { %v5193_v22 = vpop.permute.xlu0 %5192  ;;  %v5200_v13 = vunpack.i.h.bf16 %v5198_v29  ;;  %v5199_v36 = vunpack.i.l.bf16 %v5198_v29  ;;  %v358_v6 = vsel %vm6479_vm15, 0, %v357_v15  ;;  %v410_v29 = vld [vmem:[#allocation2 + $0x50] sm:$0x1] }
 0x140   : > { %v5195_v19 = vunpack.i.h.bf16 %v5193_v22  ;;  %v5194_v12 = vunpack.i.l.bf16 %v5193_v22  ;;  %359 = vst [vmem:[#allocation2 + $0x3c] sm:$0x1] %v358_v6 }
 0x141   : > { %v1623_v40 = vsel %vm1600_vm6, %v1590_v27, %v5199_v36  ;;  %v1624_v32 = vsel %vm1600_vm6, %v1591_v49, %v5200_v13 }
 0x142   : > { %v5208_v53 = vpop.permute.xlu1 %5207  ;;  %v1621_v56 = vsel %vm1600_vm6, %v1588_v14, %v5194_v12  ;;  %v1622_v35 = vsel %vm1600_vm6, %v1589_v33, %v5195_v19  ;;  %v411_v19 = vsel %vm6511_vm14, 0, %v410_v29  ;;  %v407_v12 = vld [vmem:[#allocation2 + $0x44] sm:$0x1] }
 0x143   : > { %v5203_v39 = vpop.permute.xlu0 %5202  ;;  %v5210_v43 = vunpack.i.h.bf16 %v5208_v53  ;;  %v5209_v61 = vunpack.i.l.bf16 %v5208_v53  ;;  %412 = vst [vmem:[#allocation2 + $0x50] sm:$0x1] %v411_v19  ;;  %v408_v14 = vsel %vm6511_vm14, 0, %v407_v12 }
 0x144   : > { %v5205_v54 = vunpack.i.h.bf16 %v5203_v39  ;;  %v5204_v51 = vunpack.i.l.bf16 %v5203_v39  ;;  %409 = vst [vmem:[#allocation2 + $0x44] sm:$0x1] %v408_v14 }
 0x145   : > { %v1656_v23 = vsel %vm1633_vm7, %v1623_v40, %v5209_v61  ;;  %v1657_v30 = vsel %vm1633_vm7, %v1624_v32, %v5210_v43  ;;  %v5468_v40 = vld [vmem:[%s5671_s25 + $0x128] sm:$0xff] }
 0x146   : > { %v5218_v42 = vpop.permute.xlu1 %5217  ;;  %v1654_v1 = vsel %vm1633_vm7, %v1621_v56, %v5204_v51  ;;  %v1655_v47 = vsel %vm1633_vm7, %v1622_v35, %v5205_v54  ;;  %v5467_v51 = vld [vmem:[%s5671_s25 + $0x120] sm:$0xff] }
 0x147   : > { %v5213_v62 = vpop.permute.xlu0 %5212  ;;  %v5220_v20 = vunpack.i.h.bf16 %v5218_v42  ;;  %v5219_v46 = vunpack.i.l.bf16 %v5218_v42  ;;  %v5470_v42 = vld [vmem:[%s5671_s25 + $0x140] sm:$0xff] }
 0x148   : > { %v5215_v63 = vunpack.i.h.bf16 %v5213_v62  ;;  %v5214_v3 = vunpack.i.l.bf16 %v5213_v62  ;;  %v5469_v62 = vld [vmem:[%s5671_s25 + $0x138] sm:$0xff] }
 0x149   : > { %v1689_v55 = vsel %vm1666_vm8, %v1656_v23, %v5219_v46  ;;  %v1690_v10 = vsel %vm1666_vm8, %v1657_v30, %v5220_v20 }
 0x14a   : > { %v1687_v31 = vsel %vm1666_vm8, %v1654_v1, %v5214_v3  ;;  %v1688_v48 = vsel %vm1666_vm8, %v1655_v47, %v5215_v63  ;;  %v5228_v57 = vpop.permute.xlu1 %5227 }
 0x14b   : > { %v5223_v8 = vpop.permute.xlu0 %5222  ;;  %v5230_v4 = vunpack.i.h.bf16 %v5228_v57  ;;  %v5229_v25 = vunpack.i.l.bf16 %v5228_v57 }
 0x14c   : > { %v5225_v58 = vunpack.i.h.bf16 %v5223_v8  ;;  %v5224_v28 = vunpack.i.l.bf16 %v5223_v8 }
 0x14d   : > { %v1722_v17 = vsel %vm1699_vm9, %v1689_v55, %v5229_v25  ;;  %v1723_v38 = vsel %vm1699_vm9, %v1690_v10, %v5230_v4 }
 0x14e   : > { %v1720_v9 = vsel %vm1699_vm9, %v1687_v31, %v5224_v28  ;;  %v1721_v21 = vsel %vm1699_vm9, %v1688_v48, %v5225_v58  ;;  %v5238_v45 = vpop.permute.xlu1 %5237 }
 0x14f   : > { %v5233_v50 = vpop.permute.xlu0 %5232  ;;  %v5240_v11 = vunpack.i.h.bf16 %v5238_v45  ;;  %v5239_v16 = vunpack.i.l.bf16 %v5238_v45 }
 0x150   : > { %v5235_v59 = vunpack.i.h.bf16 %v5233_v50  ;;  %v5234_v18 = vunpack.i.l.bf16 %v5233_v50 }
 0x151   : > { %v1755_v22 = vsel %vm1732_vm10, %v1722_v17, %v5239_v16  ;;  %v1756_v26 = vsel %vm1732_vm10, %v1723_v38, %v5240_v11 }
 0x152   : > { %v1753_v37 = vsel %vm1732_vm10, %v1720_v9, %v5234_v18  ;;  %v1754_v5 = vsel %vm1732_vm10, %v1721_v21, %v5235_v59  ;;  %v5248_v44 = vpop.permute.xlu1 %5247  ;;  %v1776_v34 = vpack.c.bf16 %v1756_v26, %v1755_v22 }
 0x153   : > { %v5243_v60 = vpop.permute.xlu0 %5242  ;;  %v1775_v2 = vpack.c.bf16 %v1754_v5, %v1753_v37  ;;  %v5249_v27 = vunpack.i.l.bf16 %v5248_v44  ;;  %v5250_v49 = vunpack.i.h.bf16 %v5248_v44 }
 0x154   : > { %v5244_v13 = vunpack.i.l.bf16 %v5243_v60  ;;  %v5245_v39 = vunpack.i.h.bf16 %v5243_v60 }
 0x155   : > { %4657 = vmatprep.mubr.msk.bf16.mxu0 %vm1801_vm11, %v1775_v2  ;;  %v1528_v63 = vsel %vm1501_vm3, %v5469_v62, %v5249_v27  ;;  %v1529_v1 = vsel %vm1501_vm3, %v5470_v42, %v5250_v49 }
 0x156   : > { %4658 = vmatmul.mubr.msk.bf16.gmra.mrb[20].mxu0 %vm1801_vm11, %v1776_v34  ;;  %v5258_v36 = vpop.permute.xlu1 %5257  ;;  %v1526_v56 = vsel %vm1501_vm3, %v5467_v51, %v5244_v13  ;;  %v1527_v32 = vsel %vm1501_vm3, %v5468_v40, %v5245_v39  ;;  %v366_v34 = vld [vmem:[#allocation2 + $0x60] sm:$0x1]  ;;  %v363_v40 = vld [vmem:[#allocation2 + $0x54] sm:$0x1] }
 0x157   : > { %v5253_v33 = vpop.permute.xlu0 %5252  ;;  %v5259_v43 = vunpack.i.l.bf16 %v5258_v36  ;;  %v5260_v3 = vunpack.i.h.bf16 %v5258_v36  ;;  %v367_v12 = vsel %vm6479_vm15, 0, %v366_v34  ;;  %v364_v42 = vsel %vm6479_vm15, 0, %v363_v40 }
 0x158   : > { %v5254_v53 = vunpack.i.l.bf16 %v5253_v33  ;;  %v5255_v35 = vunpack.i.h.bf16 %v5253_v33  ;;  %368 = vst [vmem:[#allocation2 + $0x60] sm:$0x1] %v367_v12  ;;  %365 = vst [vmem:[#allocation2 + $0x54] sm:$0x1] %v364_v42 }
 0x159   : > { %v1561_v52 = vsel %vm1534_vm4, %v1528_v63, %v5259_v43  ;;  %v1562_v48 = vsel %vm1534_vm4, %v1529_v1, %v5260_v3  ;;  %v416_v1 = vld [vmem:[#allocation2 + $0x68] sm:$0x1] }
 0x15a   : > { %v5268_v61 = vpop.permute.xlu1 %5267  ;;  %v1559_v20 = vsel %vm1534_vm4, %v1526_v56, %v5254_v53  ;;  %v1560_v30 = vsel %vm1534_vm4, %v1527_v32, %v5255_v35 }
 0x15b   : > { %v5263_v54 = vpop.permute.xlu0 %5262  ;;  %v5269_v24 = vunpack.i.l.bf16 %v5268_v61  ;;  %v5270_v8 = vunpack.i.h.bf16 %v5268_v61 }
 0x15c   : > { %v5264_v47 = vunpack.i.l.bf16 %v5263_v54  ;;  %v5265_v46 = vunpack.i.h.bf16 %v5263_v54 }
 0x15d   : > { %v1594_v4 = vsel %vm1567_vm5, %v1561_v52, %v5269_v24  ;;  %v1595_v21 = vsel %vm1567_vm5, %v1562_v48, %v5270_v8  ;;  %v413_v24 = vld [vmem:[#allocation2 + $0x5c] sm:$0x1] }
 0x15e   : > { %v5278_v31 = vpop.permute.xlu1 %5277  ;;  %v1592_v28 = vsel %vm1567_vm5, %v1559_v20, %v5264_v47  ;;  %v1593_v10 = vsel %vm1567_vm5, %v1560_v30, %v5265_v46  ;;  %v417_v46 = vsel %vm6511_vm14, 0, %v416_v1  ;;  %v414_v52 = vsel %vm6511_vm14, 0, %v413_v24 }
 0x15f   : > { %v5273_v23 = vpop.permute.xlu0 %5272  ;;  %v5279_v55 = vunpack.i.l.bf16 %v5278_v31  ;;  %v5280_v25 = vunpack.i.h.bf16 %v5278_v31  ;;  %418 = vst [vmem:[#allocation2 + $0x68] sm:$0x1] %v417_v46  ;;  %415 = vst [vmem:[#allocation2 + $0x5c] sm:$0x1] %v414_v52 }
 0x160   : > { %v5274_v58 = vunpack.i.l.bf16 %v5273_v23  ;;  %v5275_v57 = vunpack.i.h.bf16 %v5273_v23 }
 0x161   : > { %v1627_v11 = vsel %vm1600_vm6, %v1594_v4, %v5279_v55  ;;  %v1628_v37 = vsel %vm1600_vm6, %v1595_v21, %v5280_v25 }
 0x162   : > { %v5288_v17 = vpop.permute.xlu1 %5287  ;;  %v1625_v38 = vsel %vm1600_vm6, %v1592_v28, %v5274_v58  ;;  %v1626_v45 = vsel %vm1600_vm6, %v1593_v10, %v5275_v57 }
 0x163   : > { %v5283_v9 = vpop.permute.xlu0 %5282  ;;  %v5289_v18 = vunpack.i.l.bf16 %v5288_v17  ;;  %v5290_v16 = vunpack.i.h.bf16 %v5288_v17  ;;  %v5471_v17 = vld [vmem:[%s5671_s25 + $0x150] sm:$0xff] }
 0x164   : > { %v5284_v50 = vunpack.i.l.bf16 %v5283_v9  ;;  %v5285_v59 = vunpack.i.h.bf16 %v5283_v9 }
 0x165   : > { %v1660_v6 = vsel %vm1633_vm7, %v1627_v11, %v5289_v18  ;;  %v1661_v19 = vsel %vm1633_vm7, %v1628_v37, %v5290_v16  ;;  %v5472_v11 = vld [vmem:[%s5671_s25 + $0x158] sm:$0xff]  ;;  %v5473_v37 = vld [vmem:[%s5671_s25 + $0x168] sm:$0xff] }
 0x166   : > { %v1658_v15 = vsel %vm1633_vm7, %v1625_v38, %v5284_v50  ;;  %v5298_v60 = vpop.permute.xlu1 %5297  ;;  %v1659_v2 = vsel %vm1633_vm7, %v1626_v45, %v5285_v59 }
 0x167   : > { %v5293_v5 = vpop.permute.xlu0 %5292  ;;  %v5300_v29 = vunpack.i.h.bf16 %v5298_v60  ;;  %v5299_v44 = vunpack.i.l.bf16 %v5298_v60 }
 0x168   : > { %v5295_v22 = vunpack.i.h.bf16 %v5293_v5  ;;  %v5294_v26 = vunpack.i.l.bf16 %v5293_v5 }
 0x169   : > { %v1693_v36 = vsel %vm1666_vm8, %v1660_v6, %v5299_v44  ;;  %v1694_v53 = vsel %vm1666_vm8, %v1661_v19, %v5300_v29 }
 0x16a   : > { %v1691_v14 = vsel %vm1666_vm8, %v1658_v15, %v5294_v26  ;;  %v1692_v13 = vsel %vm1666_vm8, %v1659_v2, %v5295_v22  ;;  %v5308_v49 = vpop.permute.xlu1 %5307  ;;  %v5474_v26 = vld [vmem:[%s5671_s25 + $0x170] sm:$0xff] }
 0x16b   : > { %v5303_v33 = vpop.permute.xlu0 %5302  ;;  %v5310_v54 = vunpack.i.h.bf16 %v5308_v49  ;;  %v5309_v51 = vunpack.i.l.bf16 %v5308_v49 }
 0x16c   : > { %v5305_v39 = vunpack.i.h.bf16 %v5303_v33  ;;  %v5304_v27 = vunpack.i.l.bf16 %v5303_v33 }
 0x16d   : > { %v1726_v43 = vsel %vm1699_vm9, %v1693_v36, %v5309_v51  ;;  %v1727_v32 = vsel %vm1699_vm9, %v1694_v53, %v5310_v54 }
 0x16e   : > { %v1724_v56 = vsel %vm1699_vm9, %v1691_v14, %v5304_v27  ;;  %v1725_v35 = vsel %vm1699_vm9, %v1692_v13, %v5305_v39  ;;  %v5318_v3 = vpop.permute.xlu1 %5317 }
 0x16f   : > { %v5313_v61 = vpop.permute.xlu0 %5312  ;;  %v5320_v47 = vunpack.i.h.bf16 %v5318_v3  ;;  %v5319_v20 = vunpack.i.l.bf16 %v5318_v3 }
 0x170   : > { %v5315_v62 = vunpack.i.h.bf16 %v5313_v61  ;;  %v5314_v63 = vunpack.i.l.bf16 %v5313_v61 }
 0x171   : > { %v1759_v8 = vsel %vm1732_vm10, %v1726_v43, %v5319_v20  ;;  %v1760_v31 = vsel %vm1732_vm10, %v1727_v32, %v5320_v47 }
 0x172   : > { %v1757_v23 = vsel %vm1732_vm10, %v1724_v56, %v5314_v63  ;;  %v1758_v30 = vsel %vm1732_vm10, %v1725_v35, %v5315_v62  ;;  %v5328_v28 = vpop.permute.xlu1 %5327  ;;  %v1778_v57 = vpack.c.bf16 %v1760_v31, %v1759_v8  ;;  %v372_v8 = vld [vmem:[#allocation2 + $0x78] sm:$0x1] }
 0x173   : > { %v5323_v48 = vpop.permute.xlu0 %5322  ;;  %v1777_v58 = vpack.c.bf16 %v1758_v30, %v1757_v23  ;;  %v5329_v25 = vunpack.i.l.bf16 %v5328_v28  ;;  %v5330_v21 = vunpack.i.h.bf16 %v5328_v28  ;;  %v373_v28 = vsel %vm6479_vm15, 0, %v372_v8  ;;  %v419_v8 = vld [vmem:[#allocation2 + $0x74] sm:$0x1] }
 0x174   : > { %v5324_v55 = vunpack.i.l.bf16 %v5323_v48  ;;  %v5325_v4 = vunpack.i.h.bf16 %v5323_v48  ;;  %374 = vst [vmem:[#allocation2 + $0x78] sm:$0x1] %v373_v28 }
 0x175   : > { %4661 = vmatprep.mubr.msk.bf16.mxu0 %vm1801_vm11, %v1777_v58  ;;  %v1532_v5 = vsel %vm1501_vm3, %v5473_v37, %v5329_v25  ;;  %v1533_v60 = vsel %vm1501_vm3, %v5474_v26, %v5330_v21 }
 0x176   : > { %4662 = vmatmul.mubr.msk.bf16.gmra.mrb[24].mxu0 %vm1801_vm11, %v1778_v57  ;;  %v5338_v9 = vpop.permute.xlu1 %5337  ;;  %v1530_v38 = vsel %vm1501_vm3, %v5471_v17, %v5324_v55  ;;  %v1531_v16 = vsel %vm1501_vm3, %v5472_v11, %v5325_v4  ;;  %v6718_v57 = vld [vmem:[%s8413_s2] ss:$0 sm:$0xff]  ;;  %vm2182_vm3 = vsmask.f32 4368 }
 0x177   : > { %v5333_v10 = vpop.permute.xlu0 %5332  ;;  %v5339_v18 = vunpack.i.l.bf16 %v5338_v9  ;;  %v5340_v15 = vunpack.i.h.bf16 %v5338_v9 }
 0x178   : > { %v5334_v50 = vunpack.i.l.bf16 %v5333_v10  ;;  %v5335_v59 = vunpack.i.h.bf16 %v5333_v10 }
 0x179   : > { %v1565_v19 = vsel %vm1534_vm4, %v1532_v5, %v5339_v18  ;;  %v1566_v33 = vsel %vm1534_vm4, %v1533_v60, %v5340_v15 }
 0x17a   : > { %v5348_v22 = vpop.permute.xlu1 %5347  ;;  %v1563_v6 = vsel %vm1534_vm4, %v1530_v38, %v5334_v50  ;;  %v1564_v34 = vsel %vm1534_vm4, %v1531_v16, %v5335_v59  ;;  %vm6750_vm4 = vmand %vm332_vm12, %vm393_vm2  ;;  %vm8499_vm2 = vsmask.f32 256 }
 0x17b   : > { %v5343_v45 = vpop.permute.xlu0 %5342  ;;  %v5349_v44 = vunpack.i.l.bf16 %v5348_v22  ;;  %v5350_v12 = vunpack.i.h.bf16 %v5348_v22 }
 0x17c   : > { %v5344_v2 = vunpack.i.l.bf16 %v5343_v45  ;;  %v5345_v29 = vunpack.i.h.bf16 %v5343_v45 }
 0x17d   : > { %v1598_v54 = vsel %vm1567_vm5, %v1565_v19, %v5349_v44  ;;  %v1599_v56 = vsel %vm1567_vm5, %v1566_v33, %v5350_v12 }
 0x17e   : > { %v5358_v36 = vpop.permute.xlu1 %5357  ;;  %v1596_v39 = vsel %vm1567_vm5, %v1563_v6, %v5344_v2  ;;  %v1597_v53 = vsel %vm1567_vm5, %v1564_v34, %v5345_v29  ;;  %vm6759_vm5 = vmor %vm8499_vm2, %vm2182_vm3 }
 0x17f   : > { %v5353_v14 = vpop.permute.xlu0 %5352  ;;  %v5359_v49 = vunpack.i.l.bf16 %v5358_v36  ;;  %v5360_v51 = vunpack.i.h.bf16 %v5358_v36 }
 0x180   : > { %v5354_v13 = vunpack.i.l.bf16 %v5353_v14  ;;  %v5355_v27 = vunpack.i.h.bf16 %v5353_v14 }
 0x181   : > { %v1631_v63 = vsel %vm1600_vm6, %v1598_v54, %v5359_v49  ;;  %v1632_v1 = vsel %vm1600_vm6, %v1599_v56, %v5360_v51 }
 0x182   : > { %v1629_v43 = vsel %vm1600_vm6, %v1596_v39, %v5354_v13  ;;  %v5368_v32 = vpop.permute.xlu1 %5367  ;;  %v1630_v62 = vsel %vm1600_vm6, %v1597_v53, %v5355_v27 }
 0x183   : > { %v5363_v35 = vpop.permute.xlu0 %5362  ;;  %v5370_v3 = vunpack.i.h.bf16 %v5368_v32  ;;  %v5369_v42 = vunpack.i.l.bf16 %v5368_v32 }
 0x184   : > { %v5365_v61 = vunpack.i.h.bf16 %v5363_v35  ;;  %v5364_v40 = vunpack.i.l.bf16 %v5363_v35 }
 0x185   : > { %v1664_v24 = vsel %vm1633_vm7, %v1631_v63, %v5369_v42  ;;  %v1665_v31 = vsel %vm1633_vm7, %v1632_v1, %v5370_v3  ;;  %v369_v63 = vld [vmem:[#allocation2 + $0x6c] sm:$0x1] }
 0x186   : > { %v1662_v47 = vsel %vm1633_vm7, %v1629_v43, %v5364_v40  ;;  %v1663_v46 = vsel %vm1633_vm7, %v1630_v62, %v5365_v61  ;;  %v5378_v52 = vpop.permute.xlu1 %5377  ;;  %v2513_v61 = vld [vmem:[#allocation2 + $0x18] sm:$0xf]  ;;  %vm3376_vm7 = vcmask 392192  }
 0x187   : > { %v5373_v20 = vpop.permute.xlu0 %5372  ;;  %v5380_v48 = vunpack.i.h.bf16 %v5378_v52  ;;  %v5379_v58 = vunpack.i.l.bf16 %v5378_v52 }
 0x188   : > { %v5375_v23 = vunpack.i.h.bf16 %v5373_v20  ;;  %v5374_v30 = vunpack.i.l.bf16 %v5373_v20  ;;  %v422_v20 = vld [vmem:[#allocation2 + $0x80] sm:$0x1] }
 0x189   : > { %v1697_v25 = vsel %vm1666_vm8, %v1664_v24, %v5379_v58  ;;  %v1698_v9 = vsel %vm1666_vm8, %v1665_v31, %v5380_v48  ;;  %v2506_v48 = vld [vmem:[#allocation2 + $0xc] sm:$0xf] }
 0x18a   : > { %v1695_v55 = vsel %vm1666_vm8, %v1662_v47, %v5374_v30  ;;  %v1696_v10 = vsel %vm1666_vm8, %v1663_v46, %v5375_v23  ;;  %v5388_v17 = vpop.permute.xlu1 %5387  ;;  %vm3409_vm8 = vcmask 523264  }
 0x18b   : > { %v5383_v4 = vpop.permute.xlu0 %5382  ;;  %v5390_v59 = vunpack.i.h.bf16 %v5388_v17  ;;  %v5389_v18 = vunpack.i.l.bf16 %v5388_v17 }
 0x18c   : > { %v5385_v21 = vunpack.i.h.bf16 %v5383_v4  ;;  %v5384_v50 = vunpack.i.l.bf16 %v5383_v4  ;;  %v6724_v38 = vpop.f32.mrb[0].mxu0 }
 0x18d   : > { %v2024_v45 = vadd.f32 %v6724_v38, %v6718_v57  ;;  %v6728_v11 = vpop.f32.mrb[1].mxu0  ;;  %v1730_v22 = vsel %vm1699_vm9, %v1697_v25, %v5389_v18  ;;  %v1731_v26 = vsel %vm1699_vm9, %v1698_v9, %v5390_v59  ;;  %v2517_v9 = vld [vmem:[#allocation2 + $0x20] sm:$0x1] }
 0x18e   : > { %v1728_v16 = vsel %vm1699_vm9, %v1695_v55, %v5384_v50  ;;  %v1729_v37 = vsel %vm1699_vm9, %v1696_v10, %v5385_v21  ;;  %v2022_v5 = vadd.f32 %v6718_v57, %v6728_v11  ;;  %v6734_v15 = vpop.f32.mrb[2].mxu0  ;;  %v5398_v14 = vpop.permute.xlu1 %5397  ;;  %v370_v55 = vsel %vm6479_vm15, 0, %v369_v63 }
 0x18f   : > { %8495 = vst [vmem:[#allocation6_spill] sm:$0xff] %v6734_v15  ;;  %v2056_v60 = vmax.f32 %v2024_v45, 0.0  ;;  %v2025_v2 = vadd.f32 %v6734_v15, %v6718_v57  ;;  %v5393_v6 = vpop.permute.xlu0 %5392  ;;  %v6740_v29 = vpop.f32.mrb[3].mxu0  ;;  %v5400_v36 = vunpack.i.h.bf16 %v5398_v14  ;;  %v5399_v39 = vunpack.i.l.bf16 %v5398_v14  ;;  %371 = vst [vmem:[#allocation2 + $0x6c] sm:$0x1] %v370_v55 }
 0x190   : > { %8496 = vst [vmem:[#allocation7_spill] sm:$0xff] %v6740_v29  ;;  %v2054_v44 = vmax.f32 %v2022_v5, 0.0  ;;  %v5395_v34 = vunpack.i.h.bf16 %v5393_v6  ;;  %v5394_v19 = vunpack.i.l.bf16 %v5393_v6  ;;  %v2023_v12 = vadd.f32 %v6718_v57, %v6740_v29  ;;  %v2510_v45 = vld [vmem:[#allocation2 + $0x14] sm:$0x1] }
 0x191   : > { %v4576_v33 = vpack.c.bf16 %v2056_v60, %v2056_v60  ;;  %v2057_v13 = vmax.f32 %v2025_v2, 0.0  ;;  %v1763_v35 = vsel %vm1732_vm10, %v1730_v22, %v5399_v39  ;;  %v1764_v62 = vsel %vm1732_vm10, %v1731_v26, %v5400_v36  ;;  %v378_v36 = vld [vmem:[#allocation2 + $0x90] sm:$0x1] }
 0x192   : > { %v4574_v27 = vpack.c.bf16 %v2054_v44, %v2054_v44  ;;  %v1761_v49 = vsel %vm1732_vm10, %v1728_v16, %v5394_v19  ;;  %v1762_v53 = vsel %vm1732_vm10, %v1729_v37, %v5395_v34  ;;  %v2055_v54 = vmax.f32 %v2023_v12, 0.0  ;;  %v5422_v34 = vld [vmem:[%s8414_s3] sm:$0xff]  }
 0x193   : > { %v2202_v51 = vshrl.u32 %v4576_v33, 16  ;;  %v4577_v56 = vpack.c.bf16 %v2057_v13, %v2057_v13  ;;  %v2205_v43 = vshll.u32 %v4576_v33, 16  ;;  %v1779_v47 = vpack.c.bf16 %v1762_v53, %v1761_v49  ;;  %3685 = vmatpush1.bf16.msra.mxu0 %v5422_v34  ;;  %4693 = vmatpush1.bf16.msra.mxu1 %v5422_v34  ;;  %v5423_v13 = vld [vmem:[%s8414_s3 + $0x8] sm:$0xff]   ;;  %v5424_v49 = vld [vmem:[%s8414_s3 + $0x10] sm:$0xff]   ;;  %v2531_v34 = vld [vmem:[#allocation2 + $0x38] sm:$0x1] }
 0x194   : > { %v2185_v40 = vshrl.u32 %v4574_v27, 16  ;;  %v4575_v32 = vpack.c.bf16 %v2055_v54, %v2055_v54  ;;  %v2188_v42 = vshll.u32 %v4574_v27, 16  ;;  %v1780_v52 = vpack.c.bf16 %v1764_v62, %v1763_v35  ;;  %3686 = vmatprep.subr.bf16.mxu0 %v5557_v0  ;;  %4685 = vmatprep.subr.bf16.mxu1 %v5557_v0 }
 0x195   : > { %v2204_v3 = vrot.slane %v2202_v51, 7  ;;  %v2210_v1 = vshrl.u32 %v4577_v56, 16  ;;  %v2213_v23 = vshll.u32 %v4577_v56, 16  ;;  %4665 = vmatprep.mubr.msk.bf16.mxu0 %vm1801_vm11, %v1779_v47  ;;  %v423_v50 = vsel %vm6511_vm14, 0, %v422_v20 }
 0x196   : > { %v2187_v24 = vrot.slane %v2185_v40, 7  ;;  %v2193_v30 = vshrl.u32 %v4575_v32, 16  ;;  %v2196_v28 = vshll.u32 %v4575_v32, 16  ;;  %4666 = vmatmul.mubr.msk.bf16.gmra.mrb[28].mxu0 %vm1801_vm11, %v1780_v52  ;;  %424 = vst [vmem:[#allocation2 + $0x80] sm:$0x1] %v423_v50  ;;  %v420_v16 = vsel %vm6511_vm14, 0, %v419_v8 }
 0x197   : > { %v2207_v31 = vor.u32 %v2205_v43, %v2204_v3  ;;  %v2212_v58 = vrot.slane %v2210_v1, 7  ;;  %v2208_v10 = vrot.slane %v2204_v3, 4  ;;  %421 = vst [vmem:[#allocation2 + $0x74] sm:$0x1] %v420_v16  ;;  %3687 = vmatpush1.bf16.msra.mxu0 %v5423_v13  ;;  %v379_v27 = vsel %vm6479_vm15, 0, %v378_v36  ;;  %4694 = vmatpush1.bf16.msra.mxu1 %v5423_v13 }
 0x198   : > { %v2190_v4 = vor.u32 %v2188_v42, %v2187_v24  ;;  %v2195_v21 = vrot.slane %v2193_v30, 7  ;;  %v2191_v37 = vrot.slane %v2187_v24, 4  ;;  %380 = vst [vmem:[#allocation2 + $0x90] sm:$0x1] %v379_v27  ;;  %3688 = vmatprep.subr.bf16.mxu0 %v5557_v0  ;;  %4686 = vmatprep.subr.bf16.mxu1 %v5557_v0  ;;  %v375_v52 = vld [vmem:[#allocation2 + $0x84] sm:$0x1] }
 0x199   : > { %v2514_v17 = vsel %vm6750_vm4, %v2207_v31, %v2513_v61  ;;  %v2215_v59 = vor.u32 %v2213_v23, %v2212_v58  ;;  %v2217_v18 = vrot.slane %v2212_v58, 4  ;;  %v5425_v61 = vld [vmem:[%s8414_s3 + $0x18] sm:$0xff]   ;;  %v425_v8 = vld [vmem:[#allocation2 + $0x8c] sm:$0x1]  ;;  %v5426_v31 = vld [vmem:[%s8414_s3 + $0x20] sm:$0xff]   ;;  %v376_v55 = vsel %vm6479_vm15, 0, %v375_v52 }
 0x19a   : > { %2515 = vst [vmem:[#allocation2 + $0x18] sm:$0xf] %v2514_v17  ;;  %v2507_v5 = vsel %vm6750_vm4, %v2190_v4, %v2506_v48  ;;  %v2198_v22 = vor.u32 %v2196_v28, %v2195_v21  ;;  %v2200_v26 = vrot.slane %v2195_v21, 4  ;;  %377 = vst [vmem:[#allocation2 + $0x84] sm:$0x1] %v376_v55  ;;  %v426_v21 = vsel %vm6511_vm14, 0, %v425_v8 }
 0x19b   : > { %2508 = vst [vmem:[#allocation2 + $0xc] sm:$0xf] %v2507_v5  ;;  %v2216_v60 = vsel %vm6759_vm5, %v2208_v10, %v2215_v59  ;;  %v2518_v2 = vsel %vm6479_vm15, %v2217_v18, %v2517_v9  ;;  %3689 = vmatpush1.bf16.msra.mxu0 %v5424_v49  ;;  %4695 = vmatpush1.bf16.msra.mxu1 %v5424_v49  ;;  %v2527_v59 = vld [vmem:[#allocation2 + $0x30] sm:$0xf]  ;;  %427 = vst [vmem:[#allocation2 + $0x8c] sm:$0x1] %v426_v21 }
 0x19c   : > { %2516 = vst.msk [vmem:[#allocation2 + $0x1c] sm:$0xf] %vm332_vm12, %v2216_v60  ;;  %2519 = vst [vmem:[#allocation2 + $0x20] sm:$0x1] %v2518_v2  ;;  %v2199_v6 = vsel %vm6759_vm5, %v2191_v37, %v2198_v22  ;;  %v2511_v44 = vsel %vm6479_vm15, %v2200_v26, %v2510_v45  ;;  %3690 = vmatprep.subr.bf16.mxu0 %v5557_v0  ;;  %4687 = vmatprep.subr.bf16.mxu1 %v5557_v0  ;;  %v5427_v26 = vld [vmem:[%s8414_s3 + $0x28] sm:$0xff]   ;;  %vm3442_vm9 = vcmask 654336  }
 0x19d   : > { %2509 = vst.msk [vmem:[#allocation2 + $0x10] sm:$0xf] %vm332_vm12, %v2199_v6  ;;  %2512 = vst [vmem:[#allocation2 + $0x14] sm:$0x1] %v2511_v44  ;;  %v2520_v2 = vld [vmem:[#allocation2 + $0x24] sm:$0xf] }
 0x19e   : > { %v428_v36 = vld [vmem:[#allocation2 + $0x98] sm:$0x1]  ;;  %vm3475_vm11 = vcmask 785408  }
 0x19f   : > { %3691 = vmatpush1.bf16.msra.mxu0 %v5425_v61  ;;  %4696 = vmatpush1.bf16.msra.mxu1 %v5425_v61 }
 0x1a0   : > { %3692 = vmatprep.subr.bf16.mxu0 %v5557_v0  ;;  %4688 = vmatprep.subr.bf16.mxu1 %v5557_v0 }
 0x1a3   : > { %v6785_v19 = vld [vmem:[#allocation2 + $0x18] sm:$0xff]   ;;  %v6789_v12 = vld [vmem:[#allocation2 + $0x20] ss:$0 sps:$4 sm:$0x11]   ;;  %3693 = vmatpush1.bf16.msra.mxu0 %v5426_v31  ;;  %4697 = vmatpush1.bf16.msra.mxu1 %v5426_v31 }
 0x1a4   : > { %3230 = vrot.lane.b32.xlu0 %v6785_v19, %s5558_s22  ;;  %v3032_v14 = vrot.slane %v6785_v19, 1  ;;  %v3033_v33 = vrot.slane %v6789_v12, 1  ;;  %v6809_v53 = vld [vmem:[#allocation2 + $0xc] sm:$0xff]   ;;  %v6832_v63 = vld [vmem:[#allocation2 + $0x14] ss:$0 sps:$4 sm:$0x11]   ;;  %3694 = vmatprep.subr.bf16.mxu0 %v5557_v0 }
 0x1a5   : > { %v3029_v20 = vrot.slane %v6809_v53, 1  ;;  %v2828_v24 = vshll.u32 %v6785_v19, 16  ;;  %v3030_v28 = vrot.slane %v6832_v63, 1  ;;  %v2826_v9 = vshrl.u32 %v6785_v19, 16  ;;  %4689 = vmatprep.subr.bf16.mxu1 %v5557_v0 }
 0x1a6   : > { %v3034_v39 = vsel %vm545_vm1, %v3032_v14, %v3033_v33  ;;  %v2833_v45 = vshll.u32 %v6789_v12, 16  ;;  %v2816_v31 = vshll.u32 %v6809_v53, 16  ;;  %v2821_v55 = vshll.u32 %v6832_v63, 16 }
 0x1a7   : > { %4549 = vmatprep.mubr.msk.bf16.mxu0 %vm1600_vm6, %v3034_v39  ;;  %v2830_v22 = vrot.slane %v2828_v24, 1  ;;  %3695 = vmatpush1.bf16.msra.mxu0 %v5427_v26 }
 0x1a8   : > { %3113 = vrot.lane.b32.xlu0 %v6785_v19, %s5559_s14  ;;  %v3031_v19 = vsel %vm545_vm1, %v3029_v20, %v3030_v28  ;;  %4698 = vmatpush1.bf16.msra.mxu1 %v5427_v26  ;;  %v2835_v52 = vrot.slane %v2833_v45, 1  ;;  %v2814_v28 = vshrl.u32 %v6809_v53, 16  ;;  %v2823_v21 = vrot.slane %v2821_v55, 1 }
 0x1a9   : > { %3696 = vmatprep.subr.bf16.mxu0 %v5557_v0  ;;  %4690 = vmatprep.subr.bf16.mxu1 %v5557_v0 }
 0x1ac   : > { %v6811_v54 = vpop.f32.mrb[4].mxu0  ;;  %3111 = vrot.lane.b32.xlu0 %v6809_v53, %s5559_s14 }
 0x1ad   : > { %8502 = vst [vmem:[#allocation8_spill] sm:$0xff] %v6811_v54  ;;  %v2028_v51 = vadd.f32 %v6811_v54, %v6718_v57  ;;  %v6815_v56 = vpop.f32.mrb[5].mxu0 }
 0x1ae   : > { %8503 = vst [vmem:[#allocation9_spill] sm:$0xff] %v6815_v56  ;;  %v2026_v35 = vadd.f32 %v6718_v57, %v6815_v56  ;;  %v6822_v43 = vpop.f32.mrb[6].mxu0 }
 0x1af   : > { %8504 = vst [vmem:[#allocation10_spill] sm:$0xff] %v6822_v43  ;;  %v2060_v40 = vmax.f32 %v2028_v51, 0.0  ;;  %v2029_v32 = vadd.f32 %v6822_v43, %v6718_v57  ;;  %v6830_v62 = vpop.f32.mrb[7].mxu0  ;;  %v2524_v51 = vld [vmem:[#allocation2 + $0x2c] sm:$0x1] }
 0x1b0   : > { %8505 = vst [vmem:[#allocation11_spill] sm:$0xff] %v6830_v62  ;;  %v2058_v3 = vmax.f32 %v2026_v35, 0.0  ;;  %v2027_v42 = vadd.f32 %v6718_v57, %v6830_v62  ;;  %3195 = vrot.lane.b32.xlu0 %v3034_v39, %s5560_s21  ;;  %v429_v35 = vsel %vm6511_vm14, 0, %v428_v36 }
 0x1b1   : > { %v4580_v1 = vpack.c.bf16 %v2060_v40, %v2060_v40  ;;  %v2061_v47 = vmax.f32 %v2029_v32, 0.0  ;;  %430 = vst [vmem:[#allocation2 + $0x98] sm:$0x1] %v429_v35  ;;  %v2534_v35 = vld [vmem:[#allocation2 + $0x3c] sm:$0xf] }
 0x1b2   : > { %v4578_v23 = vpack.c.bf16 %v2058_v3, %v2058_v3  ;;  %v2059_v30 = vmax.f32 %v2027_v42, 0.0  ;;  %v5428_v42 = vld [vmem:[%s8414_s3 + $0x30] sm:$0xff]  }
 0x1b3   : > { %v2236_v48 = vshrl.u32 %v4580_v1, 16  ;;  %v4581_v58 = vpack.c.bf16 %v2061_v47, %v2061_v47  ;;  %v2239_v17 = vshll.u32 %v4580_v1, 16  ;;  %3697 = vmatpush1.bf16.msra.mxu0 %v5428_v42  ;;  %4699 = vmatpush1.bf16.msra.mxu1 %v5428_v42  ;;  %v2545_v42 = vld [vmem:[#allocation2 + $0x50] sm:$0x1] }
 0x1b4   : > { %v2219_v10 = vshrl.u32 %v4578_v23, 16  ;;  %v4579_v4 = vpack.c.bf16 %v2059_v30, %v2059_v30  ;;  %3078 = vrot.lane.b32.xlu0 %v3034_v39, %s5556_s29  ;;  %v2222_v37 = vshll.u32 %v4578_v23, 16  ;;  %v2831_v23 = vor.u32 %v2830_v22, %v2826_v9  ;;  %v5430_v30 = vld [vmem:[%s8414_s3 + $0x38] sm:$0xff]   ;;  %3698 = vmatprep.subr.bf16.mxu0 %v5557_v0 }
 0x1b5   : > { %v2238_v50 = vrot.slane %v2236_v48, 7  ;;  %v2244_v18 = vshrl.u32 %v4581_v58, 16  ;;  %v2247_v44 = vshll.u32 %v4581_v58, 16  ;;  %4691 = vmatprep.subr.bf16.mxu1 %v5557_v0  ;;  %v5431_v48 = vld [vmem:[%s8414_s3 + $0x40] sm:$0xff]   ;;  %v2818_v58 = vrot.slane %v2816_v31, 1 }
 0x1b6   : > { %v2221_v16 = vrot.slane %v2219_v10, 7  ;;  %v2227_v5 = vshrl.u32 %v4579_v4, 16  ;;  %v2230_v13 = vshll.u32 %v4579_v4, 16  ;;  %v2836_v8 = vsel %vm2800_vm0, %v2831_v23, %v2835_v52  ;;  %v384_v10 = vld [vmem:[#allocation2 + $0xa8] sm:$0x1] }
 0x1b7   : > { %v2241_v60 = vor.u32 %v2239_v17, %v2238_v50  ;;  %v2246_v6 = vrot.slane %v2244_v18, 7  ;;  %v2242_v12 = vrot.slane %v2238_v50, 4  ;;  %3699 = vmatpush1.bf16.msra.mxu0 %v5430_v30  ;;  %4700 = vmatpush1.bf16.msra.mxu1 %v5430_v30  ;;  %v2819_v4 = vor.u32 %v2818_v58, %v2814_v28  ;;  %v434_v30 = vld [vmem:[#allocation2 + $0xb0] sm:$0x1]  ;;  %v431_v28 = vld [vmem:[#allocation2 + $0xa4] sm:$0x1] }
 0x1b8   : > { %v2224_v14 = vor.u32 %v2222_v37, %v2221_v16  ;;  %v2229_v33 = vrot.slane %v2227_v5, 7  ;;  %3193 = vrot.lane.b32.xlu0 %v3031_v19, %s5560_s21  ;;  %v2225_v61 = vrot.slane %v2221_v16, 4  ;;  %3700 = vmatprep.subr.bf16.mxu0 %v5557_v0  ;;  %v385_v9 = vsel %vm6479_vm15, 0, %v384_v10 }
 0x1b9   : > { %v2528_v39 = vsel %vm6750_vm4, %v2241_v60, %v2527_v59  ;;  %v2249_v27 = vor.u32 %v2247_v44, %v2246_v6  ;;  %v2251_v49 = vrot.slane %v2246_v6, 4  ;;  %4692 = vmatprep.subr.bf16.mxu1 %v5557_v0  ;;  %386 = vst [vmem:[#allocation2 + $0xa8] sm:$0x1] %v385_v9  ;;  %v2824_v50 = vsel %vm2800_vm0, %v2819_v4, %v2823_v21  ;;  %v381_v6 = vld [vmem:[#allocation2 + $0x9c] sm:$0x1] }
 0x1ba   : > { %2529 = vst [vmem:[#allocation2 + $0x30] sm:$0xf] %v2528_v39  ;;  %v2521_v40 = vsel %vm6750_vm4, %v2224_v14, %v2520_v2  ;;  %v2232_v32 = vor.u32 %v2230_v13, %v2229_v33  ;;  %v2234_v3 = vrot.slane %v2229_v33, 4  ;;  %v2541_v39 = vld [vmem:[#allocation2 + $0x48] sm:$0xf]  ;;  %v435_v58 = vsel %vm6511_vm14, 0, %v434_v30 }
 0x1bb   : > { %2522 = vst [vmem:[#allocation2 + $0x24] sm:$0xf] %v2521_v40  ;;  %v2250_v1 = vsel %vm6759_vm5, %v2242_v12, %v2249_v27  ;;  %v2532_v47 = vsel %vm6479_vm15, %v2251_v49, %v2531_v34  ;;  %3701 = vmatpush1.bf16.msra.mxu0 %v5431_v48  ;;  %4701 = vmatpush1.bf16.msra.mxu1 %v5431_v48  ;;  %v382_v12 = vsel %vm6479_vm15, 0, %v381_v6  ;;  %v2538_v48 = vld [vmem:[#allocation2 + $0x44] sm:$0x1]  ;;  %v432_v9 = vsel %vm6511_vm14, 0, %v431_v28 }
 0x1bc   : > { %2530 = vst.msk [vmem:[#allocation2 + $0x34] sm:$0xf] %vm332_vm12, %v2250_v1  ;;  %2533 = vst [vmem:[#allocation2 + $0x38] sm:$0x1] %v2532_v47  ;;  %v2233_v20 = vsel %vm6759_vm5, %v2225_v61, %v2232_v32  ;;  %v2525_v24 = vsel %vm6479_vm15, %v2234_v3, %v2524_v51  ;;  %3076 = vrot.lane.b32.xlu0 %v3031_v19, %s5556_s29 }
 0x1bd   : > { %2523 = vst.msk [vmem:[#allocation2 + $0x28] sm:$0xf] %vm332_vm12, %v2233_v20  ;;  %2526 = vst [vmem:[#allocation2 + $0x2c] sm:$0x1] %v2525_v24 }
 0x1be   : > { %383 = vst [vmem:[#allocation2 + $0x9c] sm:$0x1] %v382_v12  ;;  %436 = vst [vmem:[#allocation2 + $0xb0] sm:$0x1] %v435_v58 }
 0x1bf   : > { %433 = vst [vmem:[#allocation2 + $0xa4] sm:$0x1] %v432_v9 }
 0x1c0   : > { %3277 = vrot.lane.b32.xlu0 %v2836_v8, %s5561_s17 }
 0x1c3   : > { %v6919_v19 = vld [vmem:[#allocation2 + $0x30] sm:$0xff]  }
 0x1c4   : > { %3160 = vrot.lane.b32.xlu0 %v2836_v8, %s5562_s28 }
 0x1c6   : > { %v2594_v29 = vld [vmem:[#allocation2 + $0xa4] sm:$0x1] }
 0x1c8   : > { %2997 = vrot.lane.b32.xlu0 %v2836_v8, %s5552_s16 }
 0x1cc   : > { %v6900_v0 = vpop.f32.mrb[8].mxu0  ;;  %3158 = vrot.lane.b32.xlu0 %v2824_v50, %s5562_s28 }
 0x1cd   : > { %8506 = vst [vmem:[#allocation12_spill] sm:$0xff] %v6900_v0  ;;  %v2032_v17 = vadd.f32 %v6900_v0, %v6718_v57  ;;  %v6905_v59 = vpop.f32.mrb[9].mxu0 }
 0x1ce   : > { %8507 = vst [vmem:[#allocation13_spill] sm:$0xff] %v6905_v59  ;;  %v2030_v53 = vadd.f32 %v6718_v57, %v6905_v59  ;;  %v6910_v63 = vpop.f32.mrb[10].mxu0 }
 0x1cf   : > { %8508 = vst [vmem:[#allocation14_spill] sm:$0xff] %v6910_v63  ;;  %v2064_v18 = vmax.f32 %v2032_v17, 0.0  ;;  %v2033_v45 = vadd.f32 %v6910_v63, %v6718_v57  ;;  %v6914_v16 = vpop.f32.mrb[11].mxu0  ;;  %v6939_v17 = vld [vmem:[#allocation2 + $0x24] sm:$0xff]  }
 0x1d0   : > { %8509 = vst [vmem:[#allocation15_spill] sm:$0xff] %v6914_v16  ;;  %v2062_v37 = vmax.f32 %v2030_v53, 0.0  ;;  %v2031_v5 = vadd.f32 %v6718_v57, %v6914_v16  ;;  %2995 = vrot.lane.b32.xlu0 %v2824_v50, %s5552_s16  ;;  %v3035_v12 = vrot.slane %v6939_v17, 1 }
 0x1d1   : > { %v4584_v22 = vpack.c.bf16 %v2064_v18, %v2064_v18  ;;  %v2065_v26 = vmax.f32 %v2033_v45, 0.0  ;;  %v5412_v45 = vld [vmem:[#allocation2 + $0x38] ss:$0 sps:$4 sm:$0x11]  }
 0x1d2   : > { %v4582_v60 = vpack.c.bf16 %v2062_v37, %v2062_v37  ;;  %v2063_v2 = vmax.f32 %v2031_v5, 0.0  ;;  %v3038_v37 = vrot.slane %v6919_v19, 1  ;;  %v3039_v5 = vrot.slane %v5412_v45, 1 }
 0x1d3   : > { %v2270_v44 = vshrl.u32 %v4584_v22, 16  ;;  %v4585_v34 = vpack.c.bf16 %v2065_v26, %v2065_v26  ;;  %v2273_v36 = vshll.u32 %v4584_v22, 16  ;;  %v6952_v22 = vld [vmem:[#allocation2 + $0x2c] ss:$0 sps:$4 sm:$0x11]  }
 0x1d4   : > { %v2253_v14 = vshrl.u32 %v4582_v60, 16  ;;  %v4583_v33 = vpack.c.bf16 %v2063_v2, %v2063_v2  ;;  %3234 = vrot.lane.b32.xlu0 %v6919_v19, %s5558_s22  ;;  %v2256_v51 = vshll.u32 %v4582_v60, 16  ;;  %v6957_v60 = vsel %vm545_vm1, %v3038_v37, %v3039_v5 }
 0x1d5   : > { %v2272_v13 = vrot.slane %v2270_v44, 7  ;;  %v2278_v27 = vshrl.u32 %v4585_v34, 16  ;;  %v2281_v3 = vshll.u32 %v4585_v34, 16  ;;  %v2852_v44 = vshll.u32 %v6919_v19, 16 }
 0x1d6   : > { %v2255_v49 = vrot.slane %v2253_v14, 7  ;;  %v2261_v61 = vshrl.u32 %v4583_v33, 16  ;;  %v2264_v1 = vshll.u32 %v4583_v33, 16  ;;  %v3036_v14 = vrot.slane %v6952_v22, 1  ;;  %v390_v33 = vld [vmem:[#allocation2 + $0xc0] sm:$0x1] }
 0x1d7   : > { %v2275_v40 = vor.u32 %v2273_v36, %v2272_v13  ;;  %v2280_v32 = vrot.slane %v2278_v27, 7  ;;  %v2276_v47 = vrot.slane %v2272_v13, 4 }
 0x1d8   : > { %v2258_v20 = vor.u32 %v2256_v51, %v2255_v49  ;;  %v2259_v24 = vrot.slane %v2255_v49, 4  ;;  %v2263_v23 = vrot.slane %v2261_v61, 7  ;;  %3117 = vrot.lane.b32.xlu0 %v6919_v19, %s5559_s14  ;;  %v391_v49 = vsel %vm6479_vm15, 0, %v390_v33 }
 0x1d9   : > { %v2542_v52 = vsel %vm6750_vm4, %v2275_v40, %v2541_v39  ;;  %v2283_v8 = vor.u32 %v2281_v3, %v2280_v32  ;;  %v2285_v31 = vrot.slane %v2280_v32, 4  ;;  %v2854_v51 = vrot.slane %v2852_v44, 1  ;;  %392 = vst [vmem:[#allocation2 + $0xc0] sm:$0x1] %v391_v49  ;;  %v387_v44 = vld [vmem:[#allocation2 + $0xb4] sm:$0x1] }
 0x1da   : > { %2543 = vst [vmem:[#allocation2 + $0x48] sm:$0xf] %v2542_v52  ;;  %v2535_v55 = vsel %vm6750_vm4, %v2258_v20, %v2534_v35  ;;  %v2266_v10 = vor.u32 %v2264_v1, %v2263_v23  ;;  %v2268_v4 = vrot.slane %v2263_v23, 4  ;;  %v6986_v32 = vsel %vm545_vm1, %v3035_v12, %v3036_v14 }
 0x1db   : > { %2536 = vst [vmem:[#allocation2 + $0x3c] sm:$0xf] %v2535_v55  ;;  %v2284_v21 = vsel %vm6759_vm5, %v2276_v47, %v2283_v8  ;;  %v2546_v50 = vsel %vm6479_vm15, %v2285_v31, %v2545_v42  ;;  %v2850_v3 = vshrl.u32 %v6919_v19, 16  ;;  %v2857_v42 = vshll.u32 %v5412_v45, 16 }
 0x1dc   : > { %2544 = vst.msk [vmem:[#allocation2 + $0x4c] sm:$0xf] %vm332_vm12, %v2284_v21  ;;  %2547 = vst [vmem:[#allocation2 + $0x50] sm:$0x1] %v2546_v50  ;;  %v2267_v53 = vsel %vm6759_vm5, %v2259_v24, %v2266_v10  ;;  %v2539_v18 = vsel %vm6479_vm15, %v2268_v4, %v2538_v48  ;;  %3232 = vrot.lane.b32.xlu0 %v6939_v17, %s5558_s22  ;;  %v388_v33 = vsel %vm6479_vm15, 0, %v387_v44 }
 0x1dd   : > { %2537 = vst.msk [vmem:[#allocation2 + $0x40] sm:$0xf] %vm332_vm12, %v2267_v53  ;;  %2540 = vst [vmem:[#allocation2 + $0x44] sm:$0x1] %v2539_v18  ;;  %v2855_v19 = vor.u32 %v2854_v51, %v2850_v3  ;;  %v2859_v4 = vrot.slane %v2857_v42, 1 }
 0x1de   : > { %389 = vst [vmem:[#allocation2 + $0xb4] sm:$0x1] %v388_v33  ;;  %v2838_v33 = vshrl.u32 %v6939_v17, 16 }
 0x1e0   : > { %3115 = vrot.lane.b32.xlu0 %v6939_v17, %s5559_s14 }
 0x1e3   : > { %v6954_v26 = vld [vmem:[#allocation2 + $0x48] sm:$0xff]   ;;  %v5414_v2 = vld [vmem:[#allocation2 + $0x50] ss:$0 sps:$4 sm:$0x11]  }
 0x1e4   : > { %3199 = vrot.lane.b32.xlu0 %v6957_v60, %s5560_s21  ;;  %v3044_v6 = vrot.slane %v6954_v26, 1  ;;  %v3045_v34 = vrot.slane %v5414_v2, 1  ;;  %v6968_v36 = vld [vmem:[#allocation2 + $0x3c] sm:$0xff]   ;;  %v6970_v39 = vld [vmem:[#allocation2 + $0x44] ss:$0 sps:$4 sm:$0x11]  }
 0x1e5   : > { %v2876_v27 = vshll.u32 %v6954_v26, 16  ;;  %v3041_v20 = vrot.slane %v6968_v36, 1  ;;  %v3042_v24 = vrot.slane %v6970_v39, 1  ;;  %v2874_v58 = vshrl.u32 %v6954_v26, 16  ;;  %v2604_v59 = vld [vmem:[#allocation2 + $0xb4] sm:$0xf] }
 0x1e6   : > { %v6966_v13 = vsel %vm545_vm1, %v3044_v6, %v3045_v34  ;;  %v2881_v28 = vshll.u32 %v5414_v2, 16  ;;  %v2860_v6 = vsel %vm2800_vm0, %v2855_v19, %v2859_v4 }
 0x1e7   : > { %3203 = vrot.lane.b32.xlu1 %v6966_v13, %s5560_s21  ;;  %v2878_v23 = vrot.slane %v2876_v27, 1  ;;  %v7007_v50 = vsel %vm545_vm1, %v3041_v20, %v3042_v24  ;;  %v2555_v27 = vld [vmem:[#allocation2 + $0x60] sm:$0xf] }
 0x1e8   : > { %3082 = vrot.lane.b32.xlu0 %v6957_v60, %s5556_s29  ;;  %v2883_v2 = vrot.slane %v2881_v28, 1 }
 0x1e9   : > { %v6979_v35 = vpop.f32.mrb[12].mxu0  ;;  %v2879_v53 = vor.u32 %v2878_v23, %v2874_v58 }
 0x1ea   : > { %8510 = vst [vmem:[#allocation16_spill] sm:$0xff] %v6979_v35  ;;  %v2036_v61 = vadd.f32 %v6979_v35, %v6718_v57  ;;  %v6983_v40 = vpop.f32.mrb[13].mxu0 }
 0x1eb   : > { %8511 = vst [vmem:[#allocation17_spill] sm:$0xff] %v6983_v40  ;;  %v2034_v1 = vadd.f32 %v6718_v57, %v6983_v40  ;;  %v6991_v47 = vpop.f32.mrb[14].mxu0  ;;  %3086 = vrot.lane.b32.xlu1 %v6966_v13, %s5556_s29  ;;  %v7017_v3 = vsel %vm2800_vm0, %v2879_v53, %v2883_v2  ;;  %v440_v2 = vld [vmem:[#allocation2 + $0xc8] sm:$0x1] }
 0x1ec   : > { %8512 = vst [vmem:[#allocation18_spill] sm:$0xff] %v6991_v47  ;;  %v2068_v30 = vmax.f32 %v2036_v61, 0.0  ;;  %v2037_v52 = vadd.f32 %v6991_v47, %v6718_v57  ;;  %v6997_v8 = vpop.f32.mrb[15].mxu0  ;;  %3197 = vrot.lane.b32.xlu0 %v6986_v32, %s5560_s21  ;;  %v441_v44 = vsel %vm6511_vm14, 0, %v440_v2 }
 0x1ed   : > { %8513 = vst [vmem:[#allocation19_spill] sm:$0xff] %v6997_v8  ;;  %v2066_v31 = vmax.f32 %v2034_v1, 0.0  ;;  %v2035_v48 = vadd.f32 %v6718_v57, %v6997_v8  ;;  %v2548_v1 = vld [vmem:[#allocation2 + $0x54] sm:$0xf]  ;;  %442 = vst [vmem:[#allocation2 + $0xc8] sm:$0x1] %v441_v44 }
 0x1ee   : > { %v4588_v55 = vpack.c.bf16 %v2068_v30, %v2068_v30  ;;  %v2069_v10 = vmax.f32 %v2037_v52, 0.0  ;;  %v2559_v30 = vld [vmem:[#allocation2 + $0x68] sm:$0x1] }
 0x1ef   : > { %v4586_v9 = vpack.c.bf16 %v2066_v31, %v2066_v31  ;;  %v2067_v21 = vmax.f32 %v2035_v48, 0.0  ;;  %3084 = vrot.lane.b32.xlu1 %v7007_v50, %s5556_s29  ;;  %v2840_v31 = vshll.u32 %v6939_v17, 16 }
 0x1f0   : > { %v2304_v18 = vshrl.u32 %v4588_v55, 16  ;;  %v4589_v45 = vpack.c.bf16 %v2069_v10, %v2069_v10  ;;  %3080 = vrot.lane.b32.xlu0 %v6986_v32, %s5556_s29  ;;  %v2307_v12 = vshll.u32 %v4588_v55, 16  ;;  %v2552_v10 = vld [vmem:[#allocation2 + $0x5c] sm:$0x1] }
 0x1f1   : > { %v2287_v37 = vshrl.u32 %v4586_v9, 16  ;;  %v4587_v5 = vpack.c.bf16 %v2067_v21, %v2067_v21  ;;  %v2290_v51 = vshll.u32 %v4586_v9, 16 }
 0x1f2   : > { %v2306_v34 = vrot.slane %v2304_v18, 7  ;;  %v2312_v14 = vshrl.u32 %v4589_v45, 16  ;;  %v2315_v24 = vshll.u32 %v4589_v45, 16 }
 0x1f3   : > { %v2289_v49 = vrot.slane %v2287_v37, 7  ;;  %v2295_v61 = vshrl.u32 %v4587_v5, 16  ;;  %3168 = vrot.lane.b32.xlu1 %v7017_v3, %s5562_s28  ;;  %v2298_v19 = vshll.u32 %v4587_v5, 16 }
 0x1f4   : > { %v2309_v42 = vor.u32 %v2307_v12, %v2306_v34  ;;  %v2314_v20 = vrot.slane %v2312_v14, 7  ;;  %3281 = vrot.lane.b32.xlu0 %v2860_v6, %s5561_s17  ;;  %v2310_v48 = vrot.slane %v2306_v34, 4  ;;  %v437_v34 = vld [vmem:[#allocation2 + $0xbc] sm:$0x1]  ;;  %v2842_v12 = vrot.slane %v2840_v31, 1  ;;  %v7083_v31 = vpop.permute.xlu0 %2993 }
 0x1f5   : > { %v2292_v23 = vor.u32 %v2290_v51, %v2289_v49  ;;  %v2297_v52 = vrot.slane %v2295_v61, 7  ;;  %v2293_v4 = vrot.slane %v2289_v49, 4  ;;  %v438_v14 = vsel %vm6511_vm14, 0, %v437_v34 }
 0x1f6   : > { %v2556_v58 = vsel %vm6750_vm4, %v2309_v42, %v2555_v27  ;;  %v2317_v28 = vor.u32 %v2315_v24, %v2314_v20  ;;  %v2319_v55 = vrot.slane %v2314_v20, 4  ;;  %439 = vst [vmem:[#allocation2 + $0xbc] sm:$0x1] %v438_v14  ;;  %v2845_v27 = vshll.u32 %v6952_v22, 16 }
 0x1f7   : > { %2557 = vst [vmem:[#allocation2 + $0x60] sm:$0xf] %v2556_v58  ;;  %v2549_v9 = vsel %vm6750_vm4, %v2292_v23, %v2548_v1  ;;  %v2300_v21 = vor.u32 %v2298_v19, %v2297_v52  ;;  %v2302_v53 = vrot.slane %v2297_v52, 4  ;;  %3005 = vrot.lane.b32.xlu1 %v7017_v3, %s5552_s16  ;;  %v2843_v49 = vor.u32 %v2842_v12, %v2838_v33 }
 0x1f8   : > { %2550 = vst [vmem:[#allocation2 + $0x54] sm:$0xf] %v2549_v9  ;;  %v2318_v18 = vsel %vm6759_vm5, %v2310_v48, %v2317_v28  ;;  %v2560_v45 = vsel %vm6479_vm15, %v2319_v55, %v2559_v30  ;;  %3164 = vrot.lane.b32.xlu0 %v2860_v6, %s5562_s28  ;;  %v2847_v61 = vrot.slane %v2845_v27, 1 }
 0x1f9   : > { %2558 = vst.msk [vmem:[#allocation2 + $0x64] sm:$0xf] %vm332_vm12, %v2318_v18  ;;  %2561 = vst [vmem:[#allocation2 + $0x68] sm:$0x1] %v2560_v45  ;;  %v2301_v37 = vsel %vm6759_vm5, %v2293_v4, %v2300_v21  ;;  %v2553_v5 = vsel %vm6479_vm15, %v2302_v53, %v2552_v10 }
 0x1fa   : > { %2551 = vst.msk [vmem:[#allocation2 + $0x58] sm:$0xf] %vm332_vm12, %v2301_v37  ;;  %2554 = vst [vmem:[#allocation2 + $0x5c] sm:$0x1] %v2553_v5 }
 0x1fc   : > { %3001 = vrot.lane.b32.xlu0 %v2860_v6, %s5552_s16  ;;  %v2848_v6 = vsel %vm2800_vm0, %v2843_v49, %v2847_v61  ;;  %v2569_v61 = vld [vmem:[#allocation2 + $0x78] sm:$0xf] }
 0x200   : > { %3121 = vrot.lane.b32.xlu0 %v6954_v26, %s5559_s14  ;;  %v7049_v51 = vld [vmem:[#allocation2 + $0x60] sm:$0xff]   ;;  %v7075_v30 = vld [vmem:[#allocation2 + $0x68] ss:$0 sps:$4 sm:$0x11]  }
 0x201   : > { %v7051_v42 = vld [vmem:[#allocation2 + $0x54] sm:$0xff]   ;;  %3242 = vrot.lane.b32.xlu1 %v7049_v51, %s5558_s22  ;;  %v7055_v41 = vld [vmem:[#allocation2 + $0x5c] ss:$0 sps:$4 sm:$0x11]   ;;  %v3050_v21 = vrot.slane %v7049_v51, 1  ;;  %v3051_v53 = vrot.slane %v7075_v30, 1 }
 0x202   : > { %v3047_v17 = vrot.slane %v7051_v42, 1  ;;  %v3048_v22 = vrot.slane %v7055_v41, 1 }
 0x203   : > { %v7101_v49 = vsel %vm545_vm1, %v3050_v21, %v3051_v53 }
 0x204   : > { %3279 = vrot.lane.b32.xlu0 %v2848_v6, %s5561_s17  ;;  %v7064_v1 = vsel %vm545_vm1, %v3047_v17, %v3048_v22 }
 0x205   : > { %3125 = vrot.lane.b32.xlu1 %v7049_v51, %s5559_s14  ;;  %4554 = vmatprep.mubr.msk.bf16.mxu1 %vm1600_vm6, %v7064_v1 }
 0x208   : > { %3162 = vrot.lane.b32.xlu0 %v2848_v6, %s5562_s28 }
 0x209   : > { %v7068_v20 = vpop.f32.mrb[16].mxu0  ;;  %3240 = vrot.lane.b32.xlu1 %v7051_v42, %s5558_s22 }
 0x20a   : > { %8514 = vst [vmem:[#allocation20_spill] sm:$0xff] %v7068_v20  ;;  %v2040_v24 = vadd.f32 %v7068_v20, %v6718_v57  ;;  %v7073_v23 = vpop.f32.mrb[17].mxu0 }
 0x20b   : > { %8515 = vst [vmem:[#allocation21_spill] sm:$0xff] %v7073_v23  ;;  %v2038_v52 = vadd.f32 %v6718_v57, %v7073_v23  ;;  %v7081_v19 = vpop.f32.mrb[18].mxu0 }
 0x20c   : > { %8516 = vst [vmem:[#allocation22_spill] sm:$0xff] %v7081_v19  ;;  %v2072_v48 = vmax.f32 %v2040_v24, 0.0  ;;  %v2041_v58 = vadd.f32 %v7081_v19, %v6718_v57  ;;  %v7087_v28 = vpop.f32.mrb[19].mxu0  ;;  %2999 = vrot.lane.b32.xlu0 %v2848_v6, %s5552_s16 }
 0x20d   : > { %8517 = vst [vmem:[#allocation23_spill] sm:$0xff] %v7087_v28  ;;  %v2070_v55 = vmax.f32 %v2038_v52, 0.0  ;;  %v2039_v10 = vadd.f32 %v6718_v57, %v7087_v28  ;;  %3123 = vrot.lane.b32.xlu1 %v7051_v42, %s5559_s14  ;;  %v7098_v57 = vpop.permute.xlu0 %3074  ;;  %v2562_v52 = vld [vmem:[#allocation2 + $0x6c] sm:$0xf] }
 0x20e   : > { %v4592_v4 = vpack.c.bf16 %v2072_v48, %v2072_v48  ;;  %v2073_v9 = vmax.f32 %v2041_v58, 0.0 }
 0x20f   : > { %v4590_v18 = vpack.c.bf16 %v2070_v55, %v2070_v55  ;;  %v2071_v45 = vmax.f32 %v2039_v10, 0.0  ;;  %v2573_v10 = vld [vmem:[#allocation2 + $0x80] sm:$0x1] }
 0x210   : > { %v2338_v37 = vshrl.u32 %v4592_v4, 16  ;;  %v2341_v5 = vshll.u32 %v4592_v4, 16  ;;  %v4593_v2 = vpack.c.bf16 %v2073_v9, %v2073_v9  ;;  %3238 = vrot.lane.b32.xlu0 %v6954_v26, %s5558_s22  ;;  %v2864_v26 = vshll.u32 %v6968_v36, 16 }
 0x211   : > { %v2321_v44 = vshrl.u32 %v4590_v18, 16  ;;  %v2324_v34 = vshll.u32 %v4590_v18, 16  ;;  %v4591_v12 = vpack.c.bf16 %v2071_v45, %v2071_v45  ;;  %3207 = vrot.lane.b32.xlu1 %v7101_v49, %s5560_s21  ;;  %v2566_v45 = vld [vmem:[#allocation2 + $0x74] sm:$0x1] }
 0x212   : > { %v2340_v14 = vrot.slane %v2338_v37, 7  ;;  %v2346_v33 = vshrl.u32 %v4593_v2, 16  ;;  %v2349_v27 = vshll.u32 %v4593_v2, 16  ;;  %v2900_v37 = vshll.u32 %v7049_v51, 16 }
 0x213   : > { %v2323_v6 = vrot.slane %v2321_v44, 7  ;;  %v2329_v17 = vshrl.u32 %v4591_v12, 16  ;;  %v2332_v9 = vshll.u32 %v4591_v12, 16 }
 0x214   : > { %v2343_v22 = vor.u32 %v2341_v5, %v2340_v14  ;;  %v2344_v24 = vrot.slane %v2340_v14, 4  ;;  %v2348_v48 = vrot.slane %v2346_v33, 7  ;;  %3236 = vrot.lane.b32.xlu0 %v6968_v36, %s5558_s22  ;;  %v2866_v33 = vrot.slane %v2864_v26, 1 }
 0x215   : > { %v2326_v58 = vor.u32 %v2324_v34, %v2323_v6  ;;  %v2327_v55 = vrot.slane %v2323_v6, 4  ;;  %v2331_v4 = vrot.slane %v2329_v17, 7  ;;  %3090 = vrot.lane.b32.xlu1 %v7101_v49, %s5556_s29  ;;  %v2862_v6 = vshrl.u32 %v6968_v36, 16 }
 0x216   : > { %v2570_v21 = vsel %vm6750_vm4, %v2343_v22, %v2569_v61  ;;  %v2351_v53 = vor.u32 %v2349_v27, %v2348_v48  ;;  %v2353_v18 = vrot.slane %v2348_v48, 4  ;;  %v7115_v34 = vpop.permute.xlu0 %3230  ;;  %v2869_v17 = vshll.u32 %v6970_v39, 16 }
 0x217   : > { %2571 = vst [vmem:[#allocation2 + $0x78] sm:$0xf] %v2570_v21  ;;  %v2563_v5 = vsel %vm6750_vm4, %v2326_v58, %v2562_v52  ;;  %v2334_v2 = vor.u32 %v2332_v9, %v2331_v4  ;;  %v2336_v44 = vrot.slane %v2331_v4, 4  ;;  %v2902_v22 = vrot.slane %v2900_v37, 1 }
 0x218   : > { %2564 = vst [vmem:[#allocation2 + $0x6c] sm:$0xf] %v2563_v5  ;;  %v2352_v12 = vsel %vm6759_vm5, %v2344_v24, %v2351_v53  ;;  %v2574_v14 = vsel %vm6479_vm15, %v2353_v18, %v2573_v10  ;;  %3119 = vrot.lane.b32.xlu0 %v6968_v36, %s5559_s14  ;;  %v2867_v52 = vor.u32 %v2866_v33, %v2862_v6  ;;  %v2898_v48 = vshrl.u32 %v7049_v51, 16 }
 0x219   : > { %2572 = vst.msk [vmem:[#allocation2 + $0x7c] sm:$0xf] %vm332_vm12, %v2352_v12  ;;  %2575 = vst [vmem:[#allocation2 + $0x80] sm:$0x1] %v2574_v14  ;;  %v2335_v27 = vsel %vm6759_vm5, %v2327_v55, %v2334_v2  ;;  %v2567_v61 = vsel %vm6479_vm15, %v2336_v44, %v2566_v45  ;;  %3205 = vrot.lane.b32.xlu1 %v7064_v1, %s5560_s21  ;;  %v2905_v26 = vshll.u32 %v7075_v30, 16  ;;  %v2871_v58 = vrot.slane %v2869_v17, 1 }
 0x21a   : > { %2565 = vst.msk [vmem:[#allocation2 + $0x70] sm:$0xf] %vm332_vm12, %v2335_v27  ;;  %2568 = vst [vmem:[#allocation2 + $0x74] sm:$0x1] %v2567_v61  ;;  %v7133_v24 = vpop.permute.xlu0 %3113  ;;  %v2903_v55 = vor.u32 %v2902_v22, %v2898_v48  ;;  %v2888_v51 = vshll.u32 %v7051_v42, 16  ;;  %v2886_v21 = vshrl.u32 %v7051_v42, 16 }
 0x21b   : > { %v2872_v39 = vsel %vm2800_vm0, %v2867_v52, %v2871_v58  ;;  %v2907_v10 = vrot.slane %v2905_v26, 1  ;;  %v2893_v53 = vshll.u32 %v7055_v41, 16  ;;  %v7162_v45 = vld [vmem:[%s8413_s2] ss:$0 sm:$0xff] }
 0x21c   : > { %3201 = vrot.lane.b32.xlu0 %v7007_v50, %s5560_s21  ;;  %v2890_v9 = vrot.slane %v2888_v51, 1 }
 0x21d   : > { %3088 = vrot.lane.b32.xlu1 %v7064_v1, %s5556_s29  ;;  %v2908_v4 = vsel %vm2800_vm0, %v2903_v55, %v2907_v10  ;;  %v2895_v27 = vrot.slane %v2893_v53, 1 }
 0x21e   : > { %v7141_v36 = vpop.permute.xlu0 %3111  ;;  %v2891_v2 = vor.u32 %v2890_v9, %v2886_v21 }
 0x220   : > { %3003 = vrot.lane.b32.xlu0 %v2872_v39, %s5552_s16  ;;  %v2896_v52 = vsel %vm2800_vm0, %v2891_v2, %v2895_v27 }
 0x221   : > { %3289 = vrot.lane.b32.xlu1 %v2908_v4, %s5561_s17 }
 0x222   : > { %v7148_v30 = vpop.permute.xlu0 %3195 }
 0x224   : > { %3283 = vrot.lane.b32.xlu0 %v2872_v39, %s5561_s17 }
 0x225   : > { %3172 = vrot.lane.b32.xlu1 %v2908_v4, %s5562_s28 }
 0x226   : > { %v7152_v1 = vpop.permute.xlu0 %3078 }
 0x228   : > { %3166 = vrot.lane.b32.xlu0 %v2872_v39, %s5562_s28 }
 0x229   : > { %v7156_v18 = vpop.f32.mrb[20].mxu0  ;;  %3009 = vrot.lane.b32.xlu1 %v2908_v4, %s5552_s16 }
 0x22a   : > { %8518 = vst [vmem:[#allocation24_spill] sm:$0xff] %v7156_v18  ;;  %v2044_v37 = vadd.f32 %v7162_v45, %v7156_v18  ;;  %v7166_v5 = vpop.f32.mrb[21].mxu0  ;;  %v7173_v44 = vpop.permute.xlu0 %3193 }
 0x22b   : > { %8519 = vst [vmem:[#allocation25_spill] sm:$0xff] %v7166_v5  ;;  %v2042_v42 = vadd.f32 %v7162_v45, %v7166_v5  ;;  %v7171_v41 = vpop.f32.mrb[22].mxu0 }
 0x22c   : > { %8520 = vst [vmem:[#allocation26_spill] sm:$0xff] %v7171_v41  ;;  %v2076_v12 = vmax.f32 %v2044_v37, 0.0  ;;  %v2045_v14 = vadd.f32 %v7162_v45, %v7171_v41  ;;  %v7177_v33 = vpop.f32.mrb[23].mxu0  ;;  %3285 = vrot.lane.b32.xlu0 %v7017_v3, %s5561_s17  ;;  %v2583_v3 = vld [vmem:[#allocation2 + $0x90] sm:$0xf] }
 0x22d   : > { %8521 = vst [vmem:[#allocation27_spill] sm:$0xff] %v7177_v33  ;;  %v2074_v61 = vmax.f32 %v2042_v42, 0.0  ;;  %v2043_v6 = vadd.f32 %v7162_v45, %v7177_v33  ;;  %3287 = vrot.lane.b32.xlu1 %v2896_v52, %s5561_s17 }
 0x22e   : > { %v4596_v17 = vpack.c.bf16 %v2076_v12, %v2076_v12  ;;  %v2077_v22 = vmax.f32 %v2045_v14, 0.0  ;;  %v7185_v58 = vpop.permute.xlu0 %3076 }
 0x22f   : > { %v4594_v48 = vpack.c.bf16 %v2074_v61, %v2074_v61  ;;  %v2075_v26 = vmax.f32 %v2043_v6, 0.0  ;;  %v2576_v6 = vld [vmem:[#allocation2 + $0x84] sm:$0xf] }
 0x230   : > { %v2372_v55 = vshrl.u32 %v4596_v17, 16  ;;  %v2375_v39 = vshll.u32 %v4596_v17, 16  ;;  %v4597_v10 = vpack.c.bf16 %v2077_v22, %v2077_v22  ;;  %v2587_v22 = vld [vmem:[#allocation2 + $0x98] sm:$0x1] }
 0x231   : > { %v2355_v4 = vshrl.u32 %v4594_v48, 16  ;;  %v2358_v51 = vshll.u32 %v4594_v48, 16  ;;  %v4595_v9 = vpack.c.bf16 %v2075_v26, %v2075_v26  ;;  %3170 = vrot.lane.b32.xlu1 %v2896_v52, %s5562_s28 }
 0x232   : > { %v2374_v21 = vrot.slane %v2372_v55, 7  ;;  %v2380_v53 = vshrl.u32 %v4597_v10, 16  ;;  %v2383_v37 = vshll.u32 %v4597_v10, 16  ;;  %v3278_v2 = vpop.permute.xlu0 %3277  ;;  %v2580_v10 = vld [vmem:[#allocation2 + $0x8c] sm:$0x1] }
 0x233   : > { %v2357_v42 = vrot.slane %v2355_v4, 7  ;;  %v2363_v12 = vshrl.u32 %v4595_v9, 16  ;;  %v2366_v14 = vshll.u32 %v4595_v9, 16 }
 0x234   : > { %v2377_v27 = vor.u32 %v2375_v39, %v2374_v21  ;;  %v2378_v61 = vrot.slane %v2374_v21, 4  ;;  %v2382_v41 = vrot.slane %v2380_v53, 7  ;;  %v5476_v53 = vld [vmem:[#allocation2] sm:$0xff]  }
 0x235   : > { %v2360_v33 = vor.u32 %v2358_v51, %v2357_v42  ;;  %v2361_v17 = vrot.slane %v2357_v42, 4  ;;  %v2365_v19 = vrot.slane %v2363_v12, 7  ;;  %3007 = vrot.lane.b32.xlu1 %v2896_v52, %s5552_s16  ;;  %v7206_v52 = vld [vmem:[#allocation2 + $0x78] sm:$0xff]   ;;  %v7219_v42 = vld [vmem:[#allocation2 + $0x6c] sm:$0xff]  }
 0x236   : > { %v2584_v48 = vsel %vm6750_vm4, %v2377_v27, %v2583_v3  ;;  %v2385_v26 = vor.u32 %v2383_v37, %v2382_v41  ;;  %v2387_v55 = vrot.slane %v2382_v41, 4  ;;  %v7193_v39 = vpop.permute.xlu0 %3160  ;;  %v3313_v41 = vsel %vm1600_vm6, %v5476_v53, %v7083_v31  ;;  %8522 = vst [vmem:[#allocation28_spill] sm:$0xff] %v7206_v52  ;;  %8523 = vst [vmem:[#allocation29_spill] sm:$0xff] %v7219_v42 }
 0x237   : > { %2585 = vst [vmem:[#allocation2 + $0x90] sm:$0xf] %v2584_v48  ;;  %v2577_v4 = vsel %vm6750_vm4, %v2360_v33, %v2576_v6  ;;  %v2368_v9 = vor.u32 %v2366_v14, %v2365_v19  ;;  %v2370_v28 = vrot.slane %v2365_v19, 4  ;;  %v3345_v31 = vsel %vm1732_vm10, %v3313_v41, %v7098_v57  ;;  %v7222_v14 = vld [vmem:[#allocation2 + $0x80] ss:$0 sps:$4 sm:$0x11]  }
 0x238   : > { %2578 = vst [vmem:[#allocation2 + $0x84] sm:$0xf] %v2577_v4  ;;  %v2386_v51 = vsel %vm6759_vm5, %v2378_v61, %v2385_v26  ;;  %v2588_v21 = vsel %vm6479_vm15, %v2387_v55, %v2587_v22  ;;  %v3378_v3 = vsel %vm3376_vm7, %v3345_v31, %v7141_v36 }
 0x239   : > { %2586 = vst.msk [vmem:[#allocation2 + $0x94] sm:$0xf] %vm332_vm12, %v2386_v51  ;;  %2589 = vst [vmem:[#allocation2 + $0x98] sm:$0x1] %v2588_v21  ;;  %v2369_v19 = vsel %vm6759_vm5, %v2361_v17, %v2368_v9  ;;  %v2581_v33 = vsel %vm6479_vm15, %v2370_v28, %v2580_v10  ;;  %3246 = vrot.lane.b32.xlu1 %v7206_v52, %s5558_s22  ;;  %v3057_v51 = vrot.slane %v7222_v14, 1 }
 0x23a   : > { %2579 = vst.msk [vmem:[#allocation2 + $0x88] sm:$0xf] %vm332_vm12, %v2369_v19  ;;  %2582 = vst [vmem:[#allocation2 + $0x8c] sm:$0x1] %v2581_v33  ;;  %v7211_v37 = vpop.permute.xlu0 %2997 }
 0x23d   : > { %3129 = vrot.lane.b32.xlu1 %v7206_v52, %s5559_s14 }
 0x23e   : > { %v3159_v28 = vpop.permute.xlu0 %3158 }
 0x23f   : > { %v3411_v12 = vsel %vm3409_vm8, %v3378_v3, %v3159_v28  ;;  %v7268_v3 = vld [vmem:[#allocation2 + $0x74] ss:$0 sps:$4 sm:$0x11]  }
 0x240   : > { %v7224_v27 = vld [vmem:[#allocation2 + $0x90] sm:$0xff]   ;;  %v3444_v57 = vsel %vm3442_vm9, %v3411_v12, %v7173_v44  ;;  %v7234_v17 = vld [vmem:[#allocation2 + $0x98] ss:$0 sps:$4 sm:$0x11]  }
 0x241   : > { %v7228_v61 = vld [vmem:[#allocation2 + $0x84] sm:$0xff]   ;;  %v3477_v36 = vsel %vm3475_vm11, %v3444_v57, %v7115_v34  ;;  %v7232_v6 = vld [vmem:[#allocation2 + $0x8c] ss:$0 sps:$4 sm:$0x11]   ;;  %3244 = vrot.lane.b32.xlu1 %v7219_v42, %s5558_s22  ;;  %v2948_v44 = vshll.u32 %v7224_v27, 16  ;;  %v2946_v34 = vshrl.u32 %v7224_v27, 16 }
 0x242   : > { %v7238_v22 = vpop.permute.xlu0 %2995  ;;  %v3510_v48 = vsel %vm3508_vm13, %v3477_v36, %v3278_v2  ;;  %v3059_v26 = vrot.slane %v7228_v61, 1  ;;  %v3060_v55 = vrot.slane %v7232_v6, 1  ;;  %v2953_v10 = vshll.u32 %v7234_v17, 16 }
 0x243   : > { %3717 = vmatmul.mubr.bf16.vlgmr.msra.gmra.mrb[32].mxu0 %v3510_v48  ;;  %v2950_v4 = vrot.slane %v2948_v44, 1  ;;  %v3056_v2 = vrot.slane %v7206_v52, 1 }
 0x244   : > { %4550 = vmatprep.mubr.msk.bf16.mxu0 %vm1600_vm6, %v6986_v32  ;;  %v7249_v9 = vsel %vm545_vm1, %v3059_v26, %v3060_v55  ;;  %v2955_v41 = vrot.slane %v2953_v10, 1  ;;  %v2924_v10 = vshll.u32 %v7206_v52, 16 }
 0x245   : > { %8524 = vst [vmem:[#allocation30_spill] sm:$0xff] %v7249_v9  ;;  %3127 = vrot.lane.b32.xlu1 %v7219_v42, %s5559_s14  ;;  %3213 = vrot.lane.b32.xlu0 %v7249_v9, %s5560_s21  ;;  %v2951_v53 = vor.u32 %v2950_v4, %v2946_v34  ;;  %v7266_v31 = vsel %vm545_vm1, %v3056_v2, %v3057_v51  ;;  %v3053_v51 = vrot.slane %v7219_v42, 1 }
 0x246   : > { %v7257_v21 = vpop.permute.xlu0 %3234  ;;  %8527 = vst [vmem:[#allocation33_spill] sm:$0xff] %v7266_v31  ;;  %v2926_v63 = vrot.slane %v2924_v10, 1  ;;  %v2590_v10 = vld [vmem:[#allocation2 + $0x9c] sm:$0xf] }
 0x247   : > { %v7285_v44 = vsel %vm2800_vm0, %v2951_v53, %v2955_v41 }
 0x249   : > { %v7259_v19 = vpop.f32.mrb[24].mxu0  ;;  %3211 = vrot.lane.b32.xlu1 %v7266_v31, %s5560_s21  ;;  %3096 = vrot.lane.b32.xlu0 %v7249_v9, %s5556_s29 }
 0x24a   : > { %8525 = vst [vmem:[#allocation31_spill] sm:$0xff] %v7259_v19  ;;  %v2048_v32 = vadd.f32 %v7162_v45, %v7259_v19  ;;  %v7263_v33 = vpop.f32.mrb[25].mxu0  ;;  %v7278_v57 = vpop.permute.xlu0 %3117 }
 0x24b   : > { %8526 = vst [vmem:[#allocation32_spill] sm:$0xff] %v7263_v33  ;;  %v2046_v28 = vadd.f32 %v7162_v45, %v7263_v33  ;;  %v7276_v12 = vpop.f32.mrb[26].mxu0 }
 0x24c   : > { %8528 = vst [vmem:[#allocation34_spill] sm:$0xff] %v7276_v12  ;;  %v2080_v36 = vmax.f32 %v2048_v32, 0.0  ;;  %v2049_v48 = vadd.f32 %v7162_v45, %v7276_v12  ;;  %v7282_v26 = vpop.f32.mrb[27].mxu0  ;;  %v3054_v32 = vrot.slane %v7268_v3, 1 }
 0x24d   : > { %8529 = vst [vmem:[#allocation35_spill] sm:$0xff] %v7282_v26  ;;  %v2078_v55 = vmax.f32 %v2046_v28, 0.0  ;;  %v2047_v34 = vadd.f32 %v7162_v45, %v7282_v26  ;;  %3094 = vrot.lane.b32.xlu1 %v7266_v31, %s5556_s29  ;;  %3297 = vrot.lane.b32.xlu0 %v7285_v44, %s5561_s17  ;;  %v2597_v31 = vld [vmem:[#allocation2 + $0xa8] sm:$0xf] }
 0x24e   : > { %v4600_v4 = vpack.c.bf16 %v2080_v36, %v2080_v36  ;;  %v2081_v2 = vmax.f32 %v2049_v48, 0.0  ;;  %v7296_v53 = vpop.permute.xlu0 %3232  ;;  %v2929_v36 = vshll.u32 %v7222_v14, 16  ;;  %v7300_v43 = vsel %vm545_vm1, %v3053_v51, %v3054_v32  ;;  %v2601_v32 = vld [vmem:[#allocation2 + $0xb0] sm:$0x1] }
 0x24f   : > { %v4598_v47 = vpack.c.bf16 %v2078_v55, %v2078_v55  ;;  %v2079_v8 = vmax.f32 %v2047_v34, 0.0 }
 0x250   : > { %v2406_v41 = vshrl.u32 %v4600_v4, 16  ;;  %v2409_v28 = vshll.u32 %v4600_v4, 16  ;;  %v4601_v12 = vpack.c.bf16 %v2081_v2, %v2081_v2 }
 0x251   : > { %v2389_v48 = vshrl.u32 %v4598_v47, 16  ;;  %v2392_v26 = vshll.u32 %v4598_v47, 16  ;;  %v4599_v9 = vpack.c.bf16 %v2079_v8, %v2079_v8  ;;  %3209 = vrot.lane.b32.xlu1 %v7300_v43, %s5560_s21  ;;  %3180 = vrot.lane.b32.xlu0 %v7285_v44, %s5562_s28 }
 0x252   : > { %v2408_v16 = vrot.slane %v2406_v41, 7  ;;  %v2414_v55 = vshrl.u32 %v4601_v12, 16  ;;  %v2417_v34 = vshll.u32 %v4601_v12, 16  ;;  %v7306_v14 = vpop.permute.xlu0 %3115  ;;  %v2922_v12 = vshrl.u32 %v7206_v52, 16 }
 0x253   : > { %v2391_v19 = vrot.slane %v2389_v48, 7  ;;  %v2397_v62 = vshrl.u32 %v4599_v9, 16  ;;  %v2400_v33 = vshll.u32 %v4599_v9, 16  ;;  %v2931_v48 = vrot.slane %v2929_v36, 1 }
 0x254   : > { %v2411_v47 = vor.u32 %v2409_v28, %v2408_v16  ;;  %v2412_v8 = vrot.slane %v2408_v16, 4  ;;  %v2416_v4 = vrot.slane %v2414_v55, 7  ;;  %v2927_v5 = vor.u32 %v2926_v63, %v2922_v12 }
 0x255   : > { %v2394_v2 = vor.u32 %v2392_v26, %v2391_v19  ;;  %v2395_v51 = vrot.slane %v2391_v19, 4  ;;  %v2399_v41 = vrot.slane %v2397_v62, 7  ;;  %3092 = vrot.lane.b32.xlu1 %v7300_v43, %s5556_s29  ;;  %v2912_v36 = vshll.u32 %v7219_v42, 16 }
 0x256   : > { %v2598_v9 = vsel %vm6750_vm4, %v2411_v47, %v2597_v31  ;;  %v2419_v15 = vor.u32 %v2417_v34, %v2416_v4  ;;  %v2421_v18 = vrot.slane %v2416_v4, 4  ;;  %v7315_v19 = vpop.permute.xlu0 %3199  ;;  %v2932_v26 = vsel %vm2800_vm0, %v2927_v5, %v2931_v48 }
 0x257   : > { %2599 = vst [vmem:[#allocation2 + $0xa8] sm:$0xf] %v2598_v9  ;;  %v2591_v16 = vsel %vm6750_vm4, %v2394_v2, %v2590_v10  ;;  %v2402_v28 = vor.u32 %v2400_v33, %v2399_v41  ;;  %v2404_v55 = vrot.slane %v2399_v41, 4  ;;  %v2914_v34 = vrot.slane %v2912_v36, 1 }
 0x258   : > { %2592 = vst [vmem:[#allocation2 + $0x9c] sm:$0xf] %v2591_v16  ;;  %v2420_v62 = vsel %vm6759_vm5, %v2412_v8, %v2419_v15  ;;  %v2602_v31 = vsel %vm6479_vm15, %v2421_v18, %v2601_v32  ;;  %v2917_v10 = vshll.u32 %v7268_v3, 16 }
 0x259   : > { %2600 = vst.msk [vmem:[#allocation2 + $0xac] sm:$0xf] %vm332_vm12, %v2420_v62  ;;  %2603 = vst [vmem:[#allocation2 + $0xb0] sm:$0x1] %v2602_v31  ;;  %v2403_v63 = vsel %vm6759_vm5, %v2395_v51, %v2402_v28  ;;  %v2595_v33 = vsel %vm6479_vm15, %v2404_v55, %v2594_v29  ;;  %v7329_v15 = vpop.permute.xlu1 %3203  ;;  %3293 = vrot.lane.b32.xlu1 %v2932_v26, %s5561_s17  ;;  %v2910_v29 = vshrl.u32 %v7219_v42, 16 }
 0x25a   : > { %2593 = vst.msk [vmem:[#allocation2 + $0xa0] sm:$0xf] %vm332_vm12, %v2403_v63  ;;  %2596 = vst [vmem:[#allocation2 + $0xa4] sm:$0x1] %v2595_v33  ;;  %v7332_v18 = vpop.permute.xlu0 %3082  ;;  %v2919_v32 = vrot.slane %v2917_v10, 1  ;;  %v5477_v33 = vld [vmem:[#allocation2 + $0xc] sm:$0xff]  }
 0x25b   : > { %v2915_v12 = vor.u32 %v2914_v34, %v2910_v29 }
 0x25d   : > { %v7334_v47 = vpop.permute.xlu1 %3086  ;;  %3176 = vrot.lane.b32.xlu1 %v2932_v26, %s5562_s28  ;;  %v2920_v9 = vsel %vm2800_vm0, %v2915_v12, %v2919_v32 }
 0x25e   : > { %v7337_v8 = vpop.permute.xlu0 %3197 }
 0x260   : > { %v7341_v5 = vld [vmem:[#allocation2 + $0xa8] sm:$0xff]   ;;  %v7352_v41 = vld [vmem:[#allocation2 + $0xb0] ss:$0 sps:$4 sm:$0x11]  }
 0x261   : > { %v7343_v4 = vld [vmem:[#allocation2 + $0x9c] sm:$0xff]   ;;  %3013 = vrot.lane.b32.xlu1 %v2932_v26, %s5552_s16  ;;  %v7350_v51 = vld [vmem:[#allocation2 + $0xa4] ss:$0 sps:$4 sm:$0x11]   ;;  %v2972_v48 = vshll.u32 %v7341_v5, 16  ;;  %v7355_v3 = vpop.permute.xlu1 %3084  ;;  %v2970_v62 = vshrl.u32 %v7341_v5, 16  ;;  %v3315_v26 = vsel %vm1600_vm6, %v5477_v33, %v7238_v22 }
 0x262   : > { %v7346_v2 = vpop.permute.xlu0 %3080  ;;  %3252 = vrot.lane.b32.xlu0 %v7343_v4, %s5558_s22  ;;  %v3065_v28 = vrot.slane %v7343_v4, 1  ;;  %v3066_v55 = vrot.slane %v7350_v51, 1  ;;  %v2977_v63 = vshll.u32 %v7352_v41, 16  ;;  %v3347_v52 = vsel %vm1732_vm10, %v3315_v26, %v7185_v58 }
 0x263   : > { %v2974_v31 = vrot.slane %v2972_v48, 1 }
 0x264   : > { %v7383_v12 = vsel %vm545_vm1, %v3065_v28, %v3066_v55  ;;  %v2979_v32 = vrot.slane %v2977_v63, 1  ;;  %v3380_v63 = vsel %vm3376_vm7, %v3347_v52, %v7133_v24 }
 0x265   : > { %3291 = vrot.lane.b32.xlu1 %v2920_v9, %s5561_s17  ;;  %v7369_v36 = vpop.permute.xlu1 %3168  ;;  %v2975_v22 = vor.u32 %v2974_v31, %v2970_v62 }
 0x266   : > { %v7359_v16 = vpop.permute.xlu0 %3281  ;;  %3017 = vrot.lane.b32.xlu0 %v7285_v44, %s5552_s16 }
 0x267   : > { %v7403_v58 = vsel %vm2800_vm0, %v2975_v22, %v2979_v32  ;;  %v2611_v22 = vld [vmem:[#allocation2 + $0xc0] sm:$0xf] }
 0x269   : > { %v7371_v34 = vpop.f32.mrb[28].mxu0  ;;  %3174 = vrot.lane.b32.xlu1 %v2920_v9, %s5562_s28 }
 0x26a   : > { %8530 = vst [vmem:[#allocation36_spill] sm:$0xff] %v7371_v34  ;;  %3135 = vrot.lane.b32.xlu0 %v7343_v4, %s5559_s14  ;;  %v2052_v44 = vadd.f32 %v7162_v45, %v7371_v34  ;;  %v7378_v29 = vpop.f32.mrb[29].mxu0  ;;  %v7380_v10 = vpop.permute.xlu0 %3164 }
 0x26b   : > { %8531 = vst [vmem:[#allocation37_spill] sm:$0xff] %v7378_v29  ;;  %v2050_v48 = vadd.f32 %v7162_v45, %v7378_v29  ;;  %v7387_v33 = vpop.f32.mrb[30].mxu0 }
 0x26c   : > { %8532 = vst [vmem:[#allocation38_spill] sm:$0xff] %v7387_v33  ;;  %v2084_v42 = vmax.f32 %v2052_v44, 0.0  ;;  %v2053_v34 = vadd.f32 %v7162_v45, %v7387_v33  ;;  %v7393_v20 = vpop.f32.mrb[31].mxu0  ;;  %v7407_v44 = vpop.permute.xlu1 %3005 }
 0x26d   : > { %8533 = vst [vmem:[#allocation39_spill] sm:$0xff] %v7393_v20  ;;  %v2082_v23 = vmax.f32 %v2050_v48, 0.0  ;;  %v2051_v28 = vadd.f32 %v7162_v45, %v7393_v20  ;;  %3011 = vrot.lane.b32.xlu1 %v2920_v9, %s5552_s16 }
 0x26e   : > { %3217 = vrot.lane.b32.xlu0 %v7383_v12, %s5560_s21  ;;  %v4604_v55 = vpack.c.bf16 %v2084_v42, %v2084_v42  ;;  %v2085_v62 = vmax.f32 %v2053_v34, 0.0  ;;  %v7400_v31 = vpop.permute.xlu0 %3001  ;;  %v3413_v42 = vsel %vm3409_vm8, %v3380_v63, %v7193_v39 }
 0x26f   : > { %v4602_v26 = vpack.c.bf16 %v2082_v23, %v2082_v23  ;;  %v2083_v48 = vmax.f32 %v2051_v28, 0.0  ;;  %v3446_v39 = vsel %vm3442_vm9, %v3413_v42, %v7148_v30 }
 0x270   : > { %v2440_v45 = vshrl.u32 %v4604_v55, 16  ;;  %v2443_v33 = vshll.u32 %v4604_v55, 16  ;;  %v4605_v9 = vpack.c.bf16 %v2085_v62, %v2085_v62 }
 0x271   : > { %v2423_v20 = vshrl.u32 %v4602_v26, 16  ;;  %v2426_v29 = vshll.u32 %v4602_v26, 16  ;;  %v4603_v35 = vpack.c.bf16 %v2083_v48, %v2083_v48  ;;  %3250 = vrot.lane.b32.xlu1 %v7224_v27, %s5558_s22  ;;  %v5478_v26 = vld [vmem:[#allocation2 + $0x18] sm:$0xff]  }
 0x272   : > { %3301 = vrot.lane.b32.xlu0 %v7403_v58, %s5561_s17  ;;  %v2442_v24 = vrot.slane %v2440_v45, 7  ;;  %v2448_v23 = vshrl.u32 %v4605_v9, 16  ;;  %v2451_v52 = vshll.u32 %v4605_v9, 16  ;;  %v7415_v34 = vpop.permute.xlu0 %3121  ;;  %v3317_v48 = vsel %vm1600_vm6, %v5478_v26, %v7211_v37  ;;  %v2615_v9 = vld [vmem:[#allocation2 + $0xc8] sm:$0x1] }
 0x273   : > { %v2425_v32 = vrot.slane %v2423_v20, 7  ;;  %v2431_v28 = vshrl.u32 %v4603_v35, 16  ;;  %v2434_v55 = vshll.u32 %v4603_v35, 16  ;;  %v7417_v62 = vpop.permute.xlu1 %3242  ;;  %v3479_v35 = vsel %vm3475_vm11, %v3446_v39, %v7296_v53 }
 0x274   : > { %v2445_v40 = vor.u32 %v2443_v33, %v2442_v24  ;;  %v2446_v0 = vrot.slane %v2442_v24, 4  ;;  %v2450_v54 = vrot.slane %v2448_v23, 7  ;;  %v2608_v24 = vld [vmem:[#allocation2 + $0xbc] sm:$0x1]  ;;  %v3349_v46 = vsel %vm1732_vm10, %v3317_v48, %v7152_v1 }
 0x275   : > { %v2428_v63 = vor.u32 %v2426_v29, %v2425_v32  ;;  %v2429_v45 = vrot.slane %v2425_v32, 4  ;;  %v2433_v56 = vrot.slane %v2431_v28, 7  ;;  %3133 = vrot.lane.b32.xlu1 %v7224_v27, %s5559_s14  ;;  %v2941_v26 = vshll.u32 %v7232_v6, 16 }
 0x276   : > { %3100 = vrot.lane.b32.xlu0 %v7383_v12, %s5556_s29  ;;  %v2612_v20 = vsel %vm6750_vm4, %v2445_v40, %v2611_v22  ;;  %v2453_v37 = vor.u32 %v2451_v52, %v2450_v54  ;;  %v2455_v33 = vrot.slane %v2450_v54, 4  ;;  %v3280_v30 = vpop.permute.xlu0 %3279  ;;  %v2936_v54 = vshll.u32 %v7228_v61, 16 }
 0x277   : > { %2613 = vst [vmem:[#allocation2 + $0xc0] sm:$0xf] %v2612_v20  ;;  %v2605_v29 = vsel %vm6750_vm4, %v2428_v63, %v2604_v59  ;;  %v2436_v42 = vor.u32 %v2434_v55, %v2433_v56  ;;  %v2438_v23 = vrot.slane %v2433_v56, 4  ;;  %v7433_v32 = vpop.permute.xlu1 %3125  ;;  %v3513_v28 = vsel %vm3508_vm13, %v3479_v35, %v3280_v30 }
 0x278   : > { %2606 = vst [vmem:[#allocation2 + $0xb4] sm:$0xf] %v2605_v29  ;;  %v2454_v53 = vsel %vm6759_vm5, %v2446_v0, %v2453_v37  ;;  %v2616_v40 = vsel %vm6479_vm15, %v2455_v33, %v2615_v9  ;;  %3725 = vmatmul.mubr.bf16.gmra.mrb[36].mxu0 %v3513_v28  ;;  %v3382_v0 = vsel %vm3376_vm7, %v3349_v46, %v7306_v14  ;;  %v3062_v52 = vrot.slane %v7224_v27, 1 }
 0x279   : > { %2614 = vst.msk [vmem:[#allocation2 + $0xc4] sm:$0xf] %vm332_vm12, %v2454_v53  ;;  %2617 = vst [vmem:[#allocation2 + $0xc8] sm:$0x1] %v2616_v40  ;;  %v2437_v56 = vsel %vm6759_vm5, %v2429_v45, %v2436_v42  ;;  %v2609_v59 = vsel %vm6479_vm15, %v2438_v23, %v2608_v24  ;;  %4551 = vmatprep.mubr.msk.bf16.mxu0 %vm1600_vm6, %v6957_v60  ;;  %3248 = vrot.lane.b32.xlu1 %v7228_v61, %s5558_s22  ;;  %v3063_v60 = vrot.slane %v7234_v17, 1 }
 0x27a   : > { %2607 = vst.msk [vmem:[#allocation2 + $0xb8] sm:$0xf] %vm332_vm12, %v2437_v56  ;;  %2610 = vst [vmem:[#allocation2 + $0xbc] sm:$0x1] %v2609_v59  ;;  %v3163_v1 = vpop.permute.xlu0 %3162  ;;  %3184 = vrot.lane.b32.xlu0 %v7403_v58, %s5562_s28  ;;  %v2934_v14 = vshrl.u32 %v7228_v61, 16  ;;  %v2938_v55 = vrot.slane %v2936_v54, 1 }
 0x27b   : > { %v3415_v25 = vsel %vm3409_vm8, %v3382_v0, %v3163_v1  ;;  %v7458_v7 = vpop.permute.xlu1 %3240  ;;  %v7475_v17 = vsel %vm545_vm1, %v3062_v52, %v3063_v60  ;;  %v2943_v9 = vrot.slane %v2941_v26, 1  ;;  %v2960_v42 = vshll.u32 %v7343_v4, 16  ;;  %v5479_v54 = vld [vmem:[#allocation2 + $0x24] sm:$0xff]  }
 0x27c   : > { %v3448_v22 = vsel %vm3442_vm9, %v3415_v25, %v7337_v8  ;;  %v2939_v8 = vor.u32 %v2938_v55, %v2934_v14  ;;  %v2958_v59 = vshrl.u32 %v7343_v4, 16  ;;  %v2965_v1 = vshll.u32 %v7350_v51, 16 }
 0x27d   : > { %3131 = vrot.lane.b32.xlu1 %v7228_v61, %s5559_s14  ;;  %v3481_v48 = vsel %vm3475_vm11, %v3448_v22, %v7257_v21  ;;  %v2962_v0 = vrot.slane %v2960_v42, 1  ;;  %v5481_v42 = vld [vmem:[#allocation2 + $0x30] sm:$0xff]   ;;  %vm4026_vm12 = vcmask 15360  }
 0x27e   : > { %v3000_v39 = vpop.permute.xlu0 %2999  ;;  %v3516_v63 = vsel %vm3508_vm13, %v3481_v48, %v7359_v16  ;;  %v2944_v37 = vsel %vm2800_vm0, %v2939_v8, %v2943_v9  ;;  %v5480_v8 = vld [vmem:[#allocation2 + $0x3c] sm:$0xff]  }
 0x27f   : > { %v7472_v45 = vpop.permute.xlu1 %3123  ;;  %v3319_v46 = vsel %vm1600_vm6, %v5479_v54, %v3000_v39  ;;  %v2963_v48 = vor.u32 %v2962_v0, %v2958_v59  ;;  %v7562_v59 = vld [vmem:[#allocation2 + $0xcc] sm:$0xff]  }
 0x280   : > { %3733 = vmatmul.mubr.bf16.gmra.mrb[40].mxu0 %v3516_v63  ;;  %v7477_v35 = vld [vmem:[#allocation2 + $0xc0] sm:$0xff]   ;;  %v7494_v33 = vld [vmem:[#allocation2 + $0xc8] ss:$0 sps:$4 sm:$0x11]   ;;  %v3351_v25 = vsel %vm1732_vm10, %v3319_v46, %v7346_v2  ;;  %v2967_v2 = vrot.slane %v2965_v1, 1 }
 0x281   : > { %4552 = vmatprep.mubr.msk.bf16.mxu0 %vm1600_vm6, %v7007_v50  ;;  %3215 = vrot.lane.b32.xlu1 %v7475_v17, %s5560_s21  ;;  %v7483_v6 = vld [vmem:[#allocation2 + $0xb4] sm:$0xff]   ;;  %v7491_v20 = vld [vmem:[#allocation2 + $0xbc] ss:$0 sps:$4 sm:$0x11]   ;;  %v3149_v50 = vshll.u32 %v7477_v35, 16  ;;  %v3147_v28 = vshrl.u32 %v7477_v35, 16  ;;  %v3384_v55 = vsel %vm3376_vm7, %v3351_v25, %v7278_v57 }
 0x282   : > { %v7485_v21 = vpop.permute.xlu0 %3238  ;;  %3256 = vrot.lane.b32.xlu0 %v7483_v6, %s5558_s22  ;;  %v3071_v29 = vrot.slane %v7483_v6, 1  ;;  %v3072_v23 = vrot.slane %v7491_v20, 1  ;;  %v3154_v40 = vshll.u32 %v7494_v33, 16  ;;  %v3417_v39 = vsel %vm3409_vm8, %v3384_v55, %v7380_v10  ;;  %v5482_v0 = vld [vmem:[#allocation2 + $0x48] sm:$0xff]  }
 0x283   : > { %v7489_v16 = vpop.permute.xlu1 %3207  ;;  %v3151_v53 = vrot.slane %v3149_v50, 1  ;;  %v2968_v50 = vsel %vm2800_vm0, %v2963_v48, %v2967_v2  ;;  %v3321_v10 = vsel %vm1600_vm6, %v5481_v42, %v7400_v31  ;;  %v3325_v1 = vsel %vm1600_vm6, %v5482_v0, %v7407_v44  ;;  %v7629_v42 = vld [vmem:[#allocation2 + $0xd4] ss:$0 sps:$4 sm:$0x11]  }
 0x284   : > { %v7518_v52 = vsel %vm545_vm1, %v3071_v29, %v3072_v23  ;;  %v3156_v22 = vrot.slane %v3154_v40, 1  ;;  %v3450_v29 = vsel %vm3442_vm9, %v3417_v39, %v7315_v19  ;;  %v3353_v19 = vsel %vm1732_vm10, %v3321_v10, %v7332_v18 }
 0x285   : > { %3295 = vrot.lane.b32.xlu1 %v2944_v37, %s5561_s17  ;;  %v3152_v60 = vor.u32 %v3151_v53, %v3147_v28  ;;  %v3357_v44 = vsel %vm1732_vm10, %v3325_v1, %v7334_v47  ;;  %v3068_v55 = vrot.slane %v7341_v5, 1  ;;  %v2982_v2 = vshrl.u32 %v7483_v6, 16 }
 0x286   : > { %v3237_v24 = vpop.permute.xlu0 %3236  ;;  %3021 = vrot.lane.b32.xlu0 %v7403_v58, %s5552_s16  ;;  %v2989_v47 = vshll.u32 %v7491_v20, 16  ;;  %v3268_v10 = vshll.u32 %v7562_v59, 16 }
 0x287   : > { %v7500_v30 = vpop.permute.xlu1 %3090  ;;  %v3157_v51 = vsel %vm2800_vm0, %v3152_v60, %v3156_v22  ;;  %v3483_v23 = vsel %vm3475_vm11, %v3450_v29, %v3237_v24 }
 0x288   : > { %v2991_v20 = vrot.slane %v2989_v47, 1  ;;  %v8547_v47 = vld [vmem:[#allocation11_spill] sm:$0xff] }
 0x289   : > { %3178 = vrot.lane.b32.xlu1 %v2944_v37, %s5562_s28 }
 0x28a   : > { %v3120_v56 = vpop.permute.xlu0 %3119  ;;  %3139 = vrot.lane.b32.xlu0 %v7483_v6, %s5559_s14 }
 0x28b   : > { %v7511_v58 = vpop.permute.xlu1 %3205 }
 0x28d   : > { %3015 = vrot.lane.b32.xlu1 %v2944_v37, %s5552_s16 }
 0x28e   : > { %v3202_v14 = vpop.permute.xlu0 %3201  ;;  %3221 = vrot.lane.b32.xlu0 %v7518_v52, %s5560_s21 }
 0x28f   : > { %v7525_v26 = vpop.permute.xlu1 %3088 }
 0x291   : > { %3098 = vrot.lane.b32.xlu1 %v7475_v17, %s5556_s29 }
 0x292   : > { %v3004_v63 = vpop.permute.xlu0 %3003  ;;  %3305 = vrot.lane.b32.xlu0 %v3157_v51, %s5561_s17 }
 0x293   : > { %v3323_v9 = vsel %vm1600_vm6, %v5480_v8, %v3004_v63  ;;  %v3290_v57 = vpop.permute.xlu1 %3289 }
 0x294   : > { %v3355_v37 = vsel %vm1732_vm10, %v3323_v9, %v7355_v3  ;;  %v8535_v9 = vld [vmem:[#allocation8_spill] sm:$0xff] }
 0x295   : > { %3299 = vrot.lane.b32.xlu1 %v2968_v50, %s5561_s17  ;;  %v3388_v28 = vsel %vm3376_vm7, %v3355_v37, %v7415_v34  ;;  %v3386_v34 = vsel %vm3376_vm7, %v3353_v19, %v3120_v56  ;;  %v8536_v37 = vld [vmem:[#allocation13_spill] sm:$0xff]  ;;  %v3273_v19 = vshll.u32 %v7629_v42, 16 }
 0x296   : > { %v3284_v53 = vpop.permute.xlu0 %3283  ;;  %3104 = vrot.lane.b32.xlu0 %v7518_v52, %s5556_s29  ;;  %v3421_v31 = vsel %vm3409_vm8, %v3388_v28, %v7369_v36 }
 0x297   : > { %v7547_v3 = vpop.permute.xlu1 %3172  ;;  %v3519_v40 = vsel %vm3508_vm13, %v3483_v23, %v3284_v53  ;;  %v8538_v23 = vld [vmem:[#allocation17_spill] sm:$0xff]  ;;  %v3266_v53 = vshrl.u32 %v7562_v59, 16 }
 0x298   : > { %3741 = vmatmul.mubr.bf16.gmra.mrb[44].mxu0 %v3519_v40  ;;  %v3270_v40 = vrot.slane %v3268_v10, 1  ;;  %v8552_v10 = vld [vmem:[#allocation15_spill] sm:$0xff] }
 0x299   : > { %4553 = vmatprep.mubr.msk.bf16.mxu0 %vm1600_vm6, %v6966_v13  ;;  %3182 = vrot.lane.b32.xlu1 %v2968_v50, %s5562_s28  ;;  %v3454_v13 = vsel %vm3442_vm9, %v3421_v31, %v7329_v15  ;;  %v8539_v31 = vld [vmem:[#allocation16_spill] sm:$0xff] }
 0x29a   : > { %v3167_v24 = vpop.permute.xlu0 %3166  ;;  %3188 = vrot.lane.b32.xlu0 %v3157_v51, %s5562_s28  ;;  %v3487_v15 = vsel %vm3475_vm11, %v3454_v13, %v7458_v7  ;;  %v3069_v51 = vrot.slane %v7352_v41, 1  ;;  %v3275_v13 = vrot.slane %v3273_v19, 1  ;;  %v8554_v19 = vld [vmem:[#allocation14_spill] sm:$0xff] }
 0x29b   : > { %v3419_v54 = vsel %vm3409_vm8, %v3386_v34, %v3167_v24  ;;  %v7560_v46 = vpop.permute.xlu1 %3009  ;;  %v3190_v24 = vrot.slane %v7477_v35, 1 }
 0x29c   : > { %v3452_v18 = vsel %vm3442_vm9, %v3419_v54, %v3202_v14  ;;  %v2984_v14 = vshll.u32 %v7483_v6, 16  ;;  %v7604_v63 = vsel %vm545_vm1, %v3068_v55, %v3069_v51  ;;  %v3191_v54 = vrot.slane %v7494_v33, 1  ;;  %v8545_v51 = vld [vmem:[#allocation6_spill] sm:$0xff] }
 0x29d   : > { %3254 = vrot.lane.b32.xlu1 %v7341_v5, %s5558_s22  ;;  %v3485_v36 = vsel %vm3475_vm11, %v3452_v18, %v7485_v21  ;;  %v3390_v21 = vsel %vm3376_vm7, %v3357_v44, %v7472_v45  ;;  %v3271_v18 = vor.u32 %v3270_v40, %v3266_v53  ;;  %v8543_v44 = vld [vmem:[#allocation7_spill] sm:$0xff]  ;;  %v8553_v53 = vld [vmem:[#allocation36_spill] sm:$0xff] }
 0x29e   : > { %v3286_v56 = vpop.permute.xlu0 %3285  ;;  %3260 = vrot.lane.b32.xlu0 %v7562_v59, %s5558_s22  ;;  %v2986_v39 = vrot.slane %v2984_v14, 1  ;;  %v7650_v0 = vsel %vm545_vm1, %v3190_v24, %v3191_v54 }
 0x29f   : > { %v3288_v25 = vpop.permute.xlu1 %3287  ;;  %v3522_v60 = vsel %vm3508_vm13, %v3485_v36, %v3286_v56  ;;  %v8540_v36 = vld [vmem:[#allocation21_spill] sm:$0xff]  ;;  %v3276_v1 = vsel %vm2800_vm0, %v3271_v18, %v3275_v13  ;;  %v8556_v18 = vld [vmem:[#allocation19_spill] sm:$0xff] }
 0x2a0   : > { %3749 = vmatmul.mubr.bf16.gmra.mrb[48].mxu0 %v3522_v60  ;;  %v3525_v22 = vsel %vm3508_vm13, %v3487_v15, %v3288_v25  ;;  %v2987_v8 = vor.u32 %v2986_v39, %v2982_v2  ;;  %v8541_v25 = vld [vmem:[#allocation20_spill] sm:$0xff]  ;;  %v8542_v15 = vld [vmem:[#allocation25_spill] sm:$0xff] }
 0x2a1   : > { %3757 = vmatmul.mubr.bf16.vlgmr.msra.gmra.mrb[0].mxu1 %v3525_v22  ;;  %3019 = vrot.lane.b32.xlu1 %v2968_v50, %s5552_s16  ;;  %v8537_v50 = vld [vmem:[#allocation12_spill] sm:$0xff] }
 0x2a2   : > { %4555 = vmatprep.mubr.msk.bf16.mxu1 %vm1600_vm6, %v7101_v49  ;;  %4177 = vrot.lane.b32.xlu0 %v6728_v11, %s5561_s17 }
 0x2a3   : > { %v3171_v7 = vpop.permute.xlu1 %3170 }
 0x2a4   : > { %v3423_v48 = vsel %vm3409_vm8, %v3390_v21, %v3171_v7  ;;  %v8544_v21 = vld [vmem:[#allocation24_spill] sm:$0xff] }
 0x2a5   : > { %v3456_v49 = vsel %vm3442_vm9, %v3423_v48, %v7511_v58  ;;  %3137 = vrot.lane.b32.xlu1 %v7341_v5, %s5559_s14 }
 0x2a6   : > { %v3489_v11 = vsel %vm3475_vm11, %v3456_v49, %v7417_v62  ;;  %4181 = vrot.lane.b32.xlu0 %v6724_v38, %s5561_s17  ;;  %v8534_v62 = vld [vmem:[#allocation9_spill] sm:$0xff]  ;;  %v2992_v38 = vsel %vm2800_vm0, %v2987_v8, %v2991_v20 }
 0x2a7   : > { %v3008_v41 = vpop.permute.xlu1 %3007  ;;  %v3528_v45 = vsel %vm3508_vm13, %v3489_v11, %v3290_v57  ;;  %v5484_v11 = vld [vmem:[#allocation2 + $0x60] sm:$0xff]  }
 0x2a9   : > { %3765 = vmatmul.mubr.bf16.gmra.mrb[4].mxu1 %v3528_v45  ;;  %3219 = vrot.lane.b32.xlu1 %v7604_v63, %s5560_s21  ;;  %v8548_v45 = vld [vmem:[#allocation31_spill] sm:$0xff] }
 0x2aa   : > { %4556 = vmatprep.mubr.msk.bf16.mxu1 %vm1600_vm6, %v7300_v43  ;;  %4185 = vrot.lane.b32.xlu0 %v8534_v62, %s5561_s17  ;;  %v8549_v62 = vld [vmem:[#allocation10_spill] sm:$0xff] }
 0x2ab   : > { %v7612_v58 = vpop.permute.xlu1 %3246 }
 0x2ad   : > { %3303 = vrot.lane.b32.xlu1 %v2992_v38, %s5561_s17 }
 0x2ae   : > { %4189 = vrot.lane.b32.xlu0 %v8535_v9, %s5561_s17  ;;  %v8551_v9 = vld [vmem:[#allocation37_spill] sm:$0xff] }
 0x2af   : > { %v7618_v57 = vpop.permute.xlu1 %3129 }
 0x2b1   : > { %3102 = vrot.lane.b32.xlu1 %v7604_v63, %s5556_s29  ;;  %s323_s29 = sand.u32 1, %s5539_s10  }
 0x2b2   : > { %4193 = vrot.lane.b32.xlu0 %v8536_v37, %s5561_s17 }
 0x2b3   : > { %v3245_v43 = vpop.permute.xlu1 %3244 }
 0x2b5   : > { %3186 = vrot.lane.b32.xlu1 %v2992_v38, %s5562_s28  ;;  %s8369_s28 = scalar_lea.sflag [#allocation4], %s323_s29 }
 0x2b6   : > { %4197 = vrot.lane.b32.xlu0 %v8537_v50, %s5561_s17 }
 0x2b7   : > { %v3128_v29 = vpop.permute.xlu1 %3127  ;;  %v7671_v48 = vpop.permute.xlu0 %3213 }
 0x2b9   : > { %3258 = vrot.lane.b32.xlu1 %v7477_v35, %s5558_s22  ;;  %s8227_s22 = sshll.u32 %s323_s29, 8 }
 0x2ba   : > { %4201 = vrot.lane.b32.xlu0 %v8538_v23, %s5561_s17 }
 0x2bb   : > { %v7634_v28 = vpop.permute.xlu1 %3211  ;;  %v3097_v8 = vpop.permute.xlu0 %3096 }
 0x2bd   : > { %3023 = vrot.lane.b32.xlu1 %v2992_v38, %s5552_s16  ;;  %v8550_v38 = vld [vmem:[#allocation33_spill] sm:$0xff]  ;;  %s5489_s16 = sshll.u32 %s5566_s24, 4  ;;  %s5490_s16 = int_to_ptr.vmem [resolvable:$false] %s5489_s16 }
 0x2be   : > { %4205 = vrot.lane.b32.xlu0 %v8539_v31, %s5561_s17  ;;  %v8555_v31 = vld [vmem:[#allocation30_spill] sm:$0xff] }
 0x2bf   : > { %v7641_v34 = vpop.permute.xlu1 %3094  ;;  %v3298_v23 = vpop.permute.xlu0 %3297 }
 0x2c1   : > { %3141 = vrot.lane.b32.xlu1 %v7477_v35, %s5559_s14  ;;  %v5483_v35 = vld [vmem:[#allocation2 + $0x54] sm:$0xff]   ;;  %s8272_s14 = scalar_lea.vmem [#allocation3], %s8227_s22  ;;  %s5491_s22 = scalar_lea.vmem %s5490_s16, 8192 }
 0x2c2   : > { %4209 = vrot.lane.b32.xlu0 %v8540_v36, %s5561_s17  ;;  %v3327_v60 = vsel %vm1600_vm6, %v5483_v35, %v3008_v41  ;;  %v8557_v36 = vld [vmem:[#allocation18_spill] sm:$0xff] }
 0x2c3   : > { %v3210_v56 = vpop.permute.xlu1 %3209  ;;  %v3359_v14 = vsel %vm1732_vm10, %v3327_v60, %v7525_v26  ;;  %v8546_v26 = vld [vmem:[#allocation32_spill] sm:$0xff]  ;;  %v3181_v54 = vpop.permute.xlu0 %3180  ;;  %v8559_v60 = vld [vmem:[#allocation23_spill] sm:$0xff] }
 0x2c4   : > { %v3392_v55 = vsel %vm3376_vm7, %v3359_v14, %v7433_v32  ;;  %v3329_v32 = vsel %vm1600_vm6, %v5484_v11, %v7560_v46 }
 0x2c5   : > { %3223 = vrot.lane.b32.xlu1 %v7650_v0, %s5560_s21  ;;  %v3425_v2 = vsel %vm3409_vm8, %v3392_v55, %v7547_v3  ;;  %s4606_s21 = sshll.u32 %s5639_s13, 12  ;;  %s4383_s13 = sshll.u32 %s8272_s14, 4  ;;  %s8349_s13 = int_to_ptr.vmem [resolvable:$true] %s4383_s13 }
 0x2c6   : > { %4213 = vrot.lane.b32.xlu0 %v8541_v25, %s5561_s17  ;;  %v3458_v49 = vsel %vm3442_vm9, %v3425_v2, %v7489_v16  ;;  %v3361_v16 = vsel %vm1732_vm10, %v3329_v32, %v7500_v30  ;;  %v8561_v2 = vld [vmem:[#allocation27_spill] sm:$0xff]  ;;  %v8563_v32 = vld [vmem:[#allocation26_spill] sm:$0xff]  ;;  %s8335_s26 = scalar_lea.hbm %s8420_s9, %s4606_s21  ;;  %s5485_s23 = scalar_lea.vmem %s8349_s13, 4096 }
 0x2c7   : > { %v3093_v33 = vpop.permute.xlu1 %3092  ;;  %v3491_v41 = vsel %vm3475_vm11, %v3458_v49, %v3245_v43  ;;  %v3394_v46 = vsel %vm3376_vm7, %v3361_v16, %v3128_v29  ;;  %p5486_p11 = scmp.ne.s32.totalorder %s8349_s13, %s5485_s23  ;;  %p5492_p0 = scmp.lt.s32.totalorder %s8349_s13, %s5490_s16 }
 0x2c8   : > { %p5493_p1 = scmp.lt.s32.totalorder %s5491_s22, %s5485_s23 }
 0x2c9   : > { %3307 = vrot.lane.b32.xlu1 %v3276_v1, %s5561_s17  ;;  %p5487_p12 = pnand %p5486_p11, %p5656_p5 }
 0x2ca   : > { %4217 = vrot.lane.b32.xlu0 %v8542_v15, %s5561_s17  ;;  %p5494_p2 = por %p5493_p1, %p5492_p0 }
 0x2cb   : > { %v3294_v22 = vpop.permute.xlu1 %3293  ;;  %p5488_p13 = pneg %p5487_p12 }
 0x2cd   : > { %4179 = vrot.lane.b32.xlu1 %v8543_v44, %s5561_s17  ;;  %v8560_v44 = vld [vmem:[#allocation22_spill] sm:$0xff]  ;;  %p5495_p3 = pnand %p5494_p2, %p5488_p13 }
 0x2ce   : > { %4221 = vrot.lane.b32.xlu0 %v8544_v21, %s5561_s17 }
 0x2cf   : > { %v3177_v7 = vpop.permute.xlu1 %3176 }
 0x2d1   : > { %4183 = vrot.lane.b32.xlu1 %v8545_v51, %s5561_s17 }
 0x2d2   : > { %4225 = vrot.lane.b32.xlu0 %v8546_v26, %s5561_s17  ;;  %v8562_v26 = vld [vmem:[#allocation28_spill] sm:$0xff] }
 0x2d3   : > { %v3014_v39 = vpop.permute.xlu1 %3013 }
 0x2d5   : > { %4187 = vrot.lane.b32.xlu1 %v8547_v47, %s5561_s17  ;;  %v3333_v47 = vsel %vm1600_vm6, %v8562_v26, %v3014_v39 }
 0x2d6   : > { %4229 = vrot.lane.b32.xlu0 %v8548_v45, %s5561_s17 }
 0x2d7   : > { %v3292_v3 = vpop.permute.xlu1 %3291 }
 0x2d8   : > { %v3531_v20 = vsel %vm3508_vm13, %v3491_v41, %v3292_v3  ;;  %v3365_v41 = vsel %vm1732_vm10, %v3333_v47, %v7641_v34 }
 0x2d9   : > { %3773 = vmatmul.mubr.bf16.gmra.mrb[8].mxu1 %v3531_v20  ;;  %4191 = vrot.lane.b32.xlu1 %v8549_v62, %s5561_s17  ;;  %v8564_v20 = vld [vmem:[#allocation35_spill] sm:$0xff] }
 0x2da   : > { %4557 = vmatprep.mubr.msk.bf16.mxu1 %vm1600_vm6, %v8550_v38  ;;  %4233 = vrot.lane.b32.xlu0 %v8551_v9, %s5561_s17  ;;  %v8565_v9 = vld [vmem:[#allocation34_spill] sm:$0xff] }
 0x2db   : > { %v3175_v37 = vpop.permute.xlu1 %3174 }
 0x2dc   : > { %v3427_v43 = vsel %vm3409_vm8, %v3394_v46, %v3175_v37 }
 0x2dd   : > { %v3460_v50 = vsel %vm3442_vm9, %v3427_v43, %v3210_v56  ;;  %4195 = vrot.lane.b32.xlu1 %v8552_v10, %s5561_s17  ;;  %v8558_v56 = vld [vmem:[#allocation29_spill] sm:$0xff]  ;;  %v8566_v10 = vld [vmem:[#allocation39_spill] sm:$0xff] }
 0x2de   : > { %v3493_v30 = vsel %vm3475_vm11, %v3460_v50, %v7612_v58  ;;  %4237 = vrot.lane.b32.xlu0 %v8553_v53, %s5561_s17  ;;  %v3253_v58 = vpop.permute.xlu0 %3252 }
 0x2df   : > { %v3012_v40 = vpop.permute.xlu1 %3011  ;;  %v3534_v29 = vsel %vm3508_vm13, %v3493_v30, %v3294_v22 }
 0x2e0   : > { %v3331_v1 = vsel %vm1600_vm6, %v8558_v56, %v3012_v40 }
 0x2e1   : > { %3781 = vmatmul.mubr.bf16.gmra.mrb[12].mxu1 %v3534_v29  ;;  %4199 = vrot.lane.b32.xlu1 %v8554_v19, %s5561_s17  ;;  %v3363_v35 = vsel %vm1732_vm10, %v3331_v1, %v3093_v33 }
 0x2e2   : > { %4558 = vmatprep.mubr.msk.bf16.mxu1 %vm1600_vm6, %v8555_v31  ;;  %v3018_v15 = vpop.permute.xlu0 %3017  ;;  %v3396_v14 = vsel %vm3376_vm7, %v3363_v35, %v7618_v57 }
 0x2e3   : > { %v3251_v24 = vpop.permute.xlu1 %3250  ;;  %v3429_v21 = vsel %vm3409_vm8, %v3396_v14, %v3177_v7 }
 0x2e4   : > { %v3462_v33 = vsel %vm3442_vm9, %v3429_v21, %v7634_v28 }
 0x2e5   : > { %4203 = vrot.lane.b32.xlu1 %v8556_v18, %s5561_s17 }
 0x2e6   : > { %v3136_v51 = vpop.permute.xlu0 %3135 }
 0x2e7   : > { %v3134_v13 = vpop.permute.xlu1 %3133 }
 0x2e9   : > { %4207 = vrot.lane.b32.xlu1 %v8557_v36, %s5561_s17 }
 0x2ea   : > { %v3218_v7 = vpop.permute.xlu0 %3217 }
 0x2eb   : > { %v3249_v25 = vpop.permute.xlu1 %3248 }
 0x2ec   : > { %v3495_v49 = vsel %vm3475_vm11, %v3462_v33, %v3249_v25 }
 0x2ed   : > { %4211 = vrot.lane.b32.xlu1 %v8559_v60, %s5561_s17 }
 0x2ee   : > { %v3302_v34 = vpop.permute.xlu0 %3301 }
 0x2ef   : > { %v3132_v22 = vpop.permute.xlu1 %3131 }
 0x2f0   : > { %v3398_v28 = vsel %vm3376_vm7, %v3365_v41, %v3132_v22  ;;  %v3309_v41 = vrot.slane %v7562_v59, 1 }
 0x2f1   : > { %4215 = vrot.lane.b32.xlu1 %v8560_v44, %s5561_s17 }
 0x2f3   : > { %v3216_v55 = vpop.permute.xlu1 %3215 }
 0x2f5   : > { %4219 = vrot.lane.b32.xlu1 %v8561_v2, %s5561_s17 }
 0x2f7   : > { %v3296_v11 = vpop.permute.xlu1 %3295 }
 0x2f8   : > { %v3537_v57 = vsel %vm3508_vm13, %v3495_v49, %v3296_v11 }
 0x2f9   : > { %3789 = vmatmul.mubr.bf16.gmra.mrb[16].mxu1 %v3537_v57  ;;  %4223 = vrot.lane.b32.xlu1 %v8563_v32, %s5561_s17 }
 0x2fa   : > { %4559 = vmatprep.mubr.msk.bf16.mxu1 %vm1600_vm6, %v7475_v17 }
 0x2fb   : > { %v3179_v45 = vpop.permute.xlu1 %3178 }
 0x2fc   : > { %v3431_v39 = vsel %vm3409_vm8, %v3398_v28, %v3179_v45  ;;  %v3310_v28 = vrot.slane %v7629_v42, 1 }
 0x2fd   : > { %v3464_v3 = vsel %vm3442_vm9, %v3431_v39, %v7671_v48  ;;  %4227 = vrot.lane.b32.xlu1 %v8564_v20, %s5561_s17 }
 0x2fe   : > { %v3497_v62 = vsel %vm3475_vm11, %v3464_v3, %v3251_v24 }
 0x2ff   : > { %v3016_v16 = vpop.permute.xlu1 %3015  ;;  %v3540_v38 = vsel %vm3508_vm13, %v3497_v62, %v3298_v23 }
 0x300   : > { %v3335_v17 = vsel %vm1600_vm6, %v7228_v61, %v3016_v16  ;;  %v3101_v61 = vpop.permute.xlu0 %3100 }
 0x301   : > { %v3367_v46 = vsel %vm1732_vm10, %v3335_v17, %v3097_v8  ;;  %3797 = vmatmul.mubr.bf16.gmra.mrb[20].mxu1 %v3540_v38  ;;  %4231 = vrot.lane.b32.xlu1 %v8565_v9, %s5561_s17  ;;  %v3337_v8 = vsel %vm1600_vm6, %v7224_v27, %v3018_v15 }
 0x302   : > { %v3400_v48 = vsel %vm3376_vm7, %v3367_v46, %v3134_v13  ;;  %4560 = vmatprep.mubr.msk.bf16.mxu1 %vm1600_vm6, %v7383_v12  ;;  %v8567_v12 = vld [vmem:[#allocation38_spill] sm:$0xff] }
 0x303   : > { %v3099_v37 = vpop.permute.xlu1 %3098  ;;  %v3433_v43 = vsel %vm3409_vm8, %v3400_v48, %v3181_v54 }
 0x304   : > { %v3466_v50 = vsel %vm3442_vm9, %v3433_v43, %v3216_v55  ;;  %v3369_v53 = vsel %vm1732_vm10, %v3337_v8, %v3099_v37  ;;  %v3185_v31 = vpop.permute.xlu0 %3184 }
 0x305   : > { %4235 = vrot.lane.b32.xlu1 %v8566_v10, %s5561_s17  ;;  %v3499_v30 = vsel %vm3475_vm11, %v3466_v50, %v3253_v58  ;;  %v3402_v29 = vsel %vm3376_vm7, %v3369_v53, %v3136_v51 }
 0x307   : > { %v3300_v23 = vpop.permute.xlu1 %3299 }
 0x308   : > { %v3543_v40 = vsel %vm3508_vm13, %v3499_v30, %v3300_v23  ;;  %v3257_v18 = vpop.permute.xlu0 %3256 }
 0x309   : > { %3805 = vmatmul.mubr.bf16.gmra.mrb[24].mxu1 %v3543_v40  ;;  %4239 = vrot.lane.b32.xlu1 %v8567_v12, %s5561_s17 }
 0x30a   : > { %4561 = vmatprep.mubr.msk.bf16.mxu1 %vm1600_vm6, %v7604_v63 }
 0x30b   : > { %v3183_v19 = vpop.permute.xlu1 %3182 }
 0x30c   : > { %v3435_v27 = vsel %vm3409_vm8, %v3402_v29, %v3183_v19  ;;  %v3022_v1 = vpop.permute.xlu0 %3021 }
 0x30d   : > { %v3468_v24 = vsel %vm3442_vm9, %v3435_v27, %v3218_v7  ;;  %v3341_v26 = vsel %vm1600_vm6, %v7341_v5, %v3022_v1  ;;  %v3311_v5 = vsel %vm545_vm1, %v3309_v41, %v3310_v28  ;;  %vm5564_vm1 = vmmov 0  }
 0x30f   : > { %v3255_v54 = vpop.permute.xlu1 %3254 }
 0x310   : > { %v3501_v13 = vsel %vm3475_vm11, %v3468_v24, %v3255_v54  ;;  %v3140_v55 = vpop.permute.xlu0 %3139 }
 0x311   : > { %v3546_v58 = vsel %vm3508_vm13, %v3501_v13, %v3302_v34 }
 0x312   : > { %3813 = vmatmul.mubr.bf16.gmra.mrb[28].mxu1 %v3546_v58 }
 0x313   : > { %v3020_v36 = vpop.permute.xlu1 %3019  ;;  %4562 = vmatprep.mubr.msk.bf16.mxu1 %vm1600_vm6, %v7518_v52 }
 0x314   : > { %v3339_v63 = vsel %vm1600_vm6, %v7343_v4, %v3020_v36  ;;  %v3222_v33 = vpop.permute.xlu0 %3221 }
 0x315   : > { %v3371_v35 = vsel %vm1732_vm10, %v3339_v63, %v3101_v61 }
 0x316   : > { %v7775_v56 = vpop.f32.mrb[32].mxu0 }
 0x317   : > { %v3720_v25 = vpop.f32.mrb[33].mxu0  ;;  %v3138_v60 = vpop.permute.xlu1 %3137 }
 0x318   : > { %v7778_v15 = vpop.f32.mrb[34].mxu0  ;;  %v3404_v22 = vsel %vm3376_vm7, %v3371_v35, %v3138_v60  ;;  %v3306_v32 = vpop.permute.xlu0 %3305  ;;  %v3947_v25 = vld [vmem:[%s8416_s5] sm:$0xff]  ;;  %v3948_v35 = vld [vmem:[%s8416_s5 + $0x8] sm:$0xff] }
 0x319   : > { %v3723_v14 = vpop.f32.mrb[35].mxu0  ;;  %v3437_v44 = vsel %vm3409_vm8, %v3404_v22, %v3185_v31  ;;  %v5563_v22 = vmov 0.0|0.0  }
 0x31a   : > { %4681 = vmatprep.subr.bf16.mxu0 %v5563_v22  ;;  %v4682_v14 = vpack.c.bf16 %v3948_v35, %v3947_v25 }
 0x31b   : > { %v3220_v21 = vpop.permute.xlu1 %3219 }
 0x31c   : > { %v3470_v52 = vsel %vm3442_vm9, %v3437_v44, %v3220_v21  ;;  %v3105_v20 = vpop.permute.xlu0 %3104  ;;  %4683 = vmatpush3.bf16.msra.mxu0 %v4682_v14 }
 0x31d   : > { %v3503_v4 = vsel %vm3475_vm11, %v3470_v52, %v3257_v18 }
 0x31f   : > { %v3304_v51 = vpop.permute.xlu1 %3303 }
 0x320   : > { %v3549_v2 = vsel %vm3508_vm13, %v3503_v4, %v3304_v51  ;;  %v3189_v38 = vpop.permute.xlu0 %3188 }
 0x321   : > { %3821 = vmatmul.mubr.bf16.gmra.mrb[32].mxu1 %v3549_v2 }
 0x322   : > { %4563 = vmatprep.mubr.msk.bf16.mxu1 %vm1600_vm6, %v7650_v0 }
 0x323   : > { %v3103_v47 = vpop.permute.xlu1 %3102 }
 0x324   : > { %v3373_v49 = vsel %vm1732_vm10, %v3341_v26, %v3103_v47  ;;  %v3261_v48 = vpop.permute.xlu0 %3260 }
 0x325   : > { %v3406_v11 = vsel %vm3376_vm7, %v3373_v49, %v3140_v55  ;;  %v5565_v55 = vmov 0.0  }
 0x326   : > { %4673 = vmatprep.mubr.msk.f32.mxu0 %vm5564_vm1, %v5565_v55  ;;  %4676 = vmatprep.subr.mxu0 %v5565_v55 }
 0x327   : > { %v3187_v57 = vpop.permute.xlu1 %3186 }
 0x328   : > { %v3439_v7 = vsel %vm3409_vm8, %v3406_v11, %v3187_v57 }
 0x329   : > { %v3472_v45 = vsel %vm3442_vm9, %v3439_v7, %v3222_v33  ;;  %v7831_v33 = vld [vmem:[%s8415_s4] ss:$0 sm:$0xff] }
 0x32a   : > { %v7835_v26 = vadd.f32 %v7831_v33, %v7778_v15  ;;  %v7839_v47 = vadd.f32 %v7831_v33, %v7775_v56 }
 0x32b   : > { %v3259_v39 = vpop.permute.xlu1 %3258 }
 0x32c   : > { %v3505_v0 = vsel %vm3475_vm11, %v3472_v45, %v3259_v39  ;;  %v8487_v57 = vmax.f32 %v7835_v26, 0.0  ;;  %v8488_v41 = vmax.f32 %v7839_v47, 0.0 }
 0x32d   : > { %v3552_v3 = vsel %vm3508_vm13, %v3505_v0, %v3306_v32 }
 0x32e   : > { %3829 = vmatmul.mubr.bf16.gmra.mrb[36].mxu1 %v3552_v3  ;;  %v3878_v56 = vsel %vm1600_vm6, %v8487_v57, 0.0  ;;  %v3877_v0 = vsel %vm1600_vm6, %v8488_v41, 0.0 }
 0x32f   : > { %v3024_v62 = vpop.permute.xlu1 %3023  ;;  %4564 = vmatprep.mubr.msk.bf16.mxu1 %vm1600_vm6, %v3311_v5 }
 0x330   : > { %v3343_v16 = vsel %vm1600_vm6, %v7483_v6, %v3024_v62 }
 0x331   : > { %v3375_v59 = vsel %vm1732_vm10, %v3343_v16, %v3105_v20  ;;  %v3879_v20 = vadd.f32 %v3878_v56, %v3877_v0  ;;  %vm8568_vm10 = vcmask 1041408  }
 0x333   : > { %v3142_v42 = vpop.permute.xlu1 %3141 }
 0x334   : > { %v3408_v34 = vsel %vm3376_vm7, %v3375_v59, %v3142_v42 }
 0x335   : > { %v3441_v17 = vsel %vm3409_vm8, %v3408_v34, %v3189_v38 }
 0x337   : > { %v3224_v46 = vpop.permute.xlu1 %3223 }
 0x338   : > { %v3474_v9 = vsel %vm3442_vm9, %v3441_v17, %v3224_v46 }
 0x339   : > { %v3507_v43 = vsel %vm3475_vm11, %v3474_v9, %v3261_v48 }
 0x33b   : > { %v3308_v37 = vpop.permute.xlu1 %3307 }
 0x33c   : > { %v3555_v50 = vsel %vm3508_vm13, %v3507_v43, %v3308_v37 }
 0x33d   : > { %3837 = vmatmul.mubr.bf16.gmra.mrb[40].mxu1 %v3555_v50 }
 0x34b   : > { %v3726_v10 = vpop.f32.mrb[36].mxu0 }
 0x34c   : > { %v3728_v6 = vpop.f32.mrb[37].mxu0  ;;  %v7842_v49 = vadd.f32 %v7831_v33, %v3726_v10 }
 0x34d   : > { %v3729_v61 = vpop.f32.mrb[38].mxu0 }
 0x34e   : > { %v3731_v8 = vpop.f32.mrb[39].mxu0  ;;  %v8486_v28 = vmax.f32 %v7842_v49, 0.0  ;;  %v7852_v15 = vadd.f32 %v7831_v33, %v3729_v61 }
 0x350   : > { %v3880_v5 = vsel %vm1600_vm6, %v8486_v28, 0.0  ;;  %v8485_v3 = vmax.f32 %v7852_v15, 0.0  ;;  %v4109_v28 = vlaneseq }
 0x351   : > { %v3881_v59 = vadd.f32 %v3880_v5, %v3879_v20 }
 0x352   : > { %v3882_v42 = vsel %vm1600_vm6, %v8485_v3, 0.0 }
 0x353   : > { %v3734_v23 = vpop.f32.mrb[40].mxu0  ;;  %v3883_v46 = vadd.f32 %v3882_v42, %v3881_v59 }
 0x354   : > { %v3736_v30 = vpop.f32.mrb[41].mxu0  ;;  %v7858_v39 = vadd.f32 %v7831_v33, %v3734_v23 }
 0x355   : > { %v3737_v53 = vpop.f32.mrb[42].mxu0 }
 0x356   : > { %v3739_v40 = vpop.f32.mrb[43].mxu0  ;;  %v8484_v62 = vmax.f32 %v7858_v39, 0.0  ;;  %v7869_v16 = vadd.f32 %v7831_v33, %v3737_v53 }
 0x358   : > { %v3884_v34 = vsel %vm1600_vm6, %v8484_v62, 0.0  ;;  %v8483_v17 = vmax.f32 %v7869_v16, 0.0 }
 0x359   : > { %v3885_v37 = vadd.f32 %v3884_v34, %v3883_v46 }
 0x35a   : > { %v3886_v43 = vsel %vm1600_vm6, %v8483_v17, 0.0 }
 0x35b   : > { %v3887_v61 = vadd.f32 %v3886_v43, %v3885_v37 }
 0x36b   : > { %v3742_v12 = vpop.f32.mrb[44].mxu0 }
 0x36c   : > { %v3744_v29 = vpop.f32.mrb[45].mxu0  ;;  %v7875_v38 = vadd.f32 %v7831_v33, %v3742_v12 }
 0x36d   : > { %v3745_v19 = vpop.f32.mrb[46].mxu0 }
 0x36e   : > { %v3747_v31 = vpop.f32.mrb[47].mxu0  ;;  %v8482_v9 = vmax.f32 %v7875_v38, 0.0  ;;  %v7883_v48 = vadd.f32 %v7831_v33, %v3745_v19 }
 0x370   : > { %v3888_v10 = vsel %vm1600_vm6, %v8482_v9, 0.0  ;;  %v8481_v6 = vmax.f32 %v7883_v48, 0.0 }
 0x371   : > { %v3889_v30 = vadd.f32 %v3888_v10, %v3887_v61 }
 0x372   : > { %v3890_v53 = vsel %vm1600_vm6, %v8481_v6, 0.0 }
 0x373   : > { %v3750_v27 = vpop.f32.mrb[48].mxu0  ;;  %v3891_v31 = vadd.f32 %v3890_v53, %v3889_v30 }
 0x374   : > { %v3752_v24 = vpop.f32.mrb[49].mxu0  ;;  %v7807_v54 = vpop.f32.mrb[0].mxu1  ;;  %v7889_v50 = vadd.f32 %v7831_v33, %v3750_v27 }
 0x375   : > { %v3753_v18 = vpop.f32.mrb[50].mxu0  ;;  %v3760_v13 = vpop.f32.mrb[1].mxu1  ;;  %v7908_v24 = vadd.f32 %v7831_v33, %v7807_v54 }
 0x376   : > { %v3755_v58 = vpop.f32.mrb[51].mxu0  ;;  %v7809_v36 = vpop.f32.mrb[2].mxu1  ;;  %v8480_v8 = vmax.f32 %v7889_v50, 0.0  ;;  %v7897_v23 = vadd.f32 %v7831_v33, %v3753_v18 }
 0x377   : > { %v3763_v63 = vpop.f32.mrb[3].mxu1  ;;  %v7916_v25 = vadd.f32 %v7831_v33, %v7809_v36 }
 0x378   : > { %v3892_v12 = vsel %vm1600_vm6, %v8480_v8, 0.0  ;;  %v8479_v29 = vmax.f32 %v7897_v23, 0.0  ;;  %v8478_v63 = vmax.f32 %v7908_v24, 0.0 }
 0x379   : > { %v3893_v13 = vadd.f32 %v3892_v12, %v3891_v31 }
 0x37a   : > { %v3894_v58 = vsel %vm1600_vm6, %v8479_v29, 0.0 }
 0x37b   : > { %v3895_v35 = vadd.f32 %v3894_v58, %v3893_v13 }
 0x37c   : > { %v7811_v1 = vpop.f32.mrb[4].mxu1 }
 0x37d   : > { %v3768_v60 = vpop.f32.mrb[5].mxu1  ;;  %v7920_v22 = vadd.f32 %v7831_v33, %v7811_v1 }
 0x37e   : > { %v7819_v44 = vpop.f32.mrb[6].mxu1 }
 0x37f   : > { %v3771_v21 = vpop.f32.mrb[7].mxu1  ;;  %v7929_v36 = vadd.f32 %v7831_v33, %v7819_v44 }
 0x380   : > { %v3896_v21 = vsel %vm1600_vm6, %v8478_v63, 0.0 }
 0x381   : > { %v8475_v59 = vmax.f32 %v7929_v36, 0.0 }
 0x3ac   : > { %v7824_v52 = vpop.f32.mrb[8].mxu1 }
 0x3ad   : > { %v3776_v51 = vpop.f32.mrb[9].mxu1  ;;  %v7936_v56 = vadd.f32 %v7831_v33, %v7824_v52  ;;  %v3902_v52 = vsel %vm1600_vm6, %v8475_v59, 0.0 }
 0x3ae   : > { %v7826_v4 = vpop.f32.mrb[10].mxu1  ;;  %v8477_v51 = vmax.f32 %v7916_v25, 0.0 }
 0x3af   : > { %v3779_v2 = vpop.f32.mrb[11].mxu1  ;;  %v8474_v44 = vmax.f32 %v7936_v56, 0.0  ;;  %v7945_v46 = vadd.f32 %v7831_v33, %v7826_v4 }
 0x3b0   : > { %v3898_v1 = vsel %vm1600_vm6, %v8477_v51, 0.0 }
 0x3b1   : > { %v3904_v61 = vsel %vm1600_vm6, %v8474_v44, 0.0  ;;  %v8471_v30 = vmax.f32 %v7945_v46, 0.0 }
 0x3b4   : > { %v7844_v11 = vpop.f32.mrb[12].mxu1 }
 0x3b5   : > { %v3784_v32 = vpop.f32.mrb[13].mxu1  ;;  %v7952_v10 = vadd.f32 %v7831_v33, %v7844_v11  ;;  %v3906_v11 = vsel %vm1600_vm6, %v8471_v30, 0.0 }
 0x3b6   : > { %v7847_v7 = vpop.f32.mrb[14].mxu1  ;;  %v3897_v32 = vadd.f32 %v3896_v21, %v3895_v35 }
 0x3b7   : > { %v3787_v45 = vpop.f32.mrb[15].mxu1  ;;  %v8470_v4 = vmax.f32 %v7952_v10, 0.0  ;;  %v7961_v12 = vadd.f32 %v7831_v33, %v7847_v7 }
 0x3b8   : > { %v8476_v45 = vmax.f32 %v7920_v22, 0.0  ;;  %v3899_v0 = vadd.f32 %v3898_v1, %v3897_v32 }
 0x3b9   : > { %v8468_v21 = vmax.f32 %v7961_v12, 0.0 }
 0x3ba   : > { %v3900_v20 = vsel %vm1600_vm6, %v8476_v45, 0.0 }
 0x3bb   : > { %v3901_v43 = vadd.f32 %v3900_v20, %v3899_v0 }
 0x3bd   : > { %v3903_v53 = vadd.f32 %v3902_v52, %v3901_v43 }
 0x3bf   : > { %v3905_v31 = vadd.f32 %v3904_v61, %v3903_v53 }
 0x3c1   : > { %v3907_v7 = vadd.f32 %v3906_v11, %v3905_v31 }
 0x3cc   : > { %v3790_v40 = vpop.f32.mrb[16].mxu1 }
 0x3cd   : > { %v3792_v19 = vpop.f32.mrb[17].mxu1  ;;  %v7967_v13 = vadd.f32 %v7831_v33, %v3790_v40  ;;  %v3910_v40 = vsel %vm1600_vm6, %v8468_v21, 0.0 }
 0x3ce   : > { %v3793_v27 = vpop.f32.mrb[18].mxu1 }
 0x3cf   : > { %v3795_v18 = vpop.f32.mrb[19].mxu1  ;;  %v7975_v32 = vadd.f32 %v7831_v33, %v3793_v27 }
 0x3d4   : > { %v3798_v60 = vpop.f32.mrb[20].mxu1 }
 0x3d5   : > { %v3800_v54 = vpop.f32.mrb[21].mxu1  ;;  %v7981_v0 = vadd.f32 %v7831_v33, %v3798_v60 }
 0x3d6   : > { %v3801_v14 = vpop.f32.mrb[22].mxu1  ;;  %v3908_v54 = vsel %vm1600_vm6, %v8470_v4, 0.0 }
 0x3d7   : > { %v3803_v2 = vpop.f32.mrb[23].mxu1  ;;  %v3909_v1 = vadd.f32 %v3908_v54, %v3907_v7  ;;  %v8459_v43 = vmax.f32 %v7981_v0, 0.0  ;;  %v7989_v27 = vadd.f32 %v7831_v33, %v3801_v14 }
 0x3d8   : > { %v8465_v2 = vmax.f32 %v7967_v13, 0.0 }
 0x3d9   : > { %v3916_v31 = vsel %vm1600_vm6, %v8459_v43, 0.0 }
 0x3da   : > { %v3912_v20 = vsel %vm1600_vm6, %v8465_v2, 0.0 }
 0x3dc   : > { %v3806_v5 = vpop.f32.mrb[24].mxu1 }
 0x3dd   : > { %v3808_v42 = vpop.f32.mrb[25].mxu1  ;;  %v7995_v60 = vadd.f32 %v7831_v33, %v3806_v5 }
 0x3de   : > { %v3809_v34 = vpop.f32.mrb[26].mxu1  ;;  %v8461_v42 = vmax.f32 %v7975_v32, 0.0 }
 0x3df   : > { %v3811_v37 = vpop.f32.mrb[27].mxu1  ;;  %v8457_v14 = vmax.f32 %v7995_v60, 0.0  ;;  %v8003_v7 = vadd.f32 %v7831_v33, %v3809_v34 }
 0x3e0   : > { %v3911_v37 = vadd.f32 %v3910_v40, %v3909_v1  ;;  %v3914_v61 = vsel %vm1600_vm6, %v8461_v42, 0.0 }
 0x3e2   : > { %v3913_v52 = vadd.f32 %v3912_v20, %v3911_v37  ;;  %v3920_v37 = vsel %vm1600_vm6, %v8457_v14, 0.0 }
 0x3e5   : > { %v3814_v19 = vpop.f32.mrb[28].mxu1 }
 0x3e6   : > { %v3816_v18 = vpop.f32.mrb[29].mxu1  ;;  %v8009_v20 = vadd.f32 %v7831_v33, %v3814_v19 }
 0x3e7   : > { %v3817_v58 = vpop.f32.mrb[30].mxu1  ;;  %v8458_v18 = vmax.f32 %v7989_v27, 0.0 }
 0x3e8   : > { %v3819_v35 = vpop.f32.mrb[31].mxu1  ;;  %v8017_v34 = vadd.f32 %v7831_v33, %v3817_v58 }
 0x3e9   : > { %v3915_v35 = vadd.f32 %v3914_v61, %v3913_v52  ;;  %v3918_v5 = vsel %vm1600_vm6, %v8458_v18, 0.0  ;;  %v8460_v52 = vmax.f32 %v8003_v7, 0.0 }
 0x3ea   : > { %v8464_v14 = vmax.f32 %v8017_v34, 0.0 }
 0x3eb   : > { %v3917_v40 = vadd.f32 %v3916_v31, %v3915_v35  ;;  %v3922_v35 = vsel %vm1600_vm6, %v8460_v52, 0.0 }
 0x3ed   : > { %v3919_v61 = vadd.f32 %v3918_v5, %v3917_v40 }
 0x3ef   : > { %v3921_v31 = vadd.f32 %v3920_v37, %v3919_v61 }
 0x3f1   : > { %v3923_v5 = vadd.f32 %v3922_v35, %v3921_v31 }
 0x3f4   : > { %v3822_v53 = vpop.f32.mrb[32].mxu1 }
 0x3f5   : > { %v3824_v11 = vpop.f32.mrb[33].mxu1  ;;  %v8023_v19 = vadd.f32 %v7831_v33, %v3822_v53  ;;  %v3926_v53 = vsel %vm1600_vm6, %v8464_v14, 0.0 }
 0x3f6   : > { %v3825_v54 = vpop.f32.mrb[34].mxu1  ;;  %v8462_v11 = vmax.f32 %v8009_v20, 0.0 }
 0x3f7   : > { %v3827_v1 = vpop.f32.mrb[35].mxu1  ;;  %v8463_v58 = vmax.f32 %v8023_v19, 0.0  ;;  %v8031_v37 = vadd.f32 %v7831_v33, %v3825_v54 }
 0x3f8   : > { %v3924_v1 = vsel %vm1600_vm6, %v8462_v11, 0.0 }
 0x3f9   : > { %v3925_v43 = vadd.f32 %v3924_v1, %v3923_v5  ;;  %v3928_v31 = vsel %vm1600_vm6, %v8463_v58, 0.0 }
 0x3fb   : > { %v3927_v35 = vadd.f32 %v3926_v53, %v3925_v43 }
 0x401   : > { %v3830_v40 = vpop.f32.mrb[36].mxu1 }
 0x402   : > { %v3832_v18 = vpop.f32.mrb[37].mxu1  ;;  %v8037_v42 = vadd.f32 %v7831_v33, %v3830_v40 }
 0x403   : > { %v3833_v61 = vpop.f32.mrb[38].mxu1  ;;  %v8466_v18 = vmax.f32 %v8031_v37, 0.0 }
 0x404   : > { %v3835_v52 = vpop.f32.mrb[39].mxu1  ;;  %v8467_v54 = vmax.f32 %v8037_v42, 0.0  ;;  %v8045_v11 = vadd.f32 %v7831_v33, %v3833_v61 }
 0x405   : > { %v3929_v52 = vadd.f32 %v3928_v31, %v3927_v35  ;;  %v3930_v1 = vsel %vm1600_vm6, %v8466_v18, 0.0 }
 0x406   : > { %v3932_v40 = vsel %vm1600_vm6, %v8467_v54, 0.0  ;;  %v8469_v5 = vmax.f32 %v8045_v11, 0.0 }
 0x407   : > { %v3931_v58 = vadd.f32 %v3930_v1, %v3929_v52 }
 0x408   : > { %v3934_v43 = vsel %vm1600_vm6, %v8469_v5, 0.0 }
 0x409   : > { %v3933_v14 = vadd.f32 %v3932_v40, %v3931_v58 }
 0x40b   : > { %v3935_v21 = vadd.f32 %v3934_v43, %v3933_v14  ;;  %v3949_v14 = vld [vmem:[%s8417_s6] sm:$0x1] }
 0x410   : > { %v3838_v2 = vpop.f32.mrb[40].mxu1 }
 0x411   : > { %v8058_v61 = vadd.f32 %v7831_v33, %v3838_v2  ;;  %v3840_v53 = vpop.f32.mrb[41].mxu1 }
 0x412   : > { %v3841_v31 = vpop.f32.mrb[42].mxu1 }
 0x413   : > { %v8473_v35 = vmax.f32 %v8058_v61, 0.0  ;;  %v8062_v18 = vadd.f32 %v7831_v33, %v3841_v31  ;;  %v3843_v54 = vpop.f32.mrb[43].mxu1 }
 0x415   : > { %v3936_v58 = vsel %vm1600_vm6, %v8473_v35, 0.0  ;;  %v8472_v52 = vmax.f32 %v8062_v18, 0.0  ;;  %v4025_v35 = vld [vmem:[%s8419_s8] sm:$0x1] }
 0x416   : > { %v3937_v1 = vadd.f32 %v3936_v58, %v3935_v21  ;;  %v4024_v21 = vld [vmem:[%s8418_s7] sm:$0x3]  ;;  %v8081_v58 = vpop.permute.xlu0 %4177 }
 0x417   : > { %v3938_v2 = vsel %vm1600_vm6, %v8472_v52, 0.0 }
 0x418   : > { %v3939_v40 = vadd.f32 %v3938_v2, %v3937_v1  ;;  %v8083_v1 = vpop.permute.xlu1 %4179 }
 0x41a   : > { %v3940_v53 = vrot.slane %v3939_v40, 4 }
 0x41c   : > { %v3941_v5 = vadd.f32 %v3940_v53, %v3939_v40  ;;  %v8087_v2 = vpop.permute.xlu1 %4183 }
 0x41e   : > { %v3942_v4 = vrot.slane %v3941_v5, 2 }
 0x420   : > { %v3943_v30 = vadd.f32 %v3942_v4, %v3941_v5  ;;  %v8091_v53 = vpop.permute.xlu1 %4187 }
 0x422   : > { %v3944_v33 = vrot.slane %v3943_v30, 1 }
 0x424   : > { %v3945_v31 = vadd.f32 %v3944_v33, %v3943_v30 }
 0x426   : > { %v3946_v54 = vmul.f32 0.00390625, %v3945_v31  ;;  %v8095_v31 = vpop.permute.xlu1 %4191 }
 0x428   : > { %4674 = vmatmul.mubr.msk.f32.vlgmr.msra.gmra.mrb[52].mxu0 %vm1600_vm6, %v3946_v54 }
 0x429   : > { %4678 = vmatprep.mubr.msk.f32.mxu0 %vm5564_vm1, %v5565_v55  ;;  %4677 = vmatpush3.msk.msra.mxu0 %vm8568_vm10, %v4024_v21  ;;  %v8085_v55 = vpop.permute.xlu0 %4181 }
 0x42a   : > { %v8099_v21 = vpop.permute.xlu1 %4195 }
 0x42d   : > { %v8089_v40 = vpop.permute.xlu0 %4185 }
 0x431   : > { %v8093_v33 = vpop.permute.xlu0 %4189 }
 0x435   : > { %v8097_v54 = vpop.permute.xlu0 %4193 }
 0x4fb   : > { %v4019_v43 = vpop.f32.mrb[52].mxu0 }
 0x4fc   : > { %v4020_v4 = vadd.f32 %v4019_v43, %v3949_v14  ;;  %v4675_v5 = vpop.f32.mrb[53].mxu0  ;;  %v8101_v14 = vpop.permute.xlu0 %4197 }
 0x4fd   : > { %v8103_v43 = vpop.permute.xlu1 %4199 }
 0x4fe   : > { %v4023_v30 = vmax.f32 %v4020_v4, 0.0 }
 0x500   : > { %4679 = vmatmul.mubr.msk.f32.vlgmr.msra.gmra.mrb[54].mxu0 %vm4026_vm12, %v4023_v30  ;;  %v8105_v4 = vpop.permute.xlu0 %4201 }
 0x501   : > { %v8107_v5 = vpop.permute.xlu1 %4203 }
 0x504   : > { %v8109_v30 = vpop.permute.xlu0 %4205 }
 0x505   : > { %v8111_v52 = vpop.permute.xlu1 %4207 }
 0x506   : > { %8569 = vst [vmem:[#allocation9_spill] sm:$0xff] %v8111_v52 }
 0x508   : > { %v8116_v51 = vpop.permute.xlu0 %4209 }
 0x509   : > { %8570 = vst [vmem:[#allocation8_spill] sm:$0xff] %v8116_v51  ;;  %v8118_v63 = vpop.permute.xlu1 %4211  ;;  %v8594_v51 = vmax.f32 %v7936_v56, 0.0 }
 0x50a   : > { %8571 = vst [vmem:[#allocation13_spill] sm:$0xff] %v8118_v63 }
 0x50c   : > { %v8120_v8 = vpop.permute.xlu0 %4213 }
 0x50d   : > { %8572 = vst [vmem:[#allocation12_spill] sm:$0xff] %v8120_v8  ;;  %v8122_v6 = vpop.permute.xlu1 %4215  ;;  %v8580_v8 = vmax.f32 %v7839_v47, 0.0  ;;  %v8587_v47 = vmax.f32 %v7883_v48, 0.0  ;;  %v8593_v48 = vmax.f32 %v7929_v36, 0.0  ;;  %v8600_v36 = vmax.f32 %v7981_v0, 0.0 }
 0x50e   : > { %8573 = vst [vmem:[#allocation17_spill] sm:$0xff] %v8122_v6 }
 0x510   : > { %v8124_v17 = vpop.permute.xlu0 %4217 }
 0x511   : > { %8574 = vst [vmem:[#allocation16_spill] sm:$0xff] %v8124_v17  ;;  %v8126_v62 = vpop.permute.xlu1 %4219 }
 0x512   : > { %8575 = vst [vmem:[#allocation21_spill] sm:$0xff] %v8126_v62  ;;  %v8581_v62 = vmax.f32 %v7835_v26, 0.0 }
 0x5d3   : > { %v4099_v44 = vpop.f32.mrb[54].mxu0 }
 0x5d4   : > { %v4100_v59 = vadd.f32 %v4099_v44, %v4025_v35  ;;  %v4680_v45 = vpop.f32.mrb[55].mxu0  ;;  %v8128_v44 = vpop.permute.xlu0 %4221  ;;  %v4110_v35 = vshrl.u32 %v4109_v28, 7  ;;  %v8584_v28 = vmax.f32 %v7858_v39, 0.0  ;;  %v8590_v39 = vmax.f32 %v7908_v24, 0.0 }
 0x5d5   : > { %8576 = vst [vmem:[#allocation20_spill] sm:$0xff] %v8128_v44  ;;  %v8130_v45 = vpop.permute.xlu1 %4223  ;;  %v8583_v44 = vmax.f32 %v7852_v15, 0.0  ;;  %v8589_v15 = vmax.f32 %v7897_v23, 0.0  ;;  %v8596_v23 = vmax.f32 %v7952_v10, 0.0  ;;  %v8597_v24 = vmax.f32 %v7961_v12, 0.0 }
 0x5d6   : > { %v4568_v29 = vmul.f32 -1.442695, %v4100_v59  ;;  %8577 = vst [vmem:[#allocation25_spill] sm:$0xff] %v8130_v45  ;;  %v4111_v57 = vsub.s32 0, %v4110_v35  ;;  %v8603_v10 = vmax.f32 %v8003_v7, 0.0 }
 0x5d8   : > { %5449 = vpow2.f32 %v4568_v29  ;;  %v8132_v59 = vpop.permute.xlu0 %4225 }
 0x5d9   : > { %8578 = vst [vmem:[#allocation7_spill] sm:$0xff] %v8132_v59  ;;  %v8134_v29 = vpop.permute.xlu1 %4227  ;;  %v8585_v59 = vmax.f32 %v7869_v16, 0.0  ;;  %v8591_v16 = vmax.f32 %v7916_v25, 0.0  ;;  %v8598_v25 = vmax.f32 %v7967_v13, 0.0 }
 0x5da   : > { %8579 = vst [vmem:[#allocation24_spill] sm:$0xff] %v8134_v29 }
 0x5dc   : > { %v4230_v26 = vpop.permute.xlu0 %4229 }
 0x5e2   : > { %v5450_v9 = vpop.eup %5449 }
 0x5e3   : > { %v4106_v3 = vadd.f32 1.0, %v5450_v9 }
 0x5e5   : > { %5451 = vrcp.f32 %v4106_v3  ;;  %v8582_v3 = vmax.f32 %v7842_v49, 0.0  ;;  %v8588_v49 = vmax.f32 %v7889_v50, 0.0  ;;  %v8595_v50 = vmax.f32 %v7945_v46, 0.0 }
 0x5e6   : > { %v8602_v46 = vmax.f32 %v7995_v60, 0.0 }
 0x5ef   : > { %v5452_v41 = vpop.eup %5451 }
 0x5f0   : > { %v4112_v6 = vrot.slane %v5452_v41, %v4111_v57  ;;  %v8586_v57 = vmax.f32 %v7875_v38, 0.0  ;;  %v8592_v38 = vmax.f32 %v7920_v22, 0.0  ;;  %v8599_v22 = vmax.f32 %v7975_v32, 0.0 }
 0x5f2   : > { %v4113_v17 = vmul.f32 %v4112_v6, %v8580_v8  ;;  %v4114_v9 = vmul.f32 %v4112_v6, %v8581_v62  ;;  %v4115_v63 = vmul.f32 %v4112_v6, %v8582_v3  ;;  %v4116_v45 = vmul.f32 %v4112_v6, %v8583_v44  ;;  %v4232_v62 = vpop.permute.xlu1 %4231 }
 0x5f3   : > { %v4117_v35 = vmul.f32 %v4112_v6, %v8584_v28  ;;  %v4118_v29 = vmul.f32 %v4112_v6, %v8585_v59  ;;  %v4119_v41 = vmul.f32 %v4112_v6, %v8586_v57  ;;  %v4120_v8 = vmul.f32 %v4112_v6, %v8587_v47 }
 0x5f4   : > { %v4121_v3 = vmul.f32 %v4112_v6, %v8588_v49  ;;  %v4122_v44 = vmul.f32 %v4112_v6, %v8589_v15  ;;  %v4123_v28 = vmul.f32 %v4112_v6, %v8590_v39  ;;  %v4124_v59 = vmul.f32 %v4112_v6, %v8591_v16 }
 0x5f5   : > { %v4125_v57 = vmul.f32 %v4112_v6, %v8592_v38  ;;  %v4126_v47 = vmul.f32 %v4112_v6, %v8593_v48  ;;  %v4127_v52 = vmul.f32 %v4112_v6, %v8594_v51  ;;  %v4128_v49 = vmul.f32 %v4112_v6, %v8595_v50 }
 0x5f6   : > { %v4129_v15 = vmul.f32 %v4112_v6, %v8596_v23  ;;  %v4130_v39 = vmul.f32 %v4112_v6, %v8597_v24  ;;  %v4131_v16 = vmul.f32 %v4112_v6, %v8598_v25  ;;  %v4132_v38 = vmul.f32 %v4112_v6, %v8599_v22 }
 0x5f7   : > { %v4133_v48 = vmul.f32 %v4112_v6, %v8600_v36  ;;  %v8601_v51 = vmax.f32 %v7989_v27, 0.0  ;;  %v4135_v50 = vmul.f32 %v4112_v6, %v8602_v46  ;;  %v4136_v12 = vmul.f32 %v4112_v6, %v8603_v10 }
 0x5f8   : > { %v8604_v23 = vmax.f32 %v8009_v20, 0.0  ;;  %v8605_v24 = vmax.f32 %v8017_v34, 0.0  ;;  %v8606_v25 = vmax.f32 %v8023_v19, 0.0  ;;  %v8607_v22 = vmax.f32 %v8031_v37, 0.0  ;;  %v4234_v34 = vpop.permute.xlu0 %4233 }
 0x5f9   : > { %v4134_v56 = vmul.f32 %v4112_v6, %v8601_v51  ;;  %v8608_v36 = vmax.f32 %v8037_v42, 0.0  ;;  %v8609_v51 = vmax.f32 %v8045_v11, 0.0  ;;  %v8610_v46 = vmax.f32 %v8058_v61, 0.0 }
 0x5fa   : > { %v4137_v13 = vmul.f32 %v4112_v6, %v8604_v23  ;;  %v4138_v32 = vmul.f32 %v4112_v6, %v8605_v24  ;;  %v4139_v0 = vmul.f32 %v4112_v6, %v8606_v25  ;;  %v4140_v27 = vmul.f32 %v4112_v6, %v8607_v22  ;;  %v4236_v24 = vpop.permute.xlu1 %4235 }
 0x5fb   : > { %v4141_v60 = vmul.f32 %v4112_v6, %v8608_v36  ;;  %v4142_v7 = vmul.f32 %v4112_v6, %v8609_v51  ;;  %v4143_v10 = vmul.f32 %v4112_v6, %v8610_v46  ;;  %v8611_v20 = vmax.f32 %v8062_v18, 0.0 }
 0x5fc   : > { %v4273_v19 = vadd.f32 %v8081_v58, %v4113_v17  ;;  %v4274_v25 = vadd.f32 %v8083_v1, %v4114_v9  ;;  %v4275_v37 = vadd.f32 %v8085_v55, %v4115_v63  ;;  %v4276_v42 = vadd.f32 %v8087_v2, %v4116_v45  ;;  %v8618_v45 = vld [vmem:[#allocation21_spill] sm:$0xff]  ;;  %v8619_v9 = vld [vmem:[#allocation20_spill] sm:$0xff] }
 0x5fd   : > { %v4144_v23 = vmul.f32 %v4112_v6, %v8611_v20  ;;  %v4277_v11 = vadd.f32 %v8089_v40, %v4117_v35  ;;  %v4278_v61 = vadd.f32 %v8091_v53, %v4118_v29  ;;  %v4279_v22 = vadd.f32 %v8093_v33, %v4119_v41  ;;  %v8612_v40 = vld [vmem:[#allocation9_spill] sm:$0xff]  ;;  %v8613_v33 = vld [vmem:[#allocation8_spill] sm:$0xff] }
 0x5fe   : > { %v4280_v6 = vadd.f32 %v8095_v31, %v4120_v8  ;;  %v4281_v18 = vadd.f32 %v8097_v54, %v4121_v3  ;;  %v4282_v17 = vadd.f32 %v8099_v21, %v4122_v44  ;;  %v4283_v58 = vadd.f32 %v8101_v14, %v4123_v28  ;;  %v8614_v54 = vld [vmem:[#allocation13_spill] sm:$0xff]  ;;  %v8615_v14 = vld [vmem:[#allocation12_spill] sm:$0xff]  ;;  %v4238_v3 = vpop.permute.xlu0 %4237  ;;  %v4240_v44 = vpop.permute.xlu1 %4239  ;;  %v8621_v28 = vld [vmem:[#allocation7_spill] sm:$0xff] }
 0x5ff   : > { %v4284_v1 = vadd.f32 %v8103_v43, %v4124_v59  ;;  %v8214_v63 = vadd.f32 %v8105_v4, %v4125_v57  ;;  %v8217_v55 = vadd.f32 %v8107_v5, %v4126_v47  ;;  %v8220_v2 = vadd.f32 %v8109_v30, %v4127_v52  ;;  %v8616_v4 = vld [vmem:[#allocation17_spill] sm:$0xff]  ;;  %v8617_v52 = vld [vmem:[#allocation16_spill] sm:$0xff] }
 0x600   : > { %v8223_v53 = vadd.f32 %v8612_v40, %v4128_v49  ;;  %v8230_v31 = vadd.f32 %v8613_v33, %v4129_v15  ;;  %v8233_v21 = vadd.f32 %v8614_v54, %v4130_v39  ;;  %v8236_v43 = vadd.f32 %v8615_v14, %v4131_v16  ;;  %v8620_v41 = vld [vmem:[#allocation25_spill] sm:$0xff]  ;;  %v8622_v57 = vld [vmem:[#allocation24_spill] sm:$0xff] }
 0x601   : > { %v8239_v5 = vadd.f32 %v8616_v4, %v4132_v38  ;;  %v8242_v30 = vadd.f32 %v8617_v52, %v4133_v48  ;;  %v8245_v29 = vadd.f32 %v8618_v45, %v4134_v56  ;;  %v8248_v35 = vadd.f32 %v8619_v9, %v4135_v50 }
 0x602   : > { %v8251_v8 = vadd.f32 %v8620_v41, %v4136_v12  ;;  %v8254_v59 = vadd.f32 %v8621_v28, %v4137_v13  ;;  %v8257_v47 = vadd.f32 %v8622_v57, %v4138_v32  ;;  %v8259_v49 = vadd.f32 %v4230_v26, %v4139_v0 }
 0x603   : > { %v8261_v15 = vadd.f32 %v4232_v62, %v4140_v27  ;;  %v8263_v39 = vadd.f32 %v4234_v34, %v4141_v60  ;;  %v8265_v16 = vadd.f32 %v4236_v24, %v4142_v7  ;;  %v8267_v38 = vadd.f32 %v4238_v3, %v4143_v10 }
 0x604   : > { %v8269_v48 = vadd.f32 %v4240_v44, %v4144_v23  ;;  %v4305_v56 = vmax.f32 %v4273_v19, 0.0  ;;  %v4306_v50 = vmax.f32 %v4274_v25, 0.0  ;;  %v4307_v12 = vmax.f32 %v4275_v37, 0.0 }
 0x605   : > { %v4308_v13 = vmax.f32 %v4276_v42, 0.0  ;;  %v4309_v36 = vmax.f32 %v4277_v11, 0.0  ;;  %v4310_v32 = vmax.f32 %v4278_v61, 0.0  ;;  %v4311_v51 = vmax.f32 %v4279_v22, 0.0 }
 0x606   : > { %v4312_v26 = vmax.f32 %v4280_v6, 0.0  ;;  %v4313_v0 = vmax.f32 %v4281_v18, 0.0  ;;  %v4314_v62 = vmax.f32 %v4282_v17, 0.0  ;;  %v4315_v27 = vmax.f32 %v4283_v58, 0.0  ;;  %4337 = vst.msk [vmem:[%s8272_s14] sm:$0xff] %vm1600_vm6, %v4305_v56  ;;  %4338 = vst.msk [vmem:[%s8272_s14 + $0x8] sm:$0xff] %vm1600_vm6, %v4306_v50 }
 0x607   : > { %v4316_v60 = vmax.f32 %v4284_v1, 0.0  ;;  %4339 = vst.msk [vmem:[%s8272_s14 + $0x10] sm:$0xff] %vm1600_vm6, %v4307_v12  ;;  %4340 = vst.msk [vmem:[%s8272_s14 + $0x18] sm:$0xff] %vm1600_vm6, %v4308_v13  ;;  %v4317_v7 = vmax.f32 %v8214_v63, 0.0  ;;  %v4318_v46 = vmax.f32 %v8217_v55, 0.0  ;;  %v4319_v10 = vmax.f32 %v8220_v2, 0.0 }
 0x608   : > { %v4320_v20 = vmax.f32 %v8223_v53, 0.0  ;;  %4341 = vst.msk [vmem:[%s8272_s14 + $0x20] sm:$0xff] %vm1600_vm6, %v4309_v36  ;;  %4342 = vst.msk [vmem:[%s8272_s14 + $0x28] sm:$0xff] %vm1600_vm6, %v4310_v32  ;;  %v4321_v23 = vmax.f32 %v8230_v31, 0.0  ;;  %v4322_v34 = vmax.f32 %v8233_v21, 0.0  ;;  %v4323_v24 = vmax.f32 %v8236_v43, 0.0 }
 0x609   : > { %4343 = vst.msk [vmem:[%s8272_s14 + $0x30] sm:$0xff] %vm1600_vm6, %v4311_v51  ;;  %4344 = vst.msk [vmem:[%s8272_s14 + $0x38] sm:$0xff] %vm1600_vm6, %v4312_v26  ;;  %v4324_v19 = vmax.f32 %v8239_v5, 0.0  ;;  %v4325_v25 = vmax.f32 %v8242_v30, 0.0  ;;  %v4326_v37 = vmax.f32 %v8245_v29, 0.0  ;;  %v4327_v42 = vmax.f32 %v8248_v35, 0.0 }
 0x60a   : > { %4345 = vst.msk [vmem:[%s8272_s14 + $0x40] sm:$0xff] %vm1600_vm6, %v4313_v0  ;;  %4346 = vst.msk [vmem:[%s8272_s14 + $0x48] sm:$0xff] %vm1600_vm6, %v4314_v62  ;;  %v4328_v11 = vmax.f32 %v8251_v8, 0.0  ;;  %v4329_v61 = vmax.f32 %v8254_v59, 0.0  ;;  %v4330_v22 = vmax.f32 %v8257_v47, 0.0  ;;  %v4331_v6 = vmax.f32 %v8259_v49, 0.0 }
 0x60b   : > { %4347 = vst.msk [vmem:[%s8272_s14 + $0x50] sm:$0xff] %vm1600_vm6, %v4315_v27  ;;  %4348 = vst.msk [vmem:[%s8272_s14 + $0x58] sm:$0xff] %vm1600_vm6, %v4316_v60  ;;  %v4332_v18 = vmax.f32 %v8261_v15, 0.0  ;;  %v4333_v17 = vmax.f32 %v8263_v39, 0.0  ;;  %v4334_v58 = vmax.f32 %v8265_v16, 0.0  ;;  %v4335_v1 = vmax.f32 %v8267_v38, 0.0 }
 0x60c   : > { %4349 = vst.msk [vmem:[%s8272_s14 + $0x60] sm:$0xff] %vm1600_vm6, %v4317_v7  ;;  %4350 = vst.msk [vmem:[%s8272_s14 + $0x68] sm:$0xff] %vm1600_vm6, %v4318_v46  ;;  %v4336_v63 = vmax.f32 %v8269_v48, 0.0 }
 0x60d   : > { %4351 = vst.msk [vmem:[%s8272_s14 + $0x70] sm:$0xff] %vm1600_vm6, %v4319_v10  ;;  %4352 = vst.msk [vmem:[%s8272_s14 + $0x78] sm:$0xff] %vm1600_vm6, %v4320_v20 }
 0x60e   : > { %4353 = vst.msk [vmem:[%s8272_s14 + $0x80] sm:$0xff] %vm1600_vm6, %v4321_v23  ;;  %4354 = vst.msk [vmem:[%s8272_s14 + $0x88] sm:$0xff] %vm1600_vm6, %v4322_v34 }
 0x60f   : > { %4355 = vst.msk [vmem:[%s8272_s14 + $0x90] sm:$0xff] %vm1600_vm6, %v4323_v24  ;;  %4356 = vst.msk [vmem:[%s8272_s14 + $0x98] sm:$0xff] %vm1600_vm6, %v4324_v19 }
 0x610   : > { %4357 = vst.msk [vmem:[%s8272_s14 + $0xa0] sm:$0xff] %vm1600_vm6, %v4325_v25  ;;  %4358 = vst.msk [vmem:[%s8272_s14 + $0xa8] sm:$0xff] %vm1600_vm6, %v4326_v37 }
 0x611   : > { %4359 = vst.msk [vmem:[%s8272_s14 + $0xb0] sm:$0xff] %vm1600_vm6, %v4327_v42  ;;  %4360 = vst.msk [vmem:[%s8272_s14 + $0xb8] sm:$0xff] %vm1600_vm6, %v4328_v11 }
 0x612   : > { %4361 = vst.msk [vmem:[%s8272_s14 + $0xc0] sm:$0xff] %vm1600_vm6, %v4329_v61  ;;  %4362 = vst.msk [vmem:[%s8272_s14 + $0xc8] sm:$0xff] %vm1600_vm6, %v4330_v22 }
 0x613   : > { %4363 = vst.msk [vmem:[%s8272_s14 + $0xd0] sm:$0xff] %vm1600_vm6, %v4331_v6  ;;  %4364 = vst.msk [vmem:[%s8272_s14 + $0xd8] sm:$0xff] %vm1600_vm6, %v4332_v18 }
 0x614   : > { %4365 = vst.msk [vmem:[%s8272_s14 + $0xe0] sm:$0xff] %vm1600_vm6, %v4333_v17  ;;  %4366 = vst.msk [vmem:[%s8272_s14 + $0xe8] sm:$0xff] %vm1600_vm6, %v4334_v58 }
 0x615   : > { %4367 = vst.msk [vmem:[%s8272_s14 + $0xf0] sm:$0xff] %vm1600_vm6, %v4335_v1  ;;  %4368 = vst.msk [vmem:[%s8272_s14 + $0xf8] sm:$0xff] %vm1600_vm6, %v4336_v63 }
 0x616   : > { %5498 = shalt.err (!%p5495_p3)
}
 0x617   : > { %s5499_s29 = scalar_lea.hbm %s8335_s26, 4096  ;;  %s5503_s17 = scalar_lea.hbm %s8420_s9, 8192 }
 0x618   : > { %p5500_p4 = scmp.ne.s32.totalorder %s8335_s26, %s5499_s29  ;;  %p5504_p9 = scmp.lt.u32.totalorder %s8335_s26, %s8420_s9 }
 0x619   : > { %p5505_p10 = scmp.lt.u32.totalorder %s5503_s17, %s5499_s29  ;;  %p5507_p12 = scmp.lt.u32.totalorder %s5499_s29, %s8335_s26 }
 0x61a   : > { %p5501_p7 = pnand %p5500_p4, %p5656_p5 }
 0x61b   : > { %p5506_p11 = por %p5505_p10, %p5504_p9 }
 0x61c   : > { %p5502_p8 = pneg %p5501_p7 }
 0x61d   : > { %p5508_p13 = por %p5507_p12, %p5506_p11 }
 0x61f   : > { %p5509_p0 = pnand %p5508_p13, %p5502_p8 }
 0x621   : > { %5512 = shalt.err (!%p5509_p0)
}
 0x622   : > { %s5567_s23 = smov 128  }
 0x623   : > { %4704 = dma.vmem_to_hbm [thread:$0]  (%p5656_p5), %s8349_s13, 4096, %s8335_s26, %s8369_s28, %s5567_s23, %s5567_s23, %s5550_s27  }
 0x624 PF: > { %p4710_p1 = scmp.ge.s32.totalorder %s5547_s12, 2  ;;  %s4398_s16 = sand.u32 1, %s5535_s30  }
 0x625   : > { %s4399_s22 = scalar_lea.sflag [#allocation4], %s4398_s16 }
 0x626   : > { %p4707_p2 = pnand %p4710_p1, %p5660_p6 }
 0x628   : > { %5530 = dma.done.wait (!%p4707_p2), %s4399_s22, 4096  }
 0x629   : > { %5532 = vsyncadd (!%p4707_p2), %s4399_s22, 4294963200  ;;  %p19_p3 = scmp.ge.s32.totalorder %s5643_s15, 4   ;;  %s8623_s30 = smov %s5539_s10 }
 0x62a   : > { %s8624_s10 = smov %s5543_s11  ;;  %s8625_s11 = smov %s5654_s18 }
 0x62b   : > { %s8626_s12 = smov %s5643_s15  ;;  %21 = sbr.rel (!%p19_p3) target bundleno = 3 (0x3), region = 93 }
 0x632   :  { %4404 = vsyncpa [#allocation4], 1 }
 0x633   :  { %4406 = vsyncpa [#allocation4 + $0x1], 1 }

</bundles_post_ra>
